<compile_context>
chip_gen: v6e
topology: v6e:2x2x1
jax: 0.10.0
libtpu: 0.0.40
codegen_flags: <defaults>
</compile_context>

<pallas_src>
import functools
import math

import numpy as np
import jax
import jax.numpy as jnp
from jax import lax
from jax.experimental import pallas as pl
from jax.experimental.pallas import tpu as pltpu

LANE = 128


def _round_up(x, m):
    return (x + m - 1) // m * m


def _vmem_tile_bytes(shape, itemsize):
    """VMEM footprint of a resident array, including lane (128) and sublane padding."""
    shape = tuple(int(s) for s in shape)
    if len(shape) == 1:
        lead, rows, cols = 1, 1, shape[0]
    else:
        lead = int(np.prod(shape[:-2])) if len(shape) > 2 else 1
        rows, cols = shape[-2], shape[-1]
    sub = {4: 8, 2: 16, 1: 32}.get(itemsize, 8)
    return lead * _round_up(rows, sub) * _round_up(cols, LANE) * itemsize


def _vmem_capacity_bytes():
    try:
        cap = getattr(pltpu.get_tpu_info(), "vmem_capacity_bytes", None)
        if cap:
            return int(cap)
    except Exception:
        pass
    return 64 * 1024 * 1024  # conservative fallback (v7x per-core VMEM)


def _lstmnet_kernel(nlayers, T, Nt, In, Hp, out_pad, *refs):
    """refs = [x, (wx_l, whh_l, bx_l)*nlayers, wd, bd, out, seq_scratch, gate_scratch]."""
    x_ref = refs[0]
    layer_refs = refs[1:1 + 3 * nlayers]
    wd_ref = refs[1 + 3 * nlayers]
    bd_ref = refs[2 + 3 * nlayers]
    out_ref = refs[3 + 3 * nlayers]
    seq_ref = refs[4 + 3 * nlayers]      # (T*Nt, Hp)   bf16: inter-layer hidden sequence
    gx_ref = refs[5 + 3 * nlayers]       # (T*Nt, 4*Hp) bf16: hoisted input-side gate pre-acts

    H3 = 3 * Hp
    unroll = True if T <= 16 else 4

    for l in range(nlayers):
        wx_ref = layer_refs[3 * l]
        whh_ref = layer_refs[3 * l + 1]
        bx_ref = layer_refs[3 * l + 2]
        bx = bx_ref[...]                                      # (1, 4Hp) f32

        # (1) Hoisted input-side gate projection (off the serial path), chunked per
        #     timestep so the f32 matmul intermediate stays bounded at (Nt, 4Hp).
        for t in range(T):
            row = t * Nt
            inp = x_ref[t] if l == 0 else seq_ref[pl.ds(row, Nt), :]
            gx_ref[pl.ds(row, Nt), :] = (
                jnp.dot(inp, wx_ref[...], preferred_element_type=jnp.float32) + bx
            ).astype(jnp.bfloat16)

        whh = whh_ref[...]                                    # bf16 (Hp, 4Hp), hoisted load

        # (2) Serial recurrence.  Gate columns are (i,f,o,g), each padded to its own
        #     128-lane group (lane-aligned slices), and the i/f/o columns carry a
        #     folded 0.5 pre-scale, so the whole (Nt, 4Hp) pre-activation needs ONE
        #     tanh (EUP) push; sigmoid(z) = 0.5*tanh(0.5*z)+0.5 finishes on the VPU.
        def body(t, carry, whh=whh):
            h, c = carry                                      # f32 (Nt, Hp)
            row = pl.multiple_of(t * Nt, Nt)
            gates = gx_ref[pl.ds(row, Nt), :].astype(jnp.float32) + jnp.dot(
                h.astype(jnp.bfloat16), whh, preferred_element_type=jnp.float32)
            tg = jnp.tanh(gates)                              # single EUP push (Nt, 4Hp)
            sg = 0.5 * tg[:, :H3] + 0.5                       # sigmoid(i,f,o): VALU only
            i_g = sg[:, :Hp]
            f_g = sg[:, Hp:2 * Hp]
            o_g = sg[:, 2 * Hp:]
            g_g = tg[:, H3:]
            c = f_g * c + i_g * g_g
            h = o_g * jnp.tanh(c)
            seq_ref[pl.ds(row, Nt), :] = h.astype(jnp.bfloat16)
            return h, c

        carry0 = (jnp.zeros((Nt, Hp), jnp.float32),
                  jnp.zeros((Nt, Hp), jnp.float32))
        lax.fori_loop(0, T, body, carry0, unroll=unroll)

    # (3) Hoisted decoder, emitted BATCH-major into a lane-dense 2D block:
    #     out[:, t*128:(t+1)*128] = h_t @ Wd + bd.  The wrapper only reshapes and
    #     slices -- no full-tensor transpose pass over the padded output.
    wd = wd_ref[...]
    bd = bd_ref[...]
    for t in range(T):
        row = t * Nt
        dec = jnp.dot(seq_ref[pl.ds(row, Nt), :], wd,
                      preferred_element_type=jnp.float32) + bd
        out_ref[:, pl.ds(t * out_pad, out_pad)] = dec.astype(out_ref.dtype)


def _prep_weights(params, nlayers, H, Hp, output_dim, out_pad):
    """Gate reorder (i,f,g,o)->(i,f,o,g), per-gate 128-lane padding, 0.5 fold on i/f/o
    columns (sigmoid-via-tanh), embed folded into layer 0, decoder padded, bf16 cast."""

    def reorder(w):  # columns (.., 4H) in PyTorch (i,f,g,o) order
        return jnp.concatenate(
            [w[..., :2 * H], w[..., 3 * H:4 * H], w[..., 2 * H:3 * H]], axis=-1)

    def pad_gates(w, row_pad):
        rows = w.shape[0]
        out = jnp.zeros((row_pad, 4 * Hp), jnp.float32)
        for g in range(4):
            scale = 0.5 if g < 3 else 1.0          # i/f/o pre-scaled for sigmoid-via-tanh
            out = out.at[:rows, g * Hp:g * Hp + H].set(scale * w[:, g * H:(g + 1) * H])
        return out

    prepped = []
    for l in range(nlayers):
        wih = reorder(params[f'wih_{l}'])
        whh = reorder(params[f'whh_{l}'])
        b = reorder(params[f'b_{l}'])
        if l == 0:
            wx = params['we'] @ wih                           # (input_dim, 4H)
            bx = params['be'] @ wih + b                       # (1, 4H)
            wx_rows = wx.shape[0]
        else:
            wx, bx = wih, b
            wx_rows = Hp                                      # consumes the padded hidden
        prepped += [pad_gates(wx, wx_rows).astype(jnp.bfloat16),
                    pad_gates(whh, Hp).astype(jnp.bfloat16),
                    pad_gates(bx, 1).astype(jnp.float32)]
    wd = jnp.zeros((Hp, out_pad), jnp.float32).at[:H, :output_dim].set(params['wd'])
    bd = jnp.zeros((1, out_pad), jnp.float32).at[:, :output_dim].set(params['bd'][0])
    prepped += [wd.astype(jnp.bfloat16), bd]
    return prepped


def lstmnet_forward(x, params, *, nlayers, lstm_hidden_dim, output_dim):
    lead = x.shape[:-2]
    T, In = x.shape[-2], x.shape[-1]
    N = int(np.prod(lead)) if lead else 1
    H = lstm_hidden_dim
    Hp = _round_up(H, LANE)                  # per-gate lane group (H < 128 -> pad to 128)
    out_pad = _round_up(output_dim, LANE)

    weights = _prep_weights(params, nlayers, H, Hp, output_dim, out_pad)

    # ---- VMEM-aware batch-tile selection (lane/sublane padding included) ----
    vmem_cap = _vmem_capacity_bytes()
    two_cores = vmem_cap <= 80 * 1024 * 1024          # v7x: 64 MiB VMEM, 2 TCs/chip
    vmem_limit = max(32 * 1024 * 1024,
                     min(100 * 1024 * 1024, vmem_cap - 16 * 1024 * 1024))

    # Bytes that scale with one batch row of the tile (x2 = double-buffered blocks):
    per_row = (2 * 2 * T * _round_up(In, LANE)        # x block, bf16
               + 2 * 2 * T * out_pad                  # out block, bf16
               + 2 * T * Hp                           # seq scratch, bf16
               + 2 * T * 4 * Hp)                      # gate scratch, bf16
    weight_bytes = 2 * sum(_vmem_tile_bytes(w.shape, w.dtype.itemsize) for w in weights)
    headroom = 16 * 1024 * 1024                       # f32 matmul temps + compiler scratch
    budget = max(0, vmem_limit - weight_bytes - headroom)

    nt_cap = 1024 if vmem_cap >= 96 * 1024 * 1024 else 512
    nt_budget = max(16, (budget // max(per_row, 1)) // 16 * 16)
    Nt = int(max(16, min(nt_cap, nt_budget, _round_up(N, 16))))
    Npad = _round_up(N, Nt)

    # Megacore: only on 2-core chips, make sure the "parallel" grid has >= 2 steps.
    if two_cores and Npad // Nt < 2 and Npad >= 32:
        Nt = max(16, _round_up(-(-Npad // 2), 16))
        Npad = _round_up(N, Nt)

    x_flat = x.reshape(N, T, In)
    if Npad != N:
        x_flat = jnp.pad(x_flat, ((0, Npad - N), (0, 0), (0, 0)))
    x_tm = jnp.transpose(x_flat, (1, 0, 2)).astype(jnp.bfloat16)   # (T, Npad, In)

    inputs = [x_tm] + weights
    in_specs = [pl.BlockSpec((T, Nt, In), lambda n: (0, n, 0))]
    for w in weights:
        in_specs.append(pl.BlockSpec(w.shape, lambda n: (0, 0)))

    kernel = functools.partial(_lstmnet_kernel, nlayers, T, Nt, In, Hp, out_pad)
    out2d = pl.pallas_call(
        kernel,
        out_shape=jax.ShapeDtypeStruct((Npad, T * out_pad), jnp.bfloat16),
        grid=(Npad // Nt,),
        in_specs=in_specs,
        out_specs=pl.BlockSpec((Nt, T * out_pad), lambda n: (n, 0)),
        scratch_shapes=[
            pltpu.VMEM((T * Nt, Hp), jnp.bfloat16),       # inter-layer hidden sequence
            pltpu.VMEM((T * Nt, 4 * Hp), jnp.bfloat16),   # hoisted gate pre-activations
        ],
        compiler_params=pltpu.CompilerParams(
            dimension_semantics=("parallel",),
            vmem_limit_bytes=int(vmem_limit),
        ),
    )(*inputs)

    out = out2d.reshape(Npad, T, out_pad)[:N, :, :output_dim].astype(jnp.float32)
    return out.reshape(*lead, T, output_dim)


def lstmnet_ref(x, params, *, nlayers, hidden_dim, lstm_hidden_dim, output_dim):
    """Pure-JAX f32 reference mirroring the PyTorch forward."""
    lead = x.shape[:-2]
    T = x.shape[-2]
    emb = jnp.einsum('...ti,ih->...th', x, params['we']) + params['be'][0]
    layer_in = emb.reshape(-1, T, hidden_dim)                 # (N, T, hidden_dim)
    H = lstm_hidden_dim
    for l in range(nlayers):
        wih = params[f'wih_{l}']
        whh = params[f'whh_{l}']
        b = params[f'b_{l}'][0]

        def step(carry, x_t, wih=wih, whh=whh, b=b):
            h, c = carry
            gates = x_t @ wih + h @ whh + b
            i = jax.nn.sigmoid(gates[:, :H])
            f = jax.nn.sigmoid(gates[:, H:2 * H])
            g = jnp.tanh(gates[:, 2 * H:3 * H])
            o = jax.nn.sigmoid(gates[:, 3 * H:])
            c = f * c + i * g
            h = o * jnp.tanh(c)
            return (h, c), h

        Nb = layer_in.shape[0]
        carry0 = (jnp.zeros((Nb, H), jnp.float32), jnp.zeros((Nb, H), jnp.float32))
        _, hs = lax.scan(step, carry0, jnp.swapaxes(layer_in, 0, 1))  # (T, N, H)
        layer_in = jnp.swapaxes(hs, 0, 1)
    out = layer_in @ params['wd'] + params['bd'][0]
    return out.reshape(*lead, T, output_dim)


if __name__ == "__main__":
    # Module hyper-parameters (small, consistent with the forward pass).
    B, T = 2, 8
    input_dim, hidden_dim = 4, 32
    lstm_hidden_dim, output_dim, nlayers = 32, 8, 2
    dropout = 0.0  # eval semantics; unused

    key = jax.random.PRNGKey(0)
    n_param_keys = 2 + 3 * nlayers + 2
    keys = jax.random.split(key, n_param_keys + 1)
    x_key, pkeys = keys[0], keys[1:]

    def uinit(k, shape, fan_in):
        bound = 1.0 / math.sqrt(fan_in)
        return jax.random.uniform(k, shape, jnp.float32, -bound, bound)

    params = {}
    ki = 0
    params['we'] = uinit(pkeys[ki], (input_dim, hidden_dim), input_dim); ki += 1
    params['be'] = uinit(pkeys[ki], (1, hidden_dim), input_dim); ki += 1
    for l in range(nlayers):
        in_l = hidden_dim if l == 0 else lstm_hidden_dim
        params[f'wih_{l}'] = uinit(pkeys[ki], (in_l, 4 * lstm_hidden_dim),
                                   lstm_hidden_dim); ki += 1
        params[f'whh_{l}'] = uinit(pkeys[ki], (lstm_hidden_dim, 4 * lstm_hidden_dim),
                                   lstm_hidden_dim); ki += 1
        params[f'b_{l}'] = uinit(pkeys[ki], (1, 4 * lstm_hidden_dim),
                                 lstm_hidden_dim); ki += 1
    params['wd'] = uinit(pkeys[ki], (lstm_hidden_dim, output_dim),
                         lstm_hidden_dim); ki += 1
    params['bd'] = uinit(pkeys[ki], (1, output_dim), lstm_hidden_dim); ki += 1

    x = jax.random.normal(x_key, (B, T, input_dim), jnp.float32)

    out = lstmnet_forward(x, params, nlayers=nlayers,
                          lstm_hidden_dim=lstm_hidden_dim, output_dim=output_dim)
    out = jax.block_until_ready(out)
    assert out.shape == (B, T, output_dim), out.shape

    ref = lstmnet_ref(x, params, nlayers=nlayers, hidden_dim=hidden_dim,
                      lstm_hidden_dim=lstm_hidden_dim, output_dim=output_dim)
    # Tolerance reflects bf16 MXU operands / bf16 gate scratch / bf16 output
    # (f32 accumulation and f32 (h, c) carries) vs the f32 reference.
    np.testing.assert_allclose(np.asarray(out), np.asarray(ref),
                               rtol=2e-2, atol=2e-2)
    print("KERNEL_OK")
</pallas_src>

<mosaic_0001>
module attributes {stable_mosaic.version = 11 : i64} {
  func.func @_lstmnet_kernel(%arg0: i32, %arg1: memref<8x16x4xbf16, #tpu.memory_space<vmem>>, %arg2: memref<4x512xbf16, #tpu.memory_space<vmem>>, %arg3: memref<128x512xbf16, #tpu.memory_space<vmem>>, %arg4: memref<1x512xf32, #tpu.memory_space<vmem>>, %arg5: memref<128x512xbf16, #tpu.memory_space<vmem>>, %arg6: memref<128x512xbf16, #tpu.memory_space<vmem>>, %arg7: memref<1x512xf32, #tpu.memory_space<vmem>>, %arg8: memref<128x128xbf16, #tpu.memory_space<vmem>>, %arg9: memref<1x128xf32, #tpu.memory_space<vmem>>, %arg10: memref<16x1024xbf16, #tpu.memory_space<vmem>>, %arg11: memref<128x128xbf16, #tpu.memory_space<vmem>>, %arg12: memref<128x512xbf16, #tpu.memory_space<vmem>>) attributes {dimension_semantics = [#tpu.dimension_semantics<parallel>], iteration_bounds = array<i64: 1>, scalar_prefetch = 0 : i64, scratch_operands = 2 : i64, tpu.core_type = #tpu.core_type<tc>, window_params = [{transform_indices = @transform_0, window_bounds = array<i64: 8, 16, 4>}, {pipeline_mode = #tpu.pipeline_mode<synchronous>, transform_indices = @transform_1, window_bounds = array<i64: 4, 512>}, {pipeline_mode = #tpu.pipeline_mode<synchronous>, transform_indices = @transform_2, window_bounds = array<i64: 128, 512>}, {pipeline_mode = #tpu.pipeline_mode<synchronous>, transform_indices = @transform_3, window_bounds = array<i64: 1, 512>}, {pipeline_mode = #tpu.pipeline_mode<synchronous>, transform_indices = @transform_4, window_bounds = array<i64: 128, 512>}, {pipeline_mode = #tpu.pipeline_mode<synchronous>, transform_indices = @transform_5, window_bounds = array<i64: 128, 512>}, {pipeline_mode = #tpu.pipeline_mode<synchronous>, transform_indices = @transform_6, window_bounds = array<i64: 1, 512>}, {pipeline_mode = #tpu.pipeline_mode<synchronous>, transform_indices = @transform_7, window_bounds = array<i64: 128, 128>}, {pipeline_mode = #tpu.pipeline_mode<synchronous>, transform_indices = @transform_8, window_bounds = array<i64: 1, 128>}, {transform_indices = @transform_9, window_bounds = array<i64: 16, 1024>}]} {
    %c0 = arith.constant 0 : index
    %c0_0 = arith.constant 0 : index
    %0 = vector.load %arg4[%c0, %c0_0] : memref<1x512xf32, #tpu.memory_space<vmem>>, vector<1x512xf32>
    %c0_1 = arith.constant 0 : index
    %c0_2 = arith.constant 0 : index
    %c0_3 = arith.constant 0 : index
    %1 = vector.load %arg1[%c0_1, %c0_2, %c0_3] : memref<8x16x4xbf16, #tpu.memory_space<vmem>>, vector<1x16x4xbf16>
    %2 = vector.shape_cast %1 : vector<1x16x4xbf16> to vector<16x4xbf16>
    %c0_4 = arith.constant 0 : index
    %c0_5 = arith.constant 0 : index
    %3 = vector.load %arg2[%c0_4, %c0_5] : memref<4x512xbf16, #tpu.memory_space<vmem>>, vector<4x512xbf16>
    %cst = arith.constant dense<0.000000e+00> : vector<16x512xf32>
    %4 = tpu.matmul %2, %3, %cst {dimension_numbers = #tpu.dot_dimension_numbers<[1], [0], [0], [1], [0, 0, 1, 1], [], []>} : vector<16x4xbf16>, vector<4x512xbf16>, vector<16x512xf32> -> vector<16x512xf32>
    %5 = vector.broadcast %0 : vector<1x512xf32> to vector<16x512xf32>
    %6 = arith.addf %4, %5 : vector<16x512xf32>
    %7 = arith.truncf %6 : vector<16x512xf32> to vector<16x512xbf16>
    %c0_6 = arith.constant 0 : index
    %c0_7 = arith.constant 0 : index
    %8 = vector.load %arg12[%c0_6, %c0_7] : memref<128x512xbf16, #tpu.memory_space<vmem>>, vector<16x512xbf16>
    tpu.vector_store %arg12[%c0_6, %c0_7], %7 {strides = array<i32>} : memref<128x512xbf16, #tpu.memory_space<vmem>>, vector<16x512xbf16>,
    %c1 = arith.constant 1 : index
    %c0_8 = arith.constant 0 : index
    %c0_9 = arith.constant 0 : index
    %9 = vector.load %arg1[%c1, %c0_8, %c0_9] : memref<8x16x4xbf16, #tpu.memory_space<vmem>>, vector<1x16x4xbf16>
    %10 = vector.shape_cast %9 : vector<1x16x4xbf16> to vector<16x4xbf16>
    %c0_10 = arith.constant 0 : index
    %c0_11 = arith.constant 0 : index
    %11 = vector.load %arg2[%c0_10, %c0_11] : memref<4x512xbf16, #tpu.memory_space<vmem>>, vector<4x512xbf16>
    %cst_12 = arith.constant dense<0.000000e+00> : vector<16x512xf32>
    %12 = tpu.matmul %10, %11, %cst_12 {dimension_numbers = #tpu.dot_dimension_numbers<[1], [0], [0], [1], [0, 0, 1, 1], [], []>} : vector<16x4xbf16>, vector<4x512xbf16>, vector<16x512xf32> -> vector<16x512xf32>
    %13 = vector.broadcast %0 : vector<1x512xf32> to vector<16x512xf32>
    %14 = arith.addf %12, %13 : vector<16x512xf32>
    %15 = arith.truncf %14 : vector<16x512xf32> to vector<16x512xbf16>
    %c16 = arith.constant 16 : index
    %c0_13 = arith.constant 0 : index
    %16 = vector.load %arg12[%c16, %c0_13] : memref<128x512xbf16, #tpu.memory_space<vmem>>, vector<16x512xbf16>
    tpu.vector_store %arg12[%c16, %c0_13], %15 {strides = array<i32>} : memref<128x512xbf16, #tpu.memory_space<vmem>>, vector<16x512xbf16>,
    %c2 = arith.constant 2 : index
    %c0_14 = arith.constant 0 : index
    %c0_15 = arith.constant 0 : index
    %17 = vector.load %arg1[%c2, %c0_14, %c0_15] : memref<8x16x4xbf16, #tpu.memory_space<vmem>>, vector<1x16x4xbf16>
    %18 = vector.shape_cast %17 : vector<1x16x4xbf16> to vector<16x4xbf16>
    %c0_16 = arith.constant 0 : index
    %c0_17 = arith.constant 0 : index
    %19 = vector.load %arg2[%c0_16, %c0_17] : memref<4x512xbf16, #tpu.memory_space<vmem>>, vector<4x512xbf16>
    %cst_18 = arith.constant dense<0.000000e+00> : vector<16x512xf32>
    %20 = tpu.matmul %18, %19, %cst_18 {dimension_numbers = #tpu.dot_dimension_numbers<[1], [0], [0], [1], [0, 0, 1, 1], [], []>} : vector<16x4xbf16>, vector<4x512xbf16>, vector<16x512xf32> -> vector<16x512xf32>
    %21 = vector.broadcast %0 : vector<1x512xf32> to vector<16x512xf32>
    %22 = arith.addf %20, %21 : vector<16x512xf32>
    %23 = arith.truncf %22 : vector<16x512xf32> to vector<16x512xbf16>
    %c32 = arith.constant 32 : index
    %c0_19 = arith.constant 0 : index
    %24 = vector.load %arg12[%c32, %c0_19] : memref<128x512xbf16, #tpu.memory_space<vmem>>, vector<16x512xbf16>
    tpu.vector_store %arg12[%c32, %c0_19], %23 {strides = array<i32>} : memref<128x512xbf16, #tpu.memory_space<vmem>>, vector<16x512xbf16>,
    %c3 = arith.constant 3 : index
    %c0_20 = arith.constant 0 : index
    %c0_21 = arith.constant 0 : index
    %25 = vector.load %arg1[%c3, %c0_20, %c0_21] : memref<8x16x4xbf16, #tpu.memory_space<vmem>>, vector<1x16x4xbf16>
    %26 = vector.shape_cast %25 : vector<1x16x4xbf16> to vector<16x4xbf16>
    %c0_22 = arith.constant 0 : index
    %c0_23 = arith.constant 0 : index
    %27 = vector.load %arg2[%c0_22, %c0_23] : memref<4x512xbf16, #tpu.memory_space<vmem>>, vector<4x512xbf16>
    %cst_24 = arith.constant dense<0.000000e+00> : vector<16x512xf32>
    %28 = tpu.matmul %26, %27, %cst_24 {dimension_numbers = #tpu.dot_dimension_numbers<[1], [0], [0], [1], [0, 0, 1, 1], [], []>} : vector<16x4xbf16>, vector<4x512xbf16>, vector<16x512xf32> -> vector<16x512xf32>
    %29 = vector.broadcast %0 : vector<1x512xf32> to vector<16x512xf32>
    %30 = arith.addf %28, %29 : vector<16x512xf32>
    %31 = arith.truncf %30 : vector<16x512xf32> to vector<16x512xbf16>
    %c48 = arith.constant 48 : index
    %c0_25 = arith.constant 0 : index
    %32 = vector.load %arg12[%c48, %c0_25] : memref<128x512xbf16, #tpu.memory_space<vmem>>, vector<16x512xbf16>
    tpu.vector_store %arg12[%c48, %c0_25], %31 {strides = array<i32>} : memref<128x512xbf16, #tpu.memory_space<vmem>>, vector<16x512xbf16>,
    %c4 = arith.constant 4 : index
    %c0_26 = arith.constant 0 : index
    %c0_27 = arith.constant 0 : index
    %33 = vector.load %arg1[%c4, %c0_26, %c0_27] : memref<8x16x4xbf16, #tpu.memory_space<vmem>>, vector<1x16x4xbf16>
    %34 = vector.shape_cast %33 : vector<1x16x4xbf16> to vector<16x4xbf16>
    %c0_28 = arith.constant 0 : index
    %c0_29 = arith.constant 0 : index
    %35 = vector.load %arg2[%c0_28, %c0_29] : memref<4x512xbf16, #tpu.memory_space<vmem>>, vector<4x512xbf16>
    %cst_30 = arith.constant dense<0.000000e+00> : vector<16x512xf32>
    %36 = tpu.matmul %34, %35, %cst_30 {dimension_numbers = #tpu.dot_dimension_numbers<[1], [0], [0], [1], [0, 0, 1, 1], [], []>} : vector<16x4xbf16>, vector<4x512xbf16>, vector<16x512xf32> -> vector<16x512xf32>
    %37 = vector.broadcast %0 : vector<1x512xf32> to vector<16x512xf32>
    %38 = arith.addf %36, %37 : vector<16x512xf32>
    %39 = arith.truncf %38 : vector<16x512xf32> to vector<16x512xbf16>
    %c64 = arith.constant 64 : index
    %c0_31 = arith.constant 0 : index
    %40 = vector.load %arg12[%c64, %c0_31] : memref<128x512xbf16, #tpu.memory_space<vmem>>, vector<16x512xbf16>
    tpu.vector_store %arg12[%c64, %c0_31], %39 {strides = array<i32>} : memref<128x512xbf16, #tpu.memory_space<vmem>>, vector<16x512xbf16>,
    %c5 = arith.constant 5 : index
    %c0_32 = arith.constant 0 : index
    %c0_33 = arith.constant 0 : index
    %41 = vector.load %arg1[%c5, %c0_32, %c0_33] : memref<8x16x4xbf16, #tpu.memory_space<vmem>>, vector<1x16x4xbf16>
    %42 = vector.shape_cast %41 : vector<1x16x4xbf16> to vector<16x4xbf16>
    %c0_34 = arith.constant 0 : index
    %c0_35 = arith.constant 0 : index
    %43 = vector.load %arg2[%c0_34, %c0_35] : memref<4x512xbf16, #tpu.memory_space<vmem>>, vector<4x512xbf16>
    %cst_36 = arith.constant dense<0.000000e+00> : vector<16x512xf32>
    %44 = tpu.matmul %42, %43, %cst_36 {dimension_numbers = #tpu.dot_dimension_numbers<[1], [0], [0], [1], [0, 0, 1, 1], [], []>} : vector<16x4xbf16>, vector<4x512xbf16>, vector<16x512xf32> -> vector<16x512xf32>
    %45 = vector.broadcast %0 : vector<1x512xf32> to vector<16x512xf32>
    %46 = arith.addf %44, %45 : vector<16x512xf32>
    %47 = arith.truncf %46 : vector<16x512xf32> to vector<16x512xbf16>
    %c80 = arith.constant 80 : index
    %c0_37 = arith.constant 0 : index
    %48 = vector.load %arg12[%c80, %c0_37] : memref<128x512xbf16, #tpu.memory_space<vmem>>, vector<16x512xbf16>
    tpu.vector_store %arg12[%c80, %c0_37], %47 {strides = array<i32>} : memref<128x512xbf16, #tpu.memory_space<vmem>>, vector<16x512xbf16>,
    %c6 = arith.constant 6 : index
    %c0_38 = arith.constant 0 : index
    %c0_39 = arith.constant 0 : index
    %49 = vector.load %arg1[%c6, %c0_38, %c0_39] : memref<8x16x4xbf16, #tpu.memory_space<vmem>>, vector<1x16x4xbf16>
    %50 = vector.shape_cast %49 : vector<1x16x4xbf16> to vector<16x4xbf16>
    %c0_40 = arith.constant 0 : index
    %c0_41 = arith.constant 0 : index
    %51 = vector.load %arg2[%c0_40, %c0_41] : memref<4x512xbf16, #tpu.memory_space<vmem>>, vector<4x512xbf16>
    %cst_42 = arith.constant dense<0.000000e+00> : vector<16x512xf32>
    %52 = tpu.matmul %50, %51, %cst_42 {dimension_numbers = #tpu.dot_dimension_numbers<[1], [0], [0], [1], [0, 0, 1, 1], [], []>} : vector<16x4xbf16>, vector<4x512xbf16>, vector<16x512xf32> -> vector<16x512xf32>
    %53 = vector.broadcast %0 : vector<1x512xf32> to vector<16x512xf32>
    %54 = arith.addf %52, %53 : vector<16x512xf32>
    %55 = arith.truncf %54 : vector<16x512xf32> to vector<16x512xbf16>
    %c96 = arith.constant 96 : index
    %c0_43 = arith.constant 0 : index
    %56 = vector.load %arg12[%c96, %c0_43] : memref<128x512xbf16, #tpu.memory_space<vmem>>, vector<16x512xbf16>
    tpu.vector_store %arg12[%c96, %c0_43], %55 {strides = array<i32>} : memref<128x512xbf16, #tpu.memory_space<vmem>>, vector<16x512xbf16>,
    %c7 = arith.constant 7 : index
    %c0_44 = arith.constant 0 : index
    %c0_45 = arith.constant 0 : index
    %57 = vector.load %arg1[%c7, %c0_44, %c0_45] : memref<8x16x4xbf16, #tpu.memory_space<vmem>>, vector<1x16x4xbf16>
    %58 = vector.shape_cast %57 : vector<1x16x4xbf16> to vector<16x4xbf16>
    %c0_46 = arith.constant 0 : index
    %c0_47 = arith.constant 0 : index
    %59 = vector.load %arg2[%c0_46, %c0_47] : memref<4x512xbf16, #tpu.memory_space<vmem>>, vector<4x512xbf16>
    %cst_48 = arith.constant dense<0.000000e+00> : vector<16x512xf32>
    %60 = tpu.matmul %58, %59, %cst_48 {dimension_numbers = #tpu.dot_dimension_numbers<[1], [0], [0], [1], [0, 0, 1, 1], [], []>} : vector<16x4xbf16>, vector<4x512xbf16>, vector<16x512xf32> -> vector<16x512xf32>
    %61 = vector.broadcast %0 : vector<1x512xf32> to vector<16x512xf32>
    %62 = arith.addf %60, %61 : vector<16x512xf32>
    %63 = arith.truncf %62 : vector<16x512xf32> to vector<16x512xbf16>
    %c112 = arith.constant 112 : index
    %c0_49 = arith.constant 0 : index
    %64 = vector.load %arg12[%c112, %c0_49] : memref<128x512xbf16, #tpu.memory_space<vmem>>, vector<16x512xbf16>
    tpu.vector_store %arg12[%c112, %c0_49], %63 {strides = array<i32>} : memref<128x512xbf16, #tpu.memory_space<vmem>>, vector<16x512xbf16>,
    %c0_50 = arith.constant 0 : index
    %c0_51 = arith.constant 0 : index
    %65 = vector.load %arg3[%c0_50, %c0_51] : memref<128x512xbf16, #tpu.memory_space<vmem>>, vector<128x512xbf16>
    %cst_52 = arith.constant 0.000000e+00 : f32
    %66 = vector.broadcast %cst_52 : f32 to vector<16x128xf32>
    %cst_53 = arith.constant 0.000000e+00 : f32
    %67 = vector.broadcast %cst_53 : f32 to vector<16x128xf32>
    %c0_i32 = arith.constant 0 : i32
    %c16_i32 = arith.constant 16 : i32
    %68 = arith.muli %c0_i32, %c16_i32 : i32
    %69 = tpu.assume_multiple %68, 16 : i32
    %70 = arith.index_cast %69 : i32 to index
    %c0_54 = arith.constant 0 : index
    %71 = vector.load %arg12[%70, %c0_54] : memref<128x512xbf16, #tpu.memory_space<vmem>>, vector<16x512xbf16>
    %72 = arith.extf %71 : vector<16x512xbf16> to vector<16x512xf32>
    %73 = arith.truncf %66 : vector<16x128xf32> to vector<16x128xbf16>
    %cst_55 = arith.constant dense<0.000000e+00> : vector<16x512xf32>
    %74 = tpu.matmul %73, %65, %cst_55 {dimension_numbers = #tpu.dot_dimension_numbers<[1], [0], [0], [1], [0, 0, 1, 1], [], []>} : vector<16x128xbf16>, vector<128x512xbf16>, vector<16x512xf32> -> vector<16x512xf32>
    %75 = arith.addf %72, %74 : vector<16x512xf32>
    %76 = math.tanh %75 : vector<16x512xf32>
    %77 = vector.extract_strided_slice %76 {offsets = [0, 0], sizes = [16, 384], strides = [1, 1]} : vector<16x512xf32> to vector<16x384xf32>
    %cst_56 = arith.constant 5.000000e-01 : f32
    %78 = vector.broadcast %cst_56 : f32 to vector<16x384xf32>
    %79 = arith.mulf %78, %77 : vector<16x384xf32>
    %cst_57 = arith.constant 5.000000e-01 : f32
    %80 = vector.broadcast %cst_57 : f32 to vector<16x384xf32>
    %81 = arith.addf %79, %80 : vector<16x384xf32>
    %82 = vector.extract_strided_slice %81 {offsets = [0, 0], sizes = [16, 128], strides = [1, 1]} : vector<16x384xf32> to vector<16x128xf32>
    %83 = vector.extract_strided_slice %81 {offsets = [0, 128], sizes = [16, 128], strides = [1, 1]} : vector<16x384xf32> to vector<16x128xf32>
    %84 = vector.extract_strided_slice %81 {offsets = [0, 256], sizes = [16, 128], strides = [1, 1]} : vector<16x384xf32> to vector<16x128xf32>
    %85 = vector.extract_strided_slice %76 {offsets = [0, 384], sizes = [16, 128], strides = [1, 1]} : vector<16x512xf32> to vector<16x128xf32>
    %86 = arith.mulf %83, %67 : vector<16x128xf32>
    %87 = arith.mulf %82, %85 : vector<16x128xf32>
    %88 = arith.addf %86, %87 : vector<16x128xf32>
    %89 = math.tanh %88 : vector<16x128xf32>
    %90 = arith.mulf %84, %89 : vector<16x128xf32>
    %91 = arith.truncf %90 : vector<16x128xf32> to vector<16x128xbf16>
    %92 = arith.index_cast %69 : i32 to index
    %c0_58 = arith.constant 0 : index
    %93 = vector.load %arg11[%92, %c0_58] : memref<128x128xbf16, #tpu.memory_space<vmem>>, vector<16x128xbf16>
    tpu.vector_store %arg11[%92, %c0_58], %91 {strides = array<i32>} : memref<128x128xbf16, #tpu.memory_space<vmem>>, vector<16x128xbf16>,
    %c1_i32 = arith.constant 1 : i32
    %c16_i32_59 = arith.constant 16 : i32
    %94 = arith.muli %c1_i32, %c16_i32_59 : i32
    %95 = tpu.assume_multiple %94, 16 : i32
    %96 = arith.index_cast %95 : i32 to index
    %c0_60 = arith.constant 0 : index
    %97 = vector.load %arg12[%96, %c0_60] : memref<128x512xbf16, #tpu.memory_space<vmem>>, vector<16x512xbf16>
    %98 = arith.extf %97 : vector<16x512xbf16> to vector<16x512xf32>
    %99 = arith.truncf %90 : vector<16x128xf32> to vector<16x128xbf16>
    %cst_61 = arith.constant dense<0.000000e+00> : vector<16x512xf32>
    %100 = tpu.matmul %99, %65, %cst_61 {dimension_numbers = #tpu.dot_dimension_numbers<[1], [0], [0], [1], [0, 0, 1, 1], [], []>} : vector<16x128xbf16>, vector<128x512xbf16>, vector<16x512xf32> -> vector<16x512xf32>
    %101 = arith.addf %98, %100 : vector<16x512xf32>
    %102 = math.tanh %101 : vector<16x512xf32>
    %103 = vector.extract_strided_slice %102 {offsets = [0, 0], sizes = [16, 384], strides = [1, 1]} : vector<16x512xf32> to vector<16x384xf32>
    %cst_62 = arith.constant 5.000000e-01 : f32
    %104 = vector.broadcast %cst_62 : f32 to vector<16x384xf32>
    %105 = arith.mulf %104, %103 : vector<16x384xf32>
    %cst_63 = arith.constant 5.000000e-01 : f32
    %106 = vector.broadcast %cst_63 : f32 to vector<16x384xf32>
    %107 = arith.addf %105, %106 : vector<16x384xf32>
    %108 = vector.extract_strided_slice %107 {offsets = [0, 0], sizes = [16, 128], strides = [1, 1]} : vector<16x384xf32> to vector<16x128xf32>
    %109 = vector.extract_strided_slice %107 {offsets = [0, 128], sizes = [16, 128], strides = [1, 1]} : vector<16x384xf32> to vector<16x128xf32>
    %110 = vector.extract_strided_slice %107 {offsets = [0, 256], sizes = [16, 128], strides = [1, 1]} : vector<16x384xf32> to vector<16x128xf32>
    %111 = vector.extract_strided_slice %102 {offsets = [0, 384], sizes = [16, 128], strides = [1, 1]} : vector<16x512xf32> to vector<16x128xf32>
    %112 = arith.mulf %109, %88 : vector<16x128xf32>
    %113 = arith.mulf %108, %111 : vector<16x128xf32>
    %114 = arith.addf %112, %113 : vector<16x128xf32>
    %115 = math.tanh %114 : vector<16x128xf32>
    %116 = arith.mulf %110, %115 : vector<16x128xf32>
    %117 = arith.truncf %116 : vector<16x128xf32> to vector<16x128xbf16>
    %118 = arith.index_cast %95 : i32 to index
    %c0_64 = arith.constant 0 : index
    %119 = vector.load %arg11[%118, %c0_64] : memref<128x128xbf16, #tpu.memory_space<vmem>>, vector<16x128xbf16>
    tpu.vector_store %arg11[%118, %c0_64], %117 {strides = array<i32>} : memref<128x128xbf16, #tpu.memory_space<vmem>>, vector<16x128xbf16>,
    %c2_i32 = arith.constant 2 : i32
    %c16_i32_65 = arith.constant 16 : i32
    %120 = arith.muli %c2_i32, %c16_i32_65 : i32
    %121 = tpu.assume_multiple %120, 16 : i32
    %122 = arith.index_cast %121 : i32 to index
    %c0_66 = arith.constant 0 : index
    %123 = vector.load %arg12[%122, %c0_66] : memref<128x512xbf16, #tpu.memory_space<vmem>>, vector<16x512xbf16>
    %124 = arith.extf %123 : vector<16x512xbf16> to vector<16x512xf32>
    %125 = arith.truncf %116 : vector<16x128xf32> to vector<16x128xbf16>
    %cst_67 = arith.constant dense<0.000000e+00> : vector<16x512xf32>
    %126 = tpu.matmul %125, %65, %cst_67 {dimension_numbers = #tpu.dot_dimension_numbers<[1], [0], [0], [1], [0, 0, 1, 1], [], []>} : vector<16x128xbf16>, vector<128x512xbf16>, vector<16x512xf32> -> vector<16x512xf32>
    %127 = arith.addf %124, %126 : vector<16x512xf32>
    %128 = math.tanh %127 : vector<16x512xf32>
    %129 = vector.extract_strided_slice %128 {offsets = [0, 0], sizes = [16, 384], strides = [1, 1]} : vector<16x512xf32> to vector<16x384xf32>
    %cst_68 = arith.constant 5.000000e-01 : f32
    %130 = vector.broadcast %cst_68 : f32 to vector<16x384xf32>
    %131 = arith.mulf %130, %129 : vector<16x384xf32>
    %cst_69 = arith.constant 5.000000e-01 : f32
    %132 = vector.broadcast %cst_69 : f32 to vector<16x384xf32>
    %133 = arith.addf %131, %132 : vector<16x384xf32>
    %134 = vector.extract_strided_slice %133 {offsets = [0, 0], sizes = [16, 128], strides = [1, 1]} : vector<16x384xf32> to vector<16x128xf32>
    %135 = vector.extract_strided_slice %133 {offsets = [0, 128], sizes = [16, 128], strides = [1, 1]} : vector<16x384xf32> to vector<16x128xf32>
    %136 = vector.extract_strided_slice %133 {offsets = [0, 256], sizes = [16, 128], strides = [1, 1]} : vector<16x384xf32> to vector<16x128xf32>
    %137 = vector.extract_strided_slice %128 {offsets = [0, 384], sizes = [16, 128], strides = [1, 1]} : vector<16x512xf32> to vector<16x128xf32>
    %138 = arith.mulf %135, %114 : vector<16x128xf32>
    %139 = arith.mulf %134, %137 : vector<16x128xf32>
    %140 = arith.addf %138, %139 : vector<16x128xf32>
    %141 = math.tanh %140 : vector<16x128xf32>
    %142 = arith.mulf %136, %141 : vector<16x128xf32>
    %143 = arith.truncf %142 : vector<16x128xf32> to vector<16x128xbf16>
    %144 = arith.index_cast %121 : i32 to index
    %c0_70 = arith.constant 0 : index
    %145 = vector.load %arg11[%144, %c0_70] : memref<128x128xbf16, #tpu.memory_space<vmem>>, vector<16x128xbf16>
    tpu.vector_store %arg11[%144, %c0_70], %143 {strides = array<i32>} : memref<128x128xbf16, #tpu.memory_space<vmem>>, vector<16x128xbf16>,
    %c3_i32 = arith.constant 3 : i32
    %c16_i32_71 = arith.constant 16 : i32
    %146 = arith.muli %c3_i32, %c16_i32_71 : i32
    %147 = tpu.assume_multiple %146, 16 : i32
    %148 = arith.index_cast %147 : i32 to index
    %c0_72 = arith.constant 0 : index
    %149 = vector.load %arg12[%148, %c0_72] : memref<128x512xbf16, #tpu.memory_space<vmem>>, vector<16x512xbf16>
    %150 = arith.extf %149 : vector<16x512xbf16> to vector<16x512xf32>
    %151 = arith.truncf %142 : vector<16x128xf32> to vector<16x128xbf16>
    %cst_73 = arith.constant dense<0.000000e+00> : vector<16x512xf32>
    %152 = tpu.matmul %151, %65, %cst_73 {dimension_numbers = #tpu.dot_dimension_numbers<[1], [0], [0], [1], [0, 0, 1, 1], [], []>} : vector<16x128xbf16>, vector<128x512xbf16>, vector<16x512xf32> -> vector<16x512xf32>
    %153 = arith.addf %150, %152 : vector<16x512xf32>
    %154 = math.tanh %153 : vector<16x512xf32>
    %155 = vector.extract_strided_slice %154 {offsets = [0, 0], sizes = [16, 384], strides = [1, 1]} : vector<16x512xf32> to vector<16x384xf32>
    %cst_74 = arith.constant 5.000000e-01 : f32
    %156 = vector.broadcast %cst_74 : f32 to vector<16x384xf32>
    %157 = arith.mulf %156, %155 : vector<16x384xf32>
    %cst_75 = arith.constant 5.000000e-01 : f32
    %158 = vector.broadcast %cst_75 : f32 to vector<16x384xf32>
    %159 = arith.addf %157, %158 : vector<16x384xf32>
    %160 = vector.extract_strided_slice %159 {offsets = [0, 0], sizes = [16, 128], strides = [1, 1]} : vector<16x384xf32> to vector<16x128xf32>
    %161 = vector.extract_strided_slice %159 {offsets = [0, 128], sizes = [16, 128], strides = [1, 1]} : vector<16x384xf32> to vector<16x128xf32>
    %162 = vector.extract_strided_slice %159 {offsets = [0, 256], sizes = [16, 128], strides = [1, 1]} : vector<16x384xf32> to vector<16x128xf32>
    %163 = vector.extract_strided_slice %154 {offsets = [0, 384], sizes = [16, 128], strides = [1, 1]} : vector<16x512xf32> to vector<16x128xf32>
    %164 = arith.mulf %161, %140 : vector<16x128xf32>
    %165 = arith.mulf %160, %163 : vector<16x128xf32>
    %166 = arith.addf %164, %165 : vector<16x128xf32>
    %167 = math.tanh %166 : vector<16x128xf32>
    %168 = arith.mulf %162, %167 : vector<16x128xf32>
    %169 = arith.truncf %168 : vector<16x128xf32> to vector<16x128xbf16>
    %170 = arith.index_cast %147 : i32 to index
    %c0_76 = arith.constant 0 : index
    %171 = vector.load %arg11[%170, %c0_76] : memref<128x128xbf16, #tpu.memory_space<vmem>>, vector<16x128xbf16>
    tpu.vector_store %arg11[%170, %c0_76], %169 {strides = array<i32>} : memref<128x128xbf16, #tpu.memory_space<vmem>>, vector<16x128xbf16>,
    %c4_i32 = arith.constant 4 : i32
    %c16_i32_77 = arith.constant 16 : i32
    %172 = arith.muli %c4_i32, %c16_i32_77 : i32
    %173 = tpu.assume_multiple %172, 16 : i32
    %174 = arith.index_cast %173 : i32 to index
    %c0_78 = arith.constant 0 : index
    %175 = vector.load %arg12[%174, %c0_78] : memref<128x512xbf16, #tpu.memory_space<vmem>>, vector<16x512xbf16>
    %176 = arith.extf %175 : vector<16x512xbf16> to vector<16x512xf32>
    %177 = arith.truncf %168 : vector<16x128xf32> to vector<16x128xbf16>
    %cst_79 = arith.constant dense<0.000000e+00> : vector<16x512xf32>
    %178 = tpu.matmul %177, %65, %cst_79 {dimension_numbers = #tpu.dot_dimension_numbers<[1], [0], [0], [1], [0, 0, 1, 1], [], []>} : vector<16x128xbf16>, vector<128x512xbf16>, vector<16x512xf32> -> vector<16x512xf32>
    %179 = arith.addf %176, %178 : vector<16x512xf32>
    %180 = math.tanh %179 : vector<16x512xf32>
    %181 = vector.extract_strided_slice %180 {offsets = [0, 0], sizes = [16, 384], strides = [1, 1]} : vector<16x512xf32> to vector<16x384xf32>
    %cst_80 = arith.constant 5.000000e-01 : f32
    %182 = vector.broadcast %cst_80 : f32 to vector<16x384xf32>
    %183 = arith.mulf %182, %181 : vector<16x384xf32>
    %cst_81 = arith.constant 5.000000e-01 : f32
    %184 = vector.broadcast %cst_81 : f32 to vector<16x384xf32>
    %185 = arith.addf %183, %184 : vector<16x384xf32>
    %186 = vector.extract_strided_slice %185 {offsets = [0, 0], sizes = [16, 128], strides = [1, 1]} : vector<16x384xf32> to vector<16x128xf32>
    %187 = vector.extract_strided_slice %185 {offsets = [0, 128], sizes = [16, 128], strides = [1, 1]} : vector<16x384xf32> to vector<16x128xf32>
    %188 = vector.extract_strided_slice %185 {offsets = [0, 256], sizes = [16, 128], strides = [1, 1]} : vector<16x384xf32> to vector<16x128xf32>
    %189 = vector.extract_strided_slice %180 {offsets = [0, 384], sizes = [16, 128], strides = [1, 1]} : vector<16x512xf32> to vector<16x128xf32>
    %190 = arith.mulf %187, %166 : vector<16x128xf32>
    %191 = arith.mulf %186, %189 : vector<16x128xf32>
    %192 = arith.addf %190, %191 : vector<16x128xf32>
    %193 = math.tanh %192 : vector<16x128xf32>
    %194 = arith.mulf %188, %193 : vector<16x128xf32>
    %195 = arith.truncf %194 : vector<16x128xf32> to vector<16x128xbf16>
    %196 = arith.index_cast %173 : i32 to index
    %c0_82 = arith.constant 0 : index
    %197 = vector.load %arg11[%196, %c0_82] : memref<128x128xbf16, #tpu.memory_space<vmem>>, vector<16x128xbf16>
    tpu.vector_store %arg11[%196, %c0_82], %195 {strides = array<i32>} : memref<128x128xbf16, #tpu.memory_space<vmem>>, vector<16x128xbf16>,
    %c5_i32 = arith.constant 5 : i32
    %c16_i32_83 = arith.constant 16 : i32
    %198 = arith.muli %c5_i32, %c16_i32_83 : i32
    %199 = tpu.assume_multiple %198, 16 : i32
    %200 = arith.index_cast %199 : i32 to index
    %c0_84 = arith.constant 0 : index
    %201 = vector.load %arg12[%200, %c0_84] : memref<128x512xbf16, #tpu.memory_space<vmem>>, vector<16x512xbf16>
    %202 = arith.extf %201 : vector<16x512xbf16> to vector<16x512xf32>
    %203 = arith.truncf %194 : vector<16x128xf32> to vector<16x128xbf16>
    %cst_85 = arith.constant dense<0.000000e+00> : vector<16x512xf32>
    %204 = tpu.matmul %203, %65, %cst_85 {dimension_numbers = #tpu.dot_dimension_numbers<[1], [0], [0], [1], [0, 0, 1, 1], [], []>} : vector<16x128xbf16>, vector<128x512xbf16>, vector<16x512xf32> -> vector<16x512xf32>
    %205 = arith.addf %202, %204 : vector<16x512xf32>
    %206 = math.tanh %205 : vector<16x512xf32>
    %207 = vector.extract_strided_slice %206 {offsets = [0, 0], sizes = [16, 384], strides = [1, 1]} : vector<16x512xf32> to vector<16x384xf32>
    %cst_86 = arith.constant 5.000000e-01 : f32
    %208 = vector.broadcast %cst_86 : f32 to vector<16x384xf32>
    %209 = arith.mulf %208, %207 : vector<16x384xf32>
    %cst_87 = arith.constant 5.000000e-01 : f32
    %210 = vector.broadcast %cst_87 : f32 to vector<16x384xf32>
    %211 = arith.addf %209, %210 : vector<16x384xf32>
    %212 = vector.extract_strided_slice %211 {offsets = [0, 0], sizes = [16, 128], strides = [1, 1]} : vector<16x384xf32> to vector<16x128xf32>
    %213 = vector.extract_strided_slice %211 {offsets = [0, 128], sizes = [16, 128], strides = [1, 1]} : vector<16x384xf32> to vector<16x128xf32>
    %214 = vector.extract_strided_slice %211 {offsets = [0, 256], sizes = [16, 128], strides = [1, 1]} : vector<16x384xf32> to vector<16x128xf32>
    %215 = vector.extract_strided_slice %206 {offsets = [0, 384], sizes = [16, 128], strides = [1, 1]} : vector<16x512xf32> to vector<16x128xf32>
    %216 = arith.mulf %213, %192 : vector<16x128xf32>
    %217 = arith.mulf %212, %215 : vector<16x128xf32>
    %218 = arith.addf %216, %217 : vector<16x128xf32>
    %219 = math.tanh %218 : vector<16x128xf32>
    %220 = arith.mulf %214, %219 : vector<16x128xf32>
    %221 = arith.truncf %220 : vector<16x128xf32> to vector<16x128xbf16>
    %222 = arith.index_cast %199 : i32 to index
    %c0_88 = arith.constant 0 : index
    %223 = vector.load %arg11[%222, %c0_88] : memref<128x128xbf16, #tpu.memory_space<vmem>>, vector<16x128xbf16>
    tpu.vector_store %arg11[%222, %c0_88], %221 {strides = array<i32>} : memref<128x128xbf16, #tpu.memory_space<vmem>>, vector<16x128xbf16>,
    %c6_i32 = arith.constant 6 : i32
    %c16_i32_89 = arith.constant 16 : i32
    %224 = arith.muli %c6_i32, %c16_i32_89 : i32
    %225 = tpu.assume_multiple %224, 16 : i32
    %226 = arith.index_cast %225 : i32 to index
    %c0_90 = arith.constant 0 : index
    %227 = vector.load %arg12[%226, %c0_90] : memref<128x512xbf16, #tpu.memory_space<vmem>>, vector<16x512xbf16>
    %228 = arith.extf %227 : vector<16x512xbf16> to vector<16x512xf32>
    %229 = arith.truncf %220 : vector<16x128xf32> to vector<16x128xbf16>
    %cst_91 = arith.constant dense<0.000000e+00> : vector<16x512xf32>
    %230 = tpu.matmul %229, %65, %cst_91 {dimension_numbers = #tpu.dot_dimension_numbers<[1], [0], [0], [1], [0, 0, 1, 1], [], []>} : vector<16x128xbf16>, vector<128x512xbf16>, vector<16x512xf32> -> vector<16x512xf32>
    %231 = arith.addf %228, %230 : vector<16x512xf32>
    %232 = math.tanh %231 : vector<16x512xf32>
    %233 = vector.extract_strided_slice %232 {offsets = [0, 0], sizes = [16, 384], strides = [1, 1]} : vector<16x512xf32> to vector<16x384xf32>
    %cst_92 = arith.constant 5.000000e-01 : f32
    %234 = vector.broadcast %cst_92 : f32 to vector<16x384xf32>
    %235 = arith.mulf %234, %233 : vector<16x384xf32>
    %cst_93 = arith.constant 5.000000e-01 : f32
    %236 = vector.broadcast %cst_93 : f32 to vector<16x384xf32>
    %237 = arith.addf %235, %236 : vector<16x384xf32>
    %238 = vector.extract_strided_slice %237 {offsets = [0, 0], sizes = [16, 128], strides = [1, 1]} : vector<16x384xf32> to vector<16x128xf32>
    %239 = vector.extract_strided_slice %237 {offsets = [0, 128], sizes = [16, 128], strides = [1, 1]} : vector<16x384xf32> to vector<16x128xf32>
    %240 = vector.extract_strided_slice %237 {offsets = [0, 256], sizes = [16, 128], strides = [1, 1]} : vector<16x384xf32> to vector<16x128xf32>
    %241 = vector.extract_strided_slice %232 {offsets = [0, 384], sizes = [16, 128], strides = [1, 1]} : vector<16x512xf32> to vector<16x128xf32>
    %242 = arith.mulf %239, %218 : vector<16x128xf32>
    %243 = arith.mulf %238, %241 : vector<16x128xf32>
    %244 = arith.addf %242, %243 : vector<16x128xf32>
    %245 = math.tanh %244 : vector<16x128xf32>
    %246 = arith.mulf %240, %245 : vector<16x128xf32>
    %247 = arith.truncf %246 : vector<16x128xf32> to vector<16x128xbf16>
    %248 = arith.index_cast %225 : i32 to index
    %c0_94 = arith.constant 0 : index
    %249 = vector.load %arg11[%248, %c0_94] : memref<128x128xbf16, #tpu.memory_space<vmem>>, vector<16x128xbf16>
    tpu.vector_store %arg11[%248, %c0_94], %247 {strides = array<i32>} : memref<128x128xbf16, #tpu.memory_space<vmem>>, vector<16x128xbf16>,
    %c7_i32 = arith.constant 7 : i32
    %c16_i32_95 = arith.constant 16 : i32
    %250 = arith.muli %c7_i32, %c16_i32_95 : i32
    %251 = tpu.assume_multiple %250, 16 : i32
    %252 = arith.index_cast %251 : i32 to index
    %c0_96 = arith.constant 0 : index
    %253 = vector.load %arg12[%252, %c0_96] : memref<128x512xbf16, #tpu.memory_space<vmem>>, vector<16x512xbf16>
    %254 = arith.extf %253 : vector<16x512xbf16> to vector<16x512xf32>
    %255 = arith.truncf %246 : vector<16x128xf32> to vector<16x128xbf16>
    %cst_97 = arith.constant dense<0.000000e+00> : vector<16x512xf32>
    %256 = tpu.matmul %255, %65, %cst_97 {dimension_numbers = #tpu.dot_dimension_numbers<[1], [0], [0], [1], [0, 0, 1, 1], [], []>} : vector<16x128xbf16>, vector<128x512xbf16>, vector<16x512xf32> -> vector<16x512xf32>
    %257 = arith.addf %254, %256 : vector<16x512xf32>
    %258 = math.tanh %257 : vector<16x512xf32>
    %259 = vector.extract_strided_slice %258 {offsets = [0, 0], sizes = [16, 384], strides = [1, 1]} : vector<16x512xf32> to vector<16x384xf32>
    %cst_98 = arith.constant 5.000000e-01 : f32
    %260 = vector.broadcast %cst_98 : f32 to vector<16x384xf32>
    %261 = arith.mulf %260, %259 : vector<16x384xf32>
    %cst_99 = arith.constant 5.000000e-01 : f32
    %262 = vector.broadcast %cst_99 : f32 to vector<16x384xf32>
    %263 = arith.addf %261, %262 : vector<16x384xf32>
    %264 = vector.extract_strided_slice %263 {offsets = [0, 0], sizes = [16, 128], strides = [1, 1]} : vector<16x384xf32> to vector<16x128xf32>
    %265 = vector.extract_strided_slice %263 {offsets = [0, 128], sizes = [16, 128], strides = [1, 1]} : vector<16x384xf32> to vector<16x128xf32>
    %266 = vector.extract_strided_slice %263 {offsets = [0, 256], sizes = [16, 128], strides = [1, 1]} : vector<16x384xf32> to vector<16x128xf32>
    %267 = vector.extract_strided_slice %258 {offsets = [0, 384], sizes = [16, 128], strides = [1, 1]} : vector<16x512xf32> to vector<16x128xf32>
    %268 = arith.mulf %265, %244 : vector<16x128xf32>
    %269 = arith.mulf %264, %267 : vector<16x128xf32>
    %270 = arith.addf %268, %269 : vector<16x128xf32>
    %271 = math.tanh %270 : vector<16x128xf32>
    %272 = arith.mulf %266, %271 : vector<16x128xf32>
    %273 = arith.truncf %272 : vector<16x128xf32> to vector<16x128xbf16>
    %274 = arith.index_cast %251 : i32 to index
    %c0_100 = arith.constant 0 : index
    %275 = vector.load %arg11[%274, %c0_100] : memref<128x128xbf16, #tpu.memory_space<vmem>>, vector<16x128xbf16>
    tpu.vector_store %arg11[%274, %c0_100], %273 {strides = array<i32>} : memref<128x128xbf16, #tpu.memory_space<vmem>>, vector<16x128xbf16>,
    %c8_i32 = arith.constant 8 : i32
    %c0_101 = arith.constant 0 : index
    %c0_102 = arith.constant 0 : index
    %276 = vector.load %arg7[%c0_101, %c0_102] : memref<1x512xf32, #tpu.memory_space<vmem>>, vector<1x512xf32>
    %c0_103 = arith.constant 0 : index
    %c0_104 = arith.constant 0 : index
    %277 = vector.load %arg11[%c0_103, %c0_104] : memref<128x128xbf16, #tpu.memory_space<vmem>>, vector<16x128xbf16>
    %c0_105 = arith.constant 0 : index
    %c0_106 = arith.constant 0 : index
    %278 = vector.load %arg5[%c0_105, %c0_106] : memref<128x512xbf16, #tpu.memory_space<vmem>>, vector<128x512xbf16>
    %cst_107 = arith.constant dense<0.000000e+00> : vector<16x512xf32>
    %279 = tpu.matmul %277, %278, %cst_107 {dimension_numbers = #tpu.dot_dimension_numbers<[1], [0], [0], [1], [0, 0, 1, 1], [], []>} : vector<16x128xbf16>, vector<128x512xbf16>, vector<16x512xf32> -> vector<16x512xf32>
    %280 = vector.broadcast %276 : vector<1x512xf32> to vector<16x512xf32>
    %281 = arith.addf %279, %280 : vector<16x512xf32>
    %282 = arith.truncf %281 : vector<16x512xf32> to vector<16x512xbf16>
    %c0_108 = arith.constant 0 : index
    %c0_109 = arith.constant 0 : index
    %283 = vector.load %arg12[%c0_108, %c0_109] : memref<128x512xbf16, #tpu.memory_space<vmem>>, vector<16x512xbf16>
    tpu.vector_store %arg12[%c0_108, %c0_109], %282 {strides = array<i32>} : memref<128x512xbf16, #tpu.memory_space<vmem>>, vector<16x512xbf16>,
    %c16_110 = arith.constant 16 : index
    %c0_111 = arith.constant 0 : index
    %284 = vector.load %arg11[%c16_110, %c0_111] : memref<128x128xbf16, #tpu.memory_space<vmem>>, vector<16x128xbf16>
    %c0_112 = arith.constant 0 : index
    %c0_113 = arith.constant 0 : index
    %285 = vector.load %arg5[%c0_112, %c0_113] : memref<128x512xbf16, #tpu.memory_space<vmem>>, vector<128x512xbf16>
    %cst_114 = arith.constant dense<0.000000e+00> : vector<16x512xf32>
    %286 = tpu.matmul %284, %285, %cst_114 {dimension_numbers = #tpu.dot_dimension_numbers<[1], [0], [0], [1], [0, 0, 1, 1], [], []>} : vector<16x128xbf16>, vector<128x512xbf16>, vector<16x512xf32> -> vector<16x512xf32>
    %287 = vector.broadcast %276 : vector<1x512xf32> to vector<16x512xf32>
    %288 = arith.addf %286, %287 : vector<16x512xf32>
    %289 = arith.truncf %288 : vector<16x512xf32> to vector<16x512xbf16>
    %c16_115 = arith.constant 16 : index
    %c0_116 = arith.constant 0 : index
    %290 = vector.load %arg12[%c16_115, %c0_116] : memref<128x512xbf16, #tpu.memory_space<vmem>>, vector<16x512xbf16>
    tpu.vector_store %arg12[%c16_115, %c0_116], %289 {strides = array<i32>} : memref<128x512xbf16, #tpu.memory_space<vmem>>, vector<16x512xbf16>,
    %c32_117 = arith.constant 32 : index
    %c0_118 = arith.constant 0 : index
    %291 = vector.load %arg11[%c32_117, %c0_118] : memref<128x128xbf16, #tpu.memory_space<vmem>>, vector<16x128xbf16>
    %c0_119 = arith.constant 0 : index
    %c0_120 = arith.constant 0 : index
    %292 = vector.load %arg5[%c0_119, %c0_120] : memref<128x512xbf16, #tpu.memory_space<vmem>>, vector<128x512xbf16>
    %cst_121 = arith.constant dense<0.000000e+00> : vector<16x512xf32>
    %293 = tpu.matmul %291, %292, %cst_121 {dimension_numbers = #tpu.dot_dimension_numbers<[1], [0], [0], [1], [0, 0, 1, 1], [], []>} : vector<16x128xbf16>, vector<128x512xbf16>, vector<16x512xf32> -> vector<16x512xf32>
    %294 = vector.broadcast %276 : vector<1x512xf32> to vector<16x512xf32>
    %295 = arith.addf %293, %294 : vector<16x512xf32>
    %296 = arith.truncf %295 : vector<16x512xf32> to vector<16x512xbf16>
    %c32_122 = arith.constant 32 : index
    %c0_123 = arith.constant 0 : index
    %297 = vector.load %arg12[%c32_122, %c0_123] : memref<128x512xbf16, #tpu.memory_space<vmem>>, vector<16x512xbf16>
    tpu.vector_store %arg12[%c32_122, %c0_123], %296 {strides = array<i32>} : memref<128x512xbf16, #tpu.memory_space<vmem>>, vector<16x512xbf16>,
    %c48_124 = arith.constant 48 : index
    %c0_125 = arith.constant 0 : index
    %298 = vector.load %arg11[%c48_124, %c0_125] : memref<128x128xbf16, #tpu.memory_space<vmem>>, vector<16x128xbf16>
    %c0_126 = arith.constant 0 : index
    %c0_127 = arith.constant 0 : index
    %299 = vector.load %arg5[%c0_126, %c0_127] : memref<128x512xbf16, #tpu.memory_space<vmem>>, vector<128x512xbf16>
    %cst_128 = arith.constant dense<0.000000e+00> : vector<16x512xf32>
    %300 = tpu.matmul %298, %299, %cst_128 {dimension_numbers = #tpu.dot_dimension_numbers<[1], [0], [0], [1], [0, 0, 1, 1], [], []>} : vector<16x128xbf16>, vector<128x512xbf16>, vector<16x512xf32> -> vector<16x512xf32>
    %301 = vector.broadcast %276 : vector<1x512xf32> to vector<16x512xf32>
    %302 = arith.addf %300, %301 : vector<16x512xf32>
    %303 = arith.truncf %302 : vector<16x512xf32> to vector<16x512xbf16>
    %c48_129 = arith.constant 48 : index
    %c0_130 = arith.constant 0 : index
    %304 = vector.load %arg12[%c48_129, %c0_130] : memref<128x512xbf16, #tpu.memory_space<vmem>>, vector<16x512xbf16>
    tpu.vector_store %arg12[%c48_129, %c0_130], %303 {strides = array<i32>} : memref<128x512xbf16, #tpu.memory_space<vmem>>, vector<16x512xbf16>,
    %c64_131 = arith.constant 64 : index
    %c0_132 = arith.constant 0 : index
    %305 = vector.load %arg11[%c64_131, %c0_132] : memref<128x128xbf16, #tpu.memory_space<vmem>>, vector<16x128xbf16>
    %c0_133 = arith.constant 0 : index
    %c0_134 = arith.constant 0 : index
    %306 = vector.load %arg5[%c0_133, %c0_134] : memref<128x512xbf16, #tpu.memory_space<vmem>>, vector<128x512xbf16>
    %cst_135 = arith.constant dense<0.000000e+00> : vector<16x512xf32>
    %307 = tpu.matmul %305, %306, %cst_135 {dimension_numbers = #tpu.dot_dimension_numbers<[1], [0], [0], [1], [0, 0, 1, 1], [], []>} : vector<16x128xbf16>, vector<128x512xbf16>, vector<16x512xf32> -> vector<16x512xf32>
    %308 = vector.broadcast %276 : vector<1x512xf32> to vector<16x512xf32>
    %309 = arith.addf %307, %308 : vector<16x512xf32>
    %310 = arith.truncf %309 : vector<16x512xf32> to vector<16x512xbf16>
    %c64_136 = arith.constant 64 : index
    %c0_137 = arith.constant 0 : index
    %311 = vector.load %arg12[%c64_136, %c0_137] : memref<128x512xbf16, #tpu.memory_space<vmem>>, vector<16x512xbf16>
    tpu.vector_store %arg12[%c64_136, %c0_137], %310 {strides = array<i32>} : memref<128x512xbf16, #tpu.memory_space<vmem>>, vector<16x512xbf16>,
    %c80_138 = arith.constant 80 : index
    %c0_139 = arith.constant 0 : index
    %312 = vector.load %arg11[%c80_138, %c0_139] : memref<128x128xbf16, #tpu.memory_space<vmem>>, vector<16x128xbf16>
    %c0_140 = arith.constant 0 : index
    %c0_141 = arith.constant 0 : index
    %313 = vector.load %arg5[%c0_140, %c0_141] : memref<128x512xbf16, #tpu.memory_space<vmem>>, vector<128x512xbf16>
    %cst_142 = arith.constant dense<0.000000e+00> : vector<16x512xf32>
    %314 = tpu.matmul %312, %313, %cst_142 {dimension_numbers = #tpu.dot_dimension_numbers<[1], [0], [0], [1], [0, 0, 1, 1], [], []>} : vector<16x128xbf16>, vector<128x512xbf16>, vector<16x512xf32> -> vector<16x512xf32>
    %315 = vector.broadcast %276 : vector<1x512xf32> to vector<16x512xf32>
    %316 = arith.addf %314, %315 : vector<16x512xf32>
    %317 = arith.truncf %316 : vector<16x512xf32> to vector<16x512xbf16>
    %c80_143 = arith.constant 80 : index
    %c0_144 = arith.constant 0 : index
    %318 = vector.load %arg12[%c80_143, %c0_144] : memref<128x512xbf16, #tpu.memory_space<vmem>>, vector<16x512xbf16>
    tpu.vector_store %arg12[%c80_143, %c0_144], %317 {strides = array<i32>} : memref<128x512xbf16, #tpu.memory_space<vmem>>, vector<16x512xbf16>,
    %c96_145 = arith.constant 96 : index
    %c0_146 = arith.constant 0 : index
    %319 = vector.load %arg11[%c96_145, %c0_146] : memref<128x128xbf16, #tpu.memory_space<vmem>>, vector<16x128xbf16>
    %c0_147 = arith.constant 0 : index
    %c0_148 = arith.constant 0 : index
    %320 = vector.load %arg5[%c0_147, %c0_148] : memref<128x512xbf16, #tpu.memory_space<vmem>>, vector<128x512xbf16>
    %cst_149 = arith.constant dense<0.000000e+00> : vector<16x512xf32>
    %321 = tpu.matmul %319, %320, %cst_149 {dimension_numbers = #tpu.dot_dimension_numbers<[1], [0], [0], [1], [0, 0, 1, 1], [], []>} : vector<16x128xbf16>, vector<128x512xbf16>, vector<16x512xf32> -> vector<16x512xf32>
    %322 = vector.broadcast %276 : vector<1x512xf32> to vector<16x512xf32>
    %323 = arith.addf %321, %322 : vector<16x512xf32>
    %324 = arith.truncf %323 : vector<16x512xf32> to vector<16x512xbf16>
    %c96_150 = arith.constant 96 : index
    %c0_151 = arith.constant 0 : index
    %325 = vector.load %arg12[%c96_150, %c0_151] : memref<128x512xbf16, #tpu.memory_space<vmem>>, vector<16x512xbf16>
    tpu.vector_store %arg12[%c96_150, %c0_151], %324 {strides = array<i32>} : memref<128x512xbf16, #tpu.memory_space<vmem>>, vector<16x512xbf16>,
    %c112_152 = arith.constant 112 : index
    %c0_153 = arith.constant 0 : index
    %326 = vector.load %arg11[%c112_152, %c0_153] : memref<128x128xbf16, #tpu.memory_space<vmem>>, vector<16x128xbf16>
    %c0_154 = arith.constant 0 : index
    %c0_155 = arith.constant 0 : index
    %327 = vector.load %arg5[%c0_154, %c0_155] : memref<128x512xbf16, #tpu.memory_space<vmem>>, vector<128x512xbf16>
    %cst_156 = arith.constant dense<0.000000e+00> : vector<16x512xf32>
    %328 = tpu.matmul %326, %327, %cst_156 {dimension_numbers = #tpu.dot_dimension_numbers<[1], [0], [0], [1], [0, 0, 1, 1], [], []>} : vector<16x128xbf16>, vector<128x512xbf16>, vector<16x512xf32> -> vector<16x512xf32>
    %329 = vector.broadcast %276 : vector<1x512xf32> to vector<16x512xf32>
    %330 = arith.addf %328, %329 : vector<16x512xf32>
    %331 = arith.truncf %330 : vector<16x512xf32> to vector<16x512xbf16>
    %c112_157 = arith.constant 112 : index
    %c0_158 = arith.constant 0 : index
    %332 = vector.load %arg12[%c112_157, %c0_158] : memref<128x512xbf16, #tpu.memory_space<vmem>>, vector<16x512xbf16>
    tpu.vector_store %arg12[%c112_157, %c0_158], %331 {strides = array<i32>} : memref<128x512xbf16, #tpu.memory_space<vmem>>, vector<16x512xbf16>,
    %c0_159 = arith.constant 0 : index
    %c0_160 = arith.constant 0 : index
    %333 = vector.load %arg6[%c0_159, %c0_160] : memref<128x512xbf16, #tpu.memory_space<vmem>>, vector<128x512xbf16>
    %cst_161 = arith.constant 0.000000e+00 : f32
    %334 = vector.broadcast %cst_161 : f32 to vector<16x128xf32>
    %cst_162 = arith.constant 0.000000e+00 : f32
    %335 = vector.broadcast %cst_162 : f32 to vector<16x128xf32>
    %c0_i32_163 = arith.constant 0 : i32
    %c16_i32_164 = arith.constant 16 : i32
    %336 = arith.muli %c0_i32_163, %c16_i32_164 : i32
    %337 = tpu.assume_multiple %336, 16 : i32
    %338 = arith.index_cast %337 : i32 to index
    %c0_165 = arith.constant 0 : index
    %339 = vector.load %arg12[%338, %c0_165] : memref<128x512xbf16, #tpu.memory_space<vmem>>, vector<16x512xbf16>
    %340 = arith.extf %339 : vector<16x512xbf16> to vector<16x512xf32>
    %341 = arith.truncf %334 : vector<16x128xf32> to vector<16x128xbf16>
    %cst_166 = arith.constant dense<0.000000e+00> : vector<16x512xf32>
    %342 = tpu.matmul %341, %333, %cst_166 {dimension_numbers = #tpu.dot_dimension_numbers<[1], [0], [0], [1], [0, 0, 1, 1], [], []>} : vector<16x128xbf16>, vector<128x512xbf16>, vector<16x512xf32> -> vector<16x512xf32>
    %343 = arith.addf %340, %342 : vector<16x512xf32>
    %344 = math.tanh %343 : vector<16x512xf32>
    %345 = vector.extract_strided_slice %344 {offsets = [0, 0], sizes = [16, 384], strides = [1, 1]} : vector<16x512xf32> to vector<16x384xf32>
    %cst_167 = arith.constant 5.000000e-01 : f32
    %346 = vector.broadcast %cst_167 : f32 to vector<16x384xf32>
    %347 = arith.mulf %346, %345 : vector<16x384xf32>
    %cst_168 = arith.constant 5.000000e-01 : f32
    %348 = vector.broadcast %cst_168 : f32 to vector<16x384xf32>
    %349 = arith.addf %347, %348 : vector<16x384xf32>
    %350 = vector.extract_strided_slice %349 {offsets = [0, 0], sizes = [16, 128], strides = [1, 1]} : vector<16x384xf32> to vector<16x128xf32>
    %351 = vector.extract_strided_slice %349 {offsets = [0, 128], sizes = [16, 128], strides = [1, 1]} : vector<16x384xf32> to vector<16x128xf32>
    %352 = vector.extract_strided_slice %349 {offsets = [0, 256], sizes = [16, 128], strides = [1, 1]} : vector<16x384xf32> to vector<16x128xf32>
    %353 = vector.extract_strided_slice %344 {offsets = [0, 384], sizes = [16, 128], strides = [1, 1]} : vector<16x512xf32> to vector<16x128xf32>
    %354 = arith.mulf %351, %335 : vector<16x128xf32>
    %355 = arith.mulf %350, %353 : vector<16x128xf32>
    %356 = arith.addf %354, %355 : vector<16x128xf32>
    %357 = math.tanh %356 : vector<16x128xf32>
    %358 = arith.mulf %352, %357 : vector<16x128xf32>
    %359 = arith.truncf %358 : vector<16x128xf32> to vector<16x128xbf16>
    %360 = arith.index_cast %337 : i32 to index
    %c0_169 = arith.constant 0 : index
    %361 = vector.load %arg11[%360, %c0_169] : memref<128x128xbf16, #tpu.memory_space<vmem>>, vector<16x128xbf16>
    tpu.vector_store %arg11[%360, %c0_169], %359 {strides = array<i32>} : memref<128x128xbf16, #tpu.memory_space<vmem>>, vector<16x128xbf16>,
    %c1_i32_170 = arith.constant 1 : i32
    %c16_i32_171 = arith.constant 16 : i32
    %362 = arith.muli %c1_i32_170, %c16_i32_171 : i32
    %363 = tpu.assume_multiple %362, 16 : i32
    %364 = arith.index_cast %363 : i32 to index
    %c0_172 = arith.constant 0 : index
    %365 = vector.load %arg12[%364, %c0_172] : memref<128x512xbf16, #tpu.memory_space<vmem>>, vector<16x512xbf16>
    %366 = arith.extf %365 : vector<16x512xbf16> to vector<16x512xf32>
    %367 = arith.truncf %358 : vector<16x128xf32> to vector<16x128xbf16>
    %cst_173 = arith.constant dense<0.000000e+00> : vector<16x512xf32>
    %368 = tpu.matmul %367, %333, %cst_173 {dimension_numbers = #tpu.dot_dimension_numbers<[1], [0], [0], [1], [0, 0, 1, 1], [], []>} : vector<16x128xbf16>, vector<128x512xbf16>, vector<16x512xf32> -> vector<16x512xf32>
    %369 = arith.addf %366, %368 : vector<16x512xf32>
    %370 = math.tanh %369 : vector<16x512xf32>
    %371 = vector.extract_strided_slice %370 {offsets = [0, 0], sizes = [16, 384], strides = [1, 1]} : vector<16x512xf32> to vector<16x384xf32>
    %cst_174 = arith.constant 5.000000e-01 : f32
    %372 = vector.broadcast %cst_174 : f32 to vector<16x384xf32>
    %373 = arith.mulf %372, %371 : vector<16x384xf32>
    %cst_175 = arith.constant 5.000000e-01 : f32
    %374 = vector.broadcast %cst_175 : f32 to vector<16x384xf32>
    %375 = arith.addf %373, %374 : vector<16x384xf32>
    %376 = vector.extract_strided_slice %375 {offsets = [0, 0], sizes = [16, 128], strides = [1, 1]} : vector<16x384xf32> to vector<16x128xf32>
    %377 = vector.extract_strided_slice %375 {offsets = [0, 128], sizes = [16, 128], strides = [1, 1]} : vector<16x384xf32> to vector<16x128xf32>
    %378 = vector.extract_strided_slice %375 {offsets = [0, 256], sizes = [16, 128], strides = [1, 1]} : vector<16x384xf32> to vector<16x128xf32>
    %379 = vector.extract_strided_slice %370 {offsets = [0, 384], sizes = [16, 128], strides = [1, 1]} : vector<16x512xf32> to vector<16x128xf32>
    %380 = arith.mulf %377, %356 : vector<16x128xf32>
    %381 = arith.mulf %376, %379 : vector<16x128xf32>
    %382 = arith.addf %380, %381 : vector<16x128xf32>
    %383 = math.tanh %382 : vector<16x128xf32>
    %384 = arith.mulf %378, %383 : vector<16x128xf32>
    %385 = arith.truncf %384 : vector<16x128xf32> to vector<16x128xbf16>
    %386 = arith.index_cast %363 : i32 to index
    %c0_176 = arith.constant 0 : index
    %387 = vector.load %arg11[%386, %c0_176] : memref<128x128xbf16, #tpu.memory_space<vmem>>, vector<16x128xbf16>
    tpu.vector_store %arg11[%386, %c0_176], %385 {strides = array<i32>} : memref<128x128xbf16, #tpu.memory_space<vmem>>, vector<16x128xbf16>,
    %c2_i32_177 = arith.constant 2 : i32
    %c16_i32_178 = arith.constant 16 : i32
    %388 = arith.muli %c2_i32_177, %c16_i32_178 : i32
    %389 = tpu.assume_multiple %388, 16 : i32
    %390 = arith.index_cast %389 : i32 to index
    %c0_179 = arith.constant 0 : index
    %391 = vector.load %arg12[%390, %c0_179] : memref<128x512xbf16, #tpu.memory_space<vmem>>, vector<16x512xbf16>
    %392 = arith.extf %391 : vector<16x512xbf16> to vector<16x512xf32>
    %393 = arith.truncf %384 : vector<16x128xf32> to vector<16x128xbf16>
    %cst_180 = arith.constant dense<0.000000e+00> : vector<16x512xf32>
    %394 = tpu.matmul %393, %333, %cst_180 {dimension_numbers = #tpu.dot_dimension_numbers<[1], [0], [0], [1], [0, 0, 1, 1], [], []>} : vector<16x128xbf16>, vector<128x512xbf16>, vector<16x512xf32> -> vector<16x512xf32>
    %395 = arith.addf %392, %394 : vector<16x512xf32>
    %396 = math.tanh %395 : vector<16x512xf32>
    %397 = vector.extract_strided_slice %396 {offsets = [0, 0], sizes = [16, 384], strides = [1, 1]} : vector<16x512xf32> to vector<16x384xf32>
    %cst_181 = arith.constant 5.000000e-01 : f32
    %398 = vector.broadcast %cst_181 : f32 to vector<16x384xf32>
    %399 = arith.mulf %398, %397 : vector<16x384xf32>
    %cst_182 = arith.constant 5.000000e-01 : f32
    %400 = vector.broadcast %cst_182 : f32 to vector<16x384xf32>
    %401 = arith.addf %399, %400 : vector<16x384xf32>
    %402 = vector.extract_strided_slice %401 {offsets = [0, 0], sizes = [16, 128], strides = [1, 1]} : vector<16x384xf32> to vector<16x128xf32>
    %403 = vector.extract_strided_slice %401 {offsets = [0, 128], sizes = [16, 128], strides = [1, 1]} : vector<16x384xf32> to vector<16x128xf32>
    %404 = vector.extract_strided_slice %401 {offsets = [0, 256], sizes = [16, 128], strides = [1, 1]} : vector<16x384xf32> to vector<16x128xf32>
    %405 = vector.extract_strided_slice %396 {offsets = [0, 384], sizes = [16, 128], strides = [1, 1]} : vector<16x512xf32> to vector<16x128xf32>
    %406 = arith.mulf %403, %382 : vector<16x128xf32>
    %407 = arith.mulf %402, %405 : vector<16x128xf32>
    %408 = arith.addf %406, %407 : vector<16x128xf32>
    %409 = math.tanh %408 : vector<16x128xf32>
    %410 = arith.mulf %404, %409 : vector<16x128xf32>
    %411 = arith.truncf %410 : vector<16x128xf32> to vector<16x128xbf16>
    %412 = arith.index_cast %389 : i32 to index
    %c0_183 = arith.constant 0 : index
    %413 = vector.load %arg11[%412, %c0_183] : memref<128x128xbf16, #tpu.memory_space<vmem>>, vector<16x128xbf16>
    tpu.vector_store %arg11[%412, %c0_183], %411 {strides = array<i32>} : memref<128x128xbf16, #tpu.memory_space<vmem>>, vector<16x128xbf16>,
    %c3_i32_184 = arith.constant 3 : i32
    %c16_i32_185 = arith.constant 16 : i32
    %414 = arith.muli %c3_i32_184, %c16_i32_185 : i32
    %415 = tpu.assume_multiple %414, 16 : i32
    %416 = arith.index_cast %415 : i32 to index
    %c0_186 = arith.constant 0 : index
    %417 = vector.load %arg12[%416, %c0_186] : memref<128x512xbf16, #tpu.memory_space<vmem>>, vector<16x512xbf16>
    %418 = arith.extf %417 : vector<16x512xbf16> to vector<16x512xf32>
    %419 = arith.truncf %410 : vector<16x128xf32> to vector<16x128xbf16>
    %cst_187 = arith.constant dense<0.000000e+00> : vector<16x512xf32>
    %420 = tpu.matmul %419, %333, %cst_187 {dimension_numbers = #tpu.dot_dimension_numbers<[1], [0], [0], [1], [0, 0, 1, 1], [], []>} : vector<16x128xbf16>, vector<128x512xbf16>, vector<16x512xf32> -> vector<16x512xf32>
    %421 = arith.addf %418, %420 : vector<16x512xf32>
    %422 = math.tanh %421 : vector<16x512xf32>
    %423 = vector.extract_strided_slice %422 {offsets = [0, 0], sizes = [16, 384], strides = [1, 1]} : vector<16x512xf32> to vector<16x384xf32>
    %cst_188 = arith.constant 5.000000e-01 : f32
    %424 = vector.broadcast %cst_188 : f32 to vector<16x384xf32>
    %425 = arith.mulf %424, %423 : vector<16x384xf32>
    %cst_189 = arith.constant 5.000000e-01 : f32
    %426 = vector.broadcast %cst_189 : f32 to vector<16x384xf32>
    %427 = arith.addf %425, %426 : vector<16x384xf32>
    %428 = vector.extract_strided_slice %427 {offsets = [0, 0], sizes = [16, 128], strides = [1, 1]} : vector<16x384xf32> to vector<16x128xf32>
    %429 = vector.extract_strided_slice %427 {offsets = [0, 128], sizes = [16, 128], strides = [1, 1]} : vector<16x384xf32> to vector<16x128xf32>
    %430 = vector.extract_strided_slice %427 {offsets = [0, 256], sizes = [16, 128], strides = [1, 1]} : vector<16x384xf32> to vector<16x128xf32>
    %431 = vector.extract_strided_slice %422 {offsets = [0, 384], sizes = [16, 128], strides = [1, 1]} : vector<16x512xf32> to vector<16x128xf32>
    %432 = arith.mulf %429, %408 : vector<16x128xf32>
    %433 = arith.mulf %428, %431 : vector<16x128xf32>
    %434 = arith.addf %432, %433 : vector<16x128xf32>
    %435 = math.tanh %434 : vector<16x128xf32>
    %436 = arith.mulf %430, %435 : vector<16x128xf32>
    %437 = arith.truncf %436 : vector<16x128xf32> to vector<16x128xbf16>
    %438 = arith.index_cast %415 : i32 to index
    %c0_190 = arith.constant 0 : index
    %439 = vector.load %arg11[%438, %c0_190] : memref<128x128xbf16, #tpu.memory_space<vmem>>, vector<16x128xbf16>
    tpu.vector_store %arg11[%438, %c0_190], %437 {strides = array<i32>} : memref<128x128xbf16, #tpu.memory_space<vmem>>, vector<16x128xbf16>,
    %c4_i32_191 = arith.constant 4 : i32
    %c16_i32_192 = arith.constant 16 : i32
    %440 = arith.muli %c4_i32_191, %c16_i32_192 : i32
    %441 = tpu.assume_multiple %440, 16 : i32
    %442 = arith.index_cast %441 : i32 to index
    %c0_193 = arith.constant 0 : index
    %443 = vector.load %arg12[%442, %c0_193] : memref<128x512xbf16, #tpu.memory_space<vmem>>, vector<16x512xbf16>
    %444 = arith.extf %443 : vector<16x512xbf16> to vector<16x512xf32>
    %445 = arith.truncf %436 : vector<16x128xf32> to vector<16x128xbf16>
    %cst_194 = arith.constant dense<0.000000e+00> : vector<16x512xf32>
    %446 = tpu.matmul %445, %333, %cst_194 {dimension_numbers = #tpu.dot_dimension_numbers<[1], [0], [0], [1], [0, 0, 1, 1], [], []>} : vector<16x128xbf16>, vector<128x512xbf16>, vector<16x512xf32> -> vector<16x512xf32>
    %447 = arith.addf %444, %446 : vector<16x512xf32>
    %448 = math.tanh %447 : vector<16x512xf32>
    %449 = vector.extract_strided_slice %448 {offsets = [0, 0], sizes = [16, 384], strides = [1, 1]} : vector<16x512xf32> to vector<16x384xf32>
    %cst_195 = arith.constant 5.000000e-01 : f32
    %450 = vector.broadcast %cst_195 : f32 to vector<16x384xf32>
    %451 = arith.mulf %450, %449 : vector<16x384xf32>
    %cst_196 = arith.constant 5.000000e-01 : f32
    %452 = vector.broadcast %cst_196 : f32 to vector<16x384xf32>
    %453 = arith.addf %451, %452 : vector<16x384xf32>
    %454 = vector.extract_strided_slice %453 {offsets = [0, 0], sizes = [16, 128], strides = [1, 1]} : vector<16x384xf32> to vector<16x128xf32>
    %455 = vector.extract_strided_slice %453 {offsets = [0, 128], sizes = [16, 128], strides = [1, 1]} : vector<16x384xf32> to vector<16x128xf32>
    %456 = vector.extract_strided_slice %453 {offsets = [0, 256], sizes = [16, 128], strides = [1, 1]} : vector<16x384xf32> to vector<16x128xf32>
    %457 = vector.extract_strided_slice %448 {offsets = [0, 384], sizes = [16, 128], strides = [1, 1]} : vector<16x512xf32> to vector<16x128xf32>
    %458 = arith.mulf %455, %434 : vector<16x128xf32>
    %459 = arith.mulf %454, %457 : vector<16x128xf32>
    %460 = arith.addf %458, %459 : vector<16x128xf32>
    %461 = math.tanh %460 : vector<16x128xf32>
    %462 = arith.mulf %456, %461 : vector<16x128xf32>
    %463 = arith.truncf %462 : vector<16x128xf32> to vector<16x128xbf16>
    %464 = arith.index_cast %441 : i32 to index
    %c0_197 = arith.constant 0 : index
    %465 = vector.load %arg11[%464, %c0_197] : memref<128x128xbf16, #tpu.memory_space<vmem>>, vector<16x128xbf16>
    tpu.vector_store %arg11[%464, %c0_197], %463 {strides = array<i32>} : memref<128x128xbf16, #tpu.memory_space<vmem>>, vector<16x128xbf16>,
    %c5_i32_198 = arith.constant 5 : i32
    %c16_i32_199 = arith.constant 16 : i32
    %466 = arith.muli %c5_i32_198, %c16_i32_199 : i32
    %467 = tpu.assume_multiple %466, 16 : i32
    %468 = arith.index_cast %467 : i32 to index
    %c0_200 = arith.constant 0 : index
    %469 = vector.load %arg12[%468, %c0_200] : memref<128x512xbf16, #tpu.memory_space<vmem>>, vector<16x512xbf16>
    %470 = arith.extf %469 : vector<16x512xbf16> to vector<16x512xf32>
    %471 = arith.truncf %462 : vector<16x128xf32> to vector<16x128xbf16>
    %cst_201 = arith.constant dense<0.000000e+00> : vector<16x512xf32>
    %472 = tpu.matmul %471, %333, %cst_201 {dimension_numbers = #tpu.dot_dimension_numbers<[1], [0], [0], [1], [0, 0, 1, 1], [], []>} : vector<16x128xbf16>, vector<128x512xbf16>, vector<16x512xf32> -> vector<16x512xf32>
    %473 = arith.addf %470, %472 : vector<16x512xf32>
    %474 = math.tanh %473 : vector<16x512xf32>
    %475 = vector.extract_strided_slice %474 {offsets = [0, 0], sizes = [16, 384], strides = [1, 1]} : vector<16x512xf32> to vector<16x384xf32>
    %cst_202 = arith.constant 5.000000e-01 : f32
    %476 = vector.broadcast %cst_202 : f32 to vector<16x384xf32>
    %477 = arith.mulf %476, %475 : vector<16x384xf32>
    %cst_203 = arith.constant 5.000000e-01 : f32
    %478 = vector.broadcast %cst_203 : f32 to vector<16x384xf32>
    %479 = arith.addf %477, %478 : vector<16x384xf32>
    %480 = vector.extract_strided_slice %479 {offsets = [0, 0], sizes = [16, 128], strides = [1, 1]} : vector<16x384xf32> to vector<16x128xf32>
    %481 = vector.extract_strided_slice %479 {offsets = [0, 128], sizes = [16, 128], strides = [1, 1]} : vector<16x384xf32> to vector<16x128xf32>
    %482 = vector.extract_strided_slice %479 {offsets = [0, 256], sizes = [16, 128], strides = [1, 1]} : vector<16x384xf32> to vector<16x128xf32>
    %483 = vector.extract_strided_slice %474 {offsets = [0, 384], sizes = [16, 128], strides = [1, 1]} : vector<16x512xf32> to vector<16x128xf32>
    %484 = arith.mulf %481, %460 : vector<16x128xf32>
    %485 = arith.mulf %480, %483 : vector<16x128xf32>
    %486 = arith.addf %484, %485 : vector<16x128xf32>
    %487 = math.tanh %486 : vector<16x128xf32>
    %488 = arith.mulf %482, %487 : vector<16x128xf32>
    %489 = arith.truncf %488 : vector<16x128xf32> to vector<16x128xbf16>
    %490 = arith.index_cast %467 : i32 to index
    %c0_204 = arith.constant 0 : index
    %491 = vector.load %arg11[%490, %c0_204] : memref<128x128xbf16, #tpu.memory_space<vmem>>, vector<16x128xbf16>
    tpu.vector_store %arg11[%490, %c0_204], %489 {strides = array<i32>} : memref<128x128xbf16, #tpu.memory_space<vmem>>, vector<16x128xbf16>,
    %c6_i32_205 = arith.constant 6 : i32
    %c16_i32_206 = arith.constant 16 : i32
    %492 = arith.muli %c6_i32_205, %c16_i32_206 : i32
    %493 = tpu.assume_multiple %492, 16 : i32
    %494 = arith.index_cast %493 : i32 to index
    %c0_207 = arith.constant 0 : index
    %495 = vector.load %arg12[%494, %c0_207] : memref<128x512xbf16, #tpu.memory_space<vmem>>, vector<16x512xbf16>
    %496 = arith.extf %495 : vector<16x512xbf16> to vector<16x512xf32>
    %497 = arith.truncf %488 : vector<16x128xf32> to vector<16x128xbf16>
    %cst_208 = arith.constant dense<0.000000e+00> : vector<16x512xf32>
    %498 = tpu.matmul %497, %333, %cst_208 {dimension_numbers = #tpu.dot_dimension_numbers<[1], [0], [0], [1], [0, 0, 1, 1], [], []>} : vector<16x128xbf16>, vector<128x512xbf16>, vector<16x512xf32> -> vector<16x512xf32>
    %499 = arith.addf %496, %498 : vector<16x512xf32>
    %500 = math.tanh %499 : vector<16x512xf32>
    %501 = vector.extract_strided_slice %500 {offsets = [0, 0], sizes = [16, 384], strides = [1, 1]} : vector<16x512xf32> to vector<16x384xf32>
    %cst_209 = arith.constant 5.000000e-01 : f32
    %502 = vector.broadcast %cst_209 : f32 to vector<16x384xf32>
    %503 = arith.mulf %502, %501 : vector<16x384xf32>
    %cst_210 = arith.constant 5.000000e-01 : f32
    %504 = vector.broadcast %cst_210 : f32 to vector<16x384xf32>
    %505 = arith.addf %503, %504 : vector<16x384xf32>
    %506 = vector.extract_strided_slice %505 {offsets = [0, 0], sizes = [16, 128], strides = [1, 1]} : vector<16x384xf32> to vector<16x128xf32>
    %507 = vector.extract_strided_slice %505 {offsets = [0, 128], sizes = [16, 128], strides = [1, 1]} : vector<16x384xf32> to vector<16x128xf32>
    %508 = vector.extract_strided_slice %505 {offsets = [0, 256], sizes = [16, 128], strides = [1, 1]} : vector<16x384xf32> to vector<16x128xf32>
    %509 = vector.extract_strided_slice %500 {offsets = [0, 384], sizes = [16, 128], strides = [1, 1]} : vector<16x512xf32> to vector<16x128xf32>
    %510 = arith.mulf %507, %486 : vector<16x128xf32>
    %511 = arith.mulf %506, %509 : vector<16x128xf32>
    %512 = arith.addf %510, %511 : vector<16x128xf32>
    %513 = math.tanh %512 : vector<16x128xf32>
    %514 = arith.mulf %508, %513 : vector<16x128xf32>
    %515 = arith.truncf %514 : vector<16x128xf32> to vector<16x128xbf16>
    %516 = arith.index_cast %493 : i32 to index
    %c0_211 = arith.constant 0 : index
    %517 = vector.load %arg11[%516, %c0_211] : memref<128x128xbf16, #tpu.memory_space<vmem>>, vector<16x128xbf16>
    tpu.vector_store %arg11[%516, %c0_211], %515 {strides = array<i32>} : memref<128x128xbf16, #tpu.memory_space<vmem>>, vector<16x128xbf16>,
    %c7_i32_212 = arith.constant 7 : i32
    %c16_i32_213 = arith.constant 16 : i32
    %518 = arith.muli %c7_i32_212, %c16_i32_213 : i32
    %519 = tpu.assume_multiple %518, 16 : i32
    %520 = arith.index_cast %519 : i32 to index
    %c0_214 = arith.constant 0 : index
    %521 = vector.load %arg12[%520, %c0_214] : memref<128x512xbf16, #tpu.memory_space<vmem>>, vector<16x512xbf16>
    %522 = arith.extf %521 : vector<16x512xbf16> to vector<16x512xf32>
    %523 = arith.truncf %514 : vector<16x128xf32> to vector<16x128xbf16>
    %cst_215 = arith.constant dense<0.000000e+00> : vector<16x512xf32>
    %524 = tpu.matmul %523, %333, %cst_215 {dimension_numbers = #tpu.dot_dimension_numbers<[1], [0], [0], [1], [0, 0, 1, 1], [], []>} : vector<16x128xbf16>, vector<128x512xbf16>, vector<16x512xf32> -> vector<16x512xf32>
    %525 = arith.addf %522, %524 : vector<16x512xf32>
    %526 = math.tanh %525 : vector<16x512xf32>
    %527 = vector.extract_strided_slice %526 {offsets = [0, 0], sizes = [16, 384], strides = [1, 1]} : vector<16x512xf32> to vector<16x384xf32>
    %cst_216 = arith.constant 5.000000e-01 : f32
    %528 = vector.broadcast %cst_216 : f32 to vector<16x384xf32>
    %529 = arith.mulf %528, %527 : vector<16x384xf32>
    %cst_217 = arith.constant 5.000000e-01 : f32
    %530 = vector.broadcast %cst_217 : f32 to vector<16x384xf32>
    %531 = arith.addf %529, %530 : vector<16x384xf32>
    %532 = vector.extract_strided_slice %531 {offsets = [0, 0], sizes = [16, 128], strides = [1, 1]} : vector<16x384xf32> to vector<16x128xf32>
    %533 = vector.extract_strided_slice %531 {offsets = [0, 128], sizes = [16, 128], strides = [1, 1]} : vector<16x384xf32> to vector<16x128xf32>
    %534 = vector.extract_strided_slice %531 {offsets = [0, 256], sizes = [16, 128], strides = [1, 1]} : vector<16x384xf32> to vector<16x128xf32>
    %535 = vector.extract_strided_slice %526 {offsets = [0, 384], sizes = [16, 128], strides = [1, 1]} : vector<16x512xf32> to vector<16x128xf32>
    %536 = arith.mulf %533, %512 : vector<16x128xf32>
    %537 = arith.mulf %532, %535 : vector<16x128xf32>
    %538 = arith.addf %536, %537 : vector<16x128xf32>
    %539 = math.tanh %538 : vector<16x128xf32>
    %540 = arith.mulf %534, %539 : vector<16x128xf32>
    %541 = arith.truncf %540 : vector<16x128xf32> to vector<16x128xbf16>
    %542 = arith.index_cast %519 : i32 to index
    %c0_218 = arith.constant 0 : index
    %543 = vector.load %arg11[%542, %c0_218] : memref<128x128xbf16, #tpu.memory_space<vmem>>, vector<16x128xbf16>
    tpu.vector_store %arg11[%542, %c0_218], %541 {strides = array<i32>} : memref<128x128xbf16, #tpu.memory_space<vmem>>, vector<16x128xbf16>,
    %c8_i32_219 = arith.constant 8 : i32
    %c0_220 = arith.constant 0 : index
    %c0_221 = arith.constant 0 : index
    %544 = vector.load %arg8[%c0_220, %c0_221] : memref<128x128xbf16, #tpu.memory_space<vmem>>, vector<128x128xbf16>
    %c0_222 = arith.constant 0 : index
    %c0_223 = arith.constant 0 : index
    %545 = vector.load %arg9[%c0_222, %c0_223] : memref<1x128xf32, #tpu.memory_space<vmem>>, vector<1x128xf32>
    %c0_224 = arith.constant 0 : index
    %c0_225 = arith.constant 0 : index
    %546 = vector.load %arg11[%c0_224, %c0_225] : memref<128x128xbf16, #tpu.memory_space<vmem>>, vector<16x128xbf16>
    %cst_226 = arith.constant dense<0.000000e+00> : vector<16x128xf32>
    %547 = tpu.matmul %546, %544, %cst_226 {dimension_numbers = #tpu.dot_dimension_numbers<[1], [0], [0], [1], [0, 0, 1, 1], [], []>} : vector<16x128xbf16>, vector<128x128xbf16>, vector<16x128xf32> -> vector<16x128xf32>
    %548 = vector.broadcast %545 : vector<1x128xf32> to vector<16x128xf32>
    %549 = arith.addf %547, %548 : vector<16x128xf32>
    %550 = arith.truncf %549 : vector<16x128xf32> to vector<16x128xbf16>
    %c0_227 = arith.constant 0 : index
    %c0_228 = arith.constant 0 : index
    %551 = vector.load %arg10[%c0_227, %c0_228] : memref<16x1024xbf16, #tpu.memory_space<vmem>>, vector<16x128xbf16>
    tpu.vector_store %arg10[%c0_227, %c0_228], %550 {strides = array<i32>} : memref<16x1024xbf16, #tpu.memory_space<vmem>>, vector<16x128xbf16>,
    %c16_229 = arith.constant 16 : index
    %c0_230 = arith.constant 0 : index
    %552 = vector.load %arg11[%c16_229, %c0_230] : memref<128x128xbf16, #tpu.memory_space<vmem>>, vector<16x128xbf16>
    %cst_231 = arith.constant dense<0.000000e+00> : vector<16x128xf32>
    %553 = tpu.matmul %552, %544, %cst_231 {dimension_numbers = #tpu.dot_dimension_numbers<[1], [0], [0], [1], [0, 0, 1, 1], [], []>} : vector<16x128xbf16>, vector<128x128xbf16>, vector<16x128xf32> -> vector<16x128xf32>
    %554 = vector.broadcast %545 : vector<1x128xf32> to vector<16x128xf32>
    %555 = arith.addf %553, %554 : vector<16x128xf32>
    %556 = arith.truncf %555 : vector<16x128xf32> to vector<16x128xbf16>
    %c0_232 = arith.constant 0 : index
    %c128 = arith.constant 128 : index
    %557 = vector.load %arg10[%c0_232, %c128] : memref<16x1024xbf16, #tpu.memory_space<vmem>>, vector<16x128xbf16>
    tpu.vector_store %arg10[%c0_232, %c128], %556 {strides = array<i32>} : memref<16x1024xbf16, #tpu.memory_space<vmem>>, vector<16x128xbf16>,
    %c32_233 = arith.constant 32 : index
    %c0_234 = arith.constant 0 : index
    %558 = vector.load %arg11[%c32_233, %c0_234] : memref<128x128xbf16, #tpu.memory_space<vmem>>, vector<16x128xbf16>
    %cst_235 = arith.constant dense<0.000000e+00> : vector<16x128xf32>
    %559 = tpu.matmul %558, %544, %cst_235 {dimension_numbers = #tpu.dot_dimension_numbers<[1], [0], [0], [1], [0, 0, 1, 1], [], []>} : vector<16x128xbf16>, vector<128x128xbf16>, vector<16x128xf32> -> vector<16x128xf32>
    %560 = vector.broadcast %545 : vector<1x128xf32> to vector<16x128xf32>
    %561 = arith.addf %559, %560 : vector<16x128xf32>
    %562 = arith.truncf %561 : vector<16x128xf32> to vector<16x128xbf16>
    %c0_236 = arith.constant 0 : index
    %c256 = arith.constant 256 : index
    %563 = vector.load %arg10[%c0_236, %c256] : memref<16x1024xbf16, #tpu.memory_space<vmem>>, vector<16x128xbf16>
    tpu.vector_store %arg10[%c0_236, %c256], %562 {strides = array<i32>} : memref<16x1024xbf16, #tpu.memory_space<vmem>>, vector<16x128xbf16>,
    %c48_237 = arith.constant 48 : index
    %c0_238 = arith.constant 0 : index
    %564 = vector.load %arg11[%c48_237, %c0_238] : memref<128x128xbf16, #tpu.memory_space<vmem>>, vector<16x128xbf16>
    %cst_239 = arith.constant dense<0.000000e+00> : vector<16x128xf32>
    %565 = tpu.matmul %564, %544, %cst_239 {dimension_numbers = #tpu.dot_dimension_numbers<[1], [0], [0], [1], [0, 0, 1, 1], [], []>} : vector<16x128xbf16>, vector<128x128xbf16>, vector<16x128xf32> -> vector<16x128xf32>
    %566 = vector.broadcast %545 : vector<1x128xf32> to vector<16x128xf32>
    %567 = arith.addf %565, %566 : vector<16x128xf32>
    %568 = arith.truncf %567 : vector<16x128xf32> to vector<16x128xbf16>
    %c0_240 = arith.constant 0 : index
    %c384 = arith.constant 384 : index
    %569 = vector.load %arg10[%c0_240, %c384] : memref<16x1024xbf16, #tpu.memory_space<vmem>>, vector<16x128xbf16>
    tpu.vector_store %arg10[%c0_240, %c384], %568 {strides = array<i32>} : memref<16x1024xbf16, #tpu.memory_space<vmem>>, vector<16x128xbf16>,
    %c64_241 = arith.constant 64 : index
    %c0_242 = arith.constant 0 : index
    %570 = vector.load %arg11[%c64_241, %c0_242] : memref<128x128xbf16, #tpu.memory_space<vmem>>, vector<16x128xbf16>
    %cst_243 = arith.constant dense<0.000000e+00> : vector<16x128xf32>
    %571 = tpu.matmul %570, %544, %cst_243 {dimension_numbers = #tpu.dot_dimension_numbers<[1], [0], [0], [1], [0, 0, 1, 1], [], []>} : vector<16x128xbf16>, vector<128x128xbf16>, vector<16x128xf32> -> vector<16x128xf32>
    %572 = vector.broadcast %545 : vector<1x128xf32> to vector<16x128xf32>
    %573 = arith.addf %571, %572 : vector<16x128xf32>
    %574 = arith.truncf %573 : vector<16x128xf32> to vector<16x128xbf16>
    %c0_244 = arith.constant 0 : index
    %c512 = arith.constant 512 : index
    %575 = vector.load %arg10[%c0_244, %c512] : memref<16x1024xbf16, #tpu.memory_space<vmem>>, vector<16x128xbf16>
    tpu.vector_store %arg10[%c0_244, %c512], %574 {strides = array<i32>} : memref<16x1024xbf16, #tpu.memory_space<vmem>>, vector<16x128xbf16>,
    %c80_245 = arith.constant 80 : index
    %c0_246 = arith.constant 0 : index
    %576 = vector.load %arg11[%c80_245, %c0_246] : memref<128x128xbf16, #tpu.memory_space<vmem>>, vector<16x128xbf16>
    %cst_247 = arith.constant dense<0.000000e+00> : vector<16x128xf32>
    %577 = tpu.matmul %576, %544, %cst_247 {dimension_numbers = #tpu.dot_dimension_numbers<[1], [0], [0], [1], [0, 0, 1, 1], [], []>} : vector<16x128xbf16>, vector<128x128xbf16>, vector<16x128xf32> -> vector<16x128xf32>
    %578 = vector.broadcast %545 : vector<1x128xf32> to vector<16x128xf32>
    %579 = arith.addf %577, %578 : vector<16x128xf32>
    %580 = arith.truncf %579 : vector<16x128xf32> to vector<16x128xbf16>
    %c0_248 = arith.constant 0 : index
    %c640 = arith.constant 640 : index
    %581 = vector.load %arg10[%c0_248, %c640] : memref<16x1024xbf16, #tpu.memory_space<vmem>>, vector<16x128xbf16>
    tpu.vector_store %arg10[%c0_248, %c640], %580 {strides = array<i32>} : memref<16x1024xbf16, #tpu.memory_space<vmem>>, vector<16x128xbf16>,
    %c96_249 = arith.constant 96 : index
    %c0_250 = arith.constant 0 : index
    %582 = vector.load %arg11[%c96_249, %c0_250] : memref<128x128xbf16, #tpu.memory_space<vmem>>, vector<16x128xbf16>
    %cst_251 = arith.constant dense<0.000000e+00> : vector<16x128xf32>
    %583 = tpu.matmul %582, %544, %cst_251 {dimension_numbers = #tpu.dot_dimension_numbers<[1], [0], [0], [1], [0, 0, 1, 1], [], []>} : vector<16x128xbf16>, vector<128x128xbf16>, vector<16x128xf32> -> vector<16x128xf32>
    %584 = vector.broadcast %545 : vector<1x128xf32> to vector<16x128xf32>
    %585 = arith.addf %583, %584 : vector<16x128xf32>
    %586 = arith.truncf %585 : vector<16x128xf32> to vector<16x128xbf16>
    %c0_252 = arith.constant 0 : index
    %c768 = arith.constant 768 : index
    %587 = vector.load %arg10[%c0_252, %c768] : memref<16x1024xbf16, #tpu.memory_space<vmem>>, vector<16x128xbf16>
    tpu.vector_store %arg10[%c0_252, %c768], %586 {strides = array<i32>} : memref<16x1024xbf16, #tpu.memory_space<vmem>>, vector<16x128xbf16>,
    %c112_253 = arith.constant 112 : index
    %c0_254 = arith.constant 0 : index
    %588 = vector.load %arg11[%c112_253, %c0_254] : memref<128x128xbf16, #tpu.memory_space<vmem>>, vector<16x128xbf16>
    %cst_255 = arith.constant dense<0.000000e+00> : vector<16x128xf32>
    %589 = tpu.matmul %588, %544, %cst_255 {dimension_numbers = #tpu.dot_dimension_numbers<[1], [0], [0], [1], [0, 0, 1, 1], [], []>} : vector<16x128xbf16>, vector<128x128xbf16>, vector<16x128xf32> -> vector<16x128xf32>
    %590 = vector.broadcast %545 : vector<1x128xf32> to vector<16x128xf32>
    %591 = arith.addf %589, %590 : vector<16x128xf32>
    %592 = arith.truncf %591 : vector<16x128xf32> to vector<16x128xbf16>
    %c0_256 = arith.constant 0 : index
    %c896 = arith.constant 896 : index
    %593 = vector.load %arg10[%c0_256, %c896] : memref<16x1024xbf16, #tpu.memory_space<vmem>>, vector<16x128xbf16>
    tpu.vector_store %arg10[%c0_256, %c896], %592 {strides = array<i32>} : memref<16x1024xbf16, #tpu.memory_space<vmem>>, vector<16x128xbf16>,
    return
  }
  func.func @transform_0(%arg0: i32) -> (i32, i32, i32) {
    %c0_i32 = arith.constant 0 : i32
    %c0_i32_0 = arith.constant 0 : i32
    %c0_i32_1 = arith.constant 0 : i32
    return %c0_i32, %arg0, %c0_i32_0 : i32, i32, i32
  }
  func.func @transform_1(%arg0: i32) -> (i32, i32) {
    %c0_i32 = arith.constant 0 : i32
    %c0_i32_0 = arith.constant 0 : i32
    %c0_i32_1 = arith.constant 0 : i32
    return %c0_i32, %c0_i32_0 : i32, i32
  }
  func.func @transform_2(%arg0: i32) -> (i32, i32) {
    %c0_i32 = arith.constant 0 : i32
    %c0_i32_0 = arith.constant 0 : i32
    %c0_i32_1 = arith.constant 0 : i32
    return %c0_i32, %c0_i32_0 : i32, i32
  }
  func.func @transform_3(%arg0: i32) -> (i32, i32) {
    %c0_i32 = arith.constant 0 : i32
    %c0_i32_0 = arith.constant 0 : i32
    %c0_i32_1 = arith.constant 0 : i32
    return %c0_i32, %c0_i32_0 : i32, i32
  }
  func.func @transform_4(%arg0: i32) -> (i32, i32) {
    %c0_i32 = arith.constant 0 : i32
    %c0_i32_0 = arith.constant 0 : i32
    %c0_i32_1 = arith.constant 0 : i32
    return %c0_i32, %c0_i32_0 : i32, i32
  }
  func.func @transform_5(%arg0: i32) -> (i32, i32) {
    %c0_i32 = arith.constant 0 : i32
    %c0_i32_0 = arith.constant 0 : i32
    %c0_i32_1 = arith.constant 0 : i32
    return %c0_i32, %c0_i32_0 : i32, i32
  }
  func.func @transform_6(%arg0: i32) -> (i32, i32) {
    %c0_i32 = arith.constant 0 : i32
    %c0_i32_0 = arith.constant 0 : i32
    %c0_i32_1 = arith.constant 0 : i32
    return %c0_i32, %c0_i32_0 : i32, i32
  }
  func.func @transform_7(%arg0: i32) -> (i32, i32) {
    %c0_i32 = arith.constant 0 : i32
    %c0_i32_0 = arith.constant 0 : i32
    %c0_i32_1 = arith.constant 0 : i32
    return %c0_i32, %c0_i32_0 : i32, i32
  }
  func.func @transform_8(%arg0: i32) -> (i32, i32) {
    %c0_i32 = arith.constant 0 : i32
    %c0_i32_0 = arith.constant 0 : i32
    %c0_i32_1 = arith.constant 0 : i32
    return %c0_i32, %c0_i32_0 : i32, i32
  }
  func.func @transform_9(%arg0: i32) -> (i32, i32) {
    %c0_i32 = arith.constant 0 : i32
    %c0_i32_0 = arith.constant 0 : i32
    return %arg0, %c0_i32 : i32, i32
  }
}

</mosaic_0001>

<bundles_post_ra>
// kernel: tpu_custom_call.1
= control target key start
LH: loop header
LB: loop body
LE: loop exit
PB: predicated region body
PF: predicated region fallthrough
CT: control target
= control target key end

     0   :  { %14 = vsyncpa [#allocation5], 0  ;;  %s10988_s0 = inlined_call_operand.vmem [shape: bf16[8,16,4], index: 0, kind: input, shape index: {}]   ;;  %s10989_s1 = inlined_call_operand.vmem [shape: bf16[4,512], index: 1, kind: input, shape index: {}]   ;;  %s10990_s2 = inlined_call_operand.hbm [shape: bf16[128,512], index: 2, kind: input, shape index: {}]   ;;  %s10991_s3 = inlined_call_operand.vmem [shape: f32[1,512], index: 3, kind: input, shape index: {}]   ;;  %s10992_s4 = inlined_call_operand.hbm [shape: bf16[128,512], index: 4, kind: input, shape index: {}]   ;;  %s10993_s5 = inlined_call_operand.hbm [shape: bf16[128,512], index: 5, kind: input, shape index: {}]   ;;  %s10994_s6 = inlined_call_operand.vmem [shape: f32[1,512], index: 6, kind: input, shape index: {}]   ;;  %s10995_s7 = inlined_call_operand.vmem [shape: bf16[128,128], index: 7, kind: input, shape index: {}]   ;;  %s10996_s8 = inlined_call_operand.vmem [shape: f32[1,128], index: 8, kind: input, shape index: {}]   ;;  %s10997_s9 = inlined_call_operand.hbm [shape: bf16[16,1024], index: 9, kind: output, shape index: {}]  }
   0x1   :  { %15 = vsyncpa [#allocation8], 0 }
   0x2   :  { %16 = vsyncpa [#allocation6], 0  ;;  %s8841_s30 = smov [#allocation7]   ;;  %s8842_s11 = smov [#allocation4]  }
   0x3   :  { %s40_s10 = sshll.u32 %s8841_s30, 4  ;;  %s26_s12 = sshll.u32 %s8842_s11, 4  ;;  %s41_s10 = int_to_ptr.vmem [resolvable:$true] %s40_s10  ;;  %s27_s12 = int_to_ptr.vmem [resolvable:$true] %s26_s12 }
   0x4   :  { %s8763_s13 = scalar_lea.vmem %s41_s10, 4096  ;;  %p8768_p1 = scmp.lt.s32.totalorder %s41_s10, %s41_s10 }
   0x5   :  { %p8764_p0 = scmp.ne.s32.totalorder %s41_s10, %s8763_s13  ;;  %p8769_p2 = scmp.lt.s32.totalorder %s8763_s13, %s8763_s13 }
   0x7   :  { %p8770_p3 = por %p8769_p2, %p8768_p1 }
   0x9   :  { %p8771_p4 = pnand %p8770_p3, %p8764_p0 }
   0xb   :  { %8774 = shalt.err (!%p8771_p4)
}
   0xc   :  { %s8843_s14 = smov 256   ;;  %s8844_s15 = smov 16  }
   0xd   :  { %46 = dma.hbm_to_vmem [thread:$0]  %s10992_s4, 4096, %s41_s10, [#allocation8], %s8843_s14, %s8843_s14, %s8844_s15  }
   0xe   :  { %s8783_s18 = scalar_lea.vmem %s27_s12, 4096  ;;  %p8788_p6 = scmp.lt.s32.totalorder %s27_s12, %s27_s12 }
   0xf   :  { %p8784_p5 = scmp.ne.s32.totalorder %s27_s12, %s8783_s18  ;;  %p8789_p7 = scmp.lt.s32.totalorder %s8783_s18, %s8783_s18 }
  0x11   :  { %p8790_p8 = por %p8789_p7, %p8788_p6 }
  0x13   :  { %p8791_p9 = pnand %p8790_p8, %p8784_p5 }
  0x15   :  { %8794 = shalt.err (!%p8791_p9)
}
  0x16   :  { %32 = dma.hbm_to_vmem [thread:$0]  %s10990_s2, 4096, %s27_s12, [#allocation5], %s8843_s14, %s8843_s14, %s8844_s15  }
  0x17   :  { %s8845_s21 = smov [#allocation9]  }
  0x18   :  { %s52_s22 = sshll.u32 %s8845_s21, 4  ;;  %s53_s22 = int_to_ptr.vmem [resolvable:$true] %s52_s22 }
  0x19   :  { %s8803_s23 = scalar_lea.vmem %s53_s22, 4096  ;;  %p8808_p11 = scmp.lt.s32.totalorder %s53_s22, %s53_s22 }
  0x1a   :  { %p8804_p10 = scmp.ne.s32.totalorder %s53_s22, %s8803_s23  ;;  %p8809_p12 = scmp.lt.s32.totalorder %s8803_s23, %s8803_s23 }
  0x1c   :  { %p8810_p13 = por %p8809_p12, %p8808_p11 }
  0x1e   :  { %p8811_p0 = pnand %p8810_p13, %p8804_p10 }
  0x20   :  { %8814 = shalt.err (!%p8811_p0)
}
  0x21   :  { %58 = dma.hbm_to_vmem [thread:$0]  %s10993_s5, 4096, %s53_s22, [#allocation8], %s8843_s14, %s8843_s14, %s8844_s15  }
  0x22   :  { %8835 = dma.done.wait [#allocation5], 4096  }
  0x23   :  { %8836 = vsyncadd [#allocation5], 4294963200 }
  0x24   :  { %8837 = dma.done.wait [#allocation8], 8192  }
  0x25   :  { %8838 = vsyncadd [#allocation8], 4294959104  ;;  %v80_v0 = vlaneseq  ;;  %v8846_v1 = vmov 1983009808   ;;  %v11002_v3 = vmov 0   ;;  %v78_v7 = vld [vmem:[%s10989_s1] sm:$0xff] }
  0x26   :  { %v108_v2 = vunpack.c.l.s4 %v8846_v1  ;;  %172 = vmatprep.mubr.bf16.mxu0 %v11002_v3  ;;  %215 = vmatprep.mubr.bf16.mxu1 %v11002_v3  ;;  %vm127_vm0 = vcmask 1041408   ;;  %v106_v9 = vcombine.high %v78_v7, %v78_v7  ;;  %v8147_v15 = vld [vmem:[%s10988_s0] sm:$0xff]   ;;  %vm123_vm1 = vcmask 31744   ;;  %v8148_v16 = vld [vmem:[%s10988_s0 + $0x8] sm:$0xff]   ;;  %v8149_v17 = vld [vmem:[%s10988_s0 + $0x10] sm:$0xff]  }
  0x27   :  { %v8914_v4 = vshrl.u32 %v80_v0, 7  ;;  %v8150_v18 = vld [vmem:[%s10988_s0 + $0x18] sm:$0xff]   ;;  %v8151_v19 = vld [vmem:[%s10988_s0 + $0x20] sm:$0xff]   ;;  %v8152_v20 = vld [vmem:[%s10988_s0 + $0x28] sm:$0xff]   ;;  %vm8849_vm2 = vmmov 0  }
  0x28   :  { %v109_v5 = vunpack.c.0.s8 %v108_v2  ;;  %v8153_v21 = vld [vmem:[%s10988_s0 + $0x30] sm:$0xff]   ;;  %v9013_v23 = vld [vmem:[#allocation4 + $0xec] ss:$16 sps:$4 sm:$0xff]   ;;  %v9030_v27 = vld [vmem:[#allocation4 + $0xe8] ss:$16 sps:$4 sm:$0xff]  }
  0x29   :  { %11049 = vst [vmem:[#allocation14_spill] sm:$0xff] %v8914_v4  ;;  %v9011_v22 = vld [vmem:[#allocation4 + $0xe4] ss:$16 sps:$4 sm:$0xff]   ;;  %v8156_v24 = vld [vmem:[%s10988_s0 + $0x38] sm:$0xff]   ;;  %v9024_v25 = vld [vmem:[#allocation4 + $0xe0] ss:$16 sps:$4 sm:$0xff]  }
  0x2a   :  { %v112_v6 = vsub.s32 %v109_v5, %v8914_v4  ;;  %v9028_v26 = vld [vmem:[#allocation4 + $0xc4] ss:$16 sps:$4 sm:$0xff]   ;;  %v9032_v28 = vld [vmem:[#allocation4 + $0xcc] ss:$16 sps:$4 sm:$0xff]   ;;  %v9034_v29 = vld [vmem:[#allocation4 + $0xc0] ss:$16 sps:$4 sm:$0xff]  }
  0x2b   :  { %v9041_v30 = vld [vmem:[#allocation4 + $0xa4] ss:$16 sps:$4 sm:$0xff]   ;;  %v9044_v31 = vld [vmem:[#allocation4 + $0xc8] ss:$16 sps:$4 sm:$0xff]   ;;  %v9048_v32 = vld [vmem:[#allocation4 + $0xac] ss:$16 sps:$4 sm:$0xff]  }
  0x2c   :  { %v113_v8 = vrot.slane %v78_v7, %v112_v6  ;;  %v120_v12 = vrot.slane %v106_v9, %v112_v6  ;;  %v9051_v33 = vld [vmem:[#allocation4 + $0xa0] ss:$16 sps:$4 sm:$0xff]   ;;  %v9054_v34 = vld [vmem:[#allocation4 + $0x84] ss:$16 sps:$4 sm:$0xff]   ;;  %v9057_v35 = vld [vmem:[#allocation4 + $0xa8] ss:$16 sps:$4 sm:$0xff]  }
  0x2d   :  { %v9060_v36 = vld [vmem:[#allocation4 + $0x8c] ss:$16 sps:$4 sm:$0xff]   ;;  %v9063_v37 = vld [vmem:[#allocation4 + $0x80] ss:$16 sps:$4 sm:$0xff]   ;;  %v9066_v38 = vld [vmem:[#allocation4 + $0x64] ss:$16 sps:$4 sm:$0xff]  }
  0x2e   :  { %v8920_v10 = vcombine.high %v113_v8, %v113_v8  ;;  %v8923_v11 = vsel %vm127_vm0, %v113_v8, 0  ;;  %v122_v13 = vcombine.high %v120_v12, %v120_v12  ;;  %v8928_v14 = vsel %vm127_vm0, %v120_v12, 0  ;;  %v9069_v39 = vld [vmem:[#allocation4 + $0x88] ss:$16 sps:$4 sm:$0xff]   ;;  %v9072_v40 = vld [vmem:[#allocation4 + $0x6c] ss:$16 sps:$4 sm:$0xff]  }
  0x2f   :  { %v9075_v41 = vld [vmem:[#allocation4 + $0x60] ss:$16 sps:$4 sm:$0xff]   ;;  %v9078_v42 = vld [vmem:[#allocation4 + $0x44] ss:$16 sps:$4 sm:$0xff]   ;;  %v9081_v43 = vld [vmem:[#allocation4 + $0x68] ss:$16 sps:$4 sm:$0xff]  }
  0x30   :  { %7200 = vmatprep.subr.msk.bf16.mxu0 %vm127_vm0, %v8920_v10  ;;  %7202 = vmatprep.subr.msk.bf16.mxu1 %vm127_vm0, %v122_v13  ;;  %v9084_v44 = vld [vmem:[#allocation4 + $0x4c] ss:$16 sps:$4 sm:$0xff]   ;;  %v9087_v45 = vld [vmem:[#allocation4 + $0x40] ss:$16 sps:$4 sm:$0xff]   ;;  %v9090_v46 = vld [vmem:[#allocation4 + $0x24] ss:$16 sps:$4 sm:$0xff]  }
  0x31   :  { %155 = vmatpush1.bf16.msra.mxu0 %v8923_v11  ;;  %198 = vmatpush1.bf16.msra.mxu1 %v8928_v14  ;;  %v9093_v47 = vld [vmem:[#allocation4 + $0x48] ss:$16 sps:$4 sm:$0xff]   ;;  %v9096_v48 = vld [vmem:[#allocation4 + $0x2c] ss:$16 sps:$4 sm:$0xff]   ;;  %v9099_v49 = vld [vmem:[#allocation4 + $0x20] ss:$16 sps:$4 sm:$0xff]  }
  0x32   :  { %7211 = vmatprep.subr.msk.bf16.mxu0 %vm127_vm0, %v8920_v10  ;;  %7213 = vmatprep.subr.msk.bf16.mxu1 %vm127_vm0, %v122_v13  ;;  %v9102_v50 = vld [vmem:[#allocation4 + $0x4] ss:$16 sps:$4 sm:$0xff]   ;;  %v9105_v51 = vld [vmem:[#allocation4 + $0x28] ss:$16 sps:$4 sm:$0xff]   ;;  %v9108_v52 = vld [vmem:[#allocation4 + $0xc] ss:$16 sps:$4 sm:$0xff]  }
  0x33   :  { %v9111_v53 = vld [vmem:[#allocation4] ss:$16 sps:$4 sm:$0xff]   ;;  %v9115_v54 = vld [vmem:[#allocation4 + $0x8] ss:$16 sps:$4 sm:$0xff]   ;;  %v11001_v58 = vsub.s32 0, %v8914_v4  ;;  %v10998_v62 = vsub.s32 1, %v8914_v4 }
  0x34   :  { %7201 = vmatmul.mubr.msk.bf16.vlgmr.msra.gmra.mxu0 %vm123_vm1, %v8147_v15  ;;  %7203 = vmatmul.mubr.msk.bf16.vlgmr.msra.gmra.mxu1 %vm123_vm1, %v8147_v15  ;;  %v75_v59 = vld [vmem:[%s10991_s3] sm:$0xf]  ;;  %v11000_v63 = vsub.s32 2, %v8914_v4  ;;  %v10999_v5 = vsub.s32 3, %v8914_v4 }
  0x35   :  { %311 = vmatpush1.bf16.msra.mxu0 %v8923_v11  ;;  %328 = vmatprep.mubr.bf16.mxu0 %v11002_v3  ;;  %v9180_v2 = vrot.slane %v75_v59, %v11001_v58  ;;  %v9187_v8 = vrot.slane %v75_v59, %v10998_v62 }
  0x36   :  { %7222 = vmatprep.subr.msk.bf16.mxu0 %vm127_vm0, %v8920_v10  ;;  %354 = vmatpush1.bf16.msra.mxu1 %v8928_v14  ;;  %v9191_v9 = vrot.slane %v75_v59, %v11000_v63 }
  0x37   :  { %371 = vmatprep.mubr.bf16.mxu1 %v11002_v3  ;;  %7224 = vmatprep.subr.msk.bf16.mxu1 %vm127_vm0, %v122_v13 }
  0x3c   :  { %7212 = vmatmul.mubr.msk.bf16.vlgmr.msra.gmra.mxu0 %vm123_vm1, %v8148_v16  ;;  %7214 = vmatmul.mubr.msk.bf16.vlgmr.msra.gmra.mxu1 %vm123_vm1, %v8148_v16 }
  0x3d   :  { %467 = vmatpush1.bf16.msra.mxu0 %v8923_v11  ;;  %484 = vmatprep.mubr.bf16.mxu0 %v11002_v3 }
  0x3e   :  { %7233 = vmatprep.subr.msk.bf16.mxu0 %vm127_vm0, %v8920_v10  ;;  %510 = vmatpush1.bf16.msra.mxu1 %v8928_v14 }
  0x3f   :  { %527 = vmatprep.mubr.bf16.mxu1 %v11002_v3  ;;  %7235 = vmatprep.subr.msk.bf16.mxu1 %vm127_vm0, %v122_v13 }
  0x44   :  { %7223 = vmatmul.mubr.msk.bf16.vlgmr.msra.gmra.mxu0 %vm123_vm1, %v8149_v17  ;;  %7225 = vmatmul.mubr.msk.bf16.vlgmr.msra.gmra.mxu1 %vm123_vm1, %v8149_v17 }
  0x45   :  { %623 = vmatpush1.bf16.msra.mxu0 %v8923_v11  ;;  %640 = vmatprep.mubr.bf16.mxu0 %v11002_v3 }
  0x46   :  { %7244 = vmatprep.subr.msk.bf16.mxu0 %vm127_vm0, %v8920_v10  ;;  %666 = vmatpush1.bf16.msra.mxu1 %v8928_v14 }
  0x47   :  { %683 = vmatprep.mubr.bf16.mxu1 %v11002_v3  ;;  %7246 = vmatprep.subr.msk.bf16.mxu1 %vm127_vm0, %v122_v13 }
  0x4c   :  { %7234 = vmatmul.mubr.msk.bf16.vlgmr.msra.gmra.mxu0 %vm123_vm1, %v8150_v18  ;;  %7236 = vmatmul.mubr.msk.bf16.vlgmr.msra.gmra.mxu1 %vm123_vm1, %v8150_v18 }
  0x4d   :  { %779 = vmatpush1.bf16.msra.mxu0 %v8923_v11  ;;  %796 = vmatprep.mubr.bf16.mxu0 %v11002_v3 }
  0x4e   :  { %7255 = vmatprep.subr.msk.bf16.mxu0 %vm127_vm0, %v8920_v10  ;;  %822 = vmatpush1.bf16.msra.mxu1 %v8928_v14 }
  0x4f   :  { %839 = vmatprep.mubr.bf16.mxu1 %v11002_v3  ;;  %7257 = vmatprep.subr.msk.bf16.mxu1 %vm127_vm0, %v122_v13 }
  0x54   :  { %7245 = vmatmul.mubr.msk.bf16.vlgmr.msra.gmra.mxu0 %vm123_vm1, %v8151_v19  ;;  %7247 = vmatmul.mubr.msk.bf16.vlgmr.msra.gmra.mxu1 %vm123_vm1, %v8151_v19 }
  0x55   :  { %935 = vmatpush1.bf16.msra.mxu0 %v8923_v11  ;;  %952 = vmatprep.mubr.bf16.mxu0 %v11002_v3 }
  0x56   :  { %7266 = vmatprep.subr.msk.bf16.mxu0 %vm127_vm0, %v8920_v10  ;;  %978 = vmatpush1.bf16.msra.mxu1 %v8928_v14 }
  0x57   :  { %995 = vmatprep.mubr.bf16.mxu1 %v11002_v3  ;;  %7268 = vmatprep.subr.msk.bf16.mxu1 %vm127_vm0, %v122_v13 }
  0x5c   :  { %7256 = vmatmul.mubr.msk.bf16.vlgmr.msra.gmra.mxu0 %vm123_vm1, %v8152_v20  ;;  %7258 = vmatmul.mubr.msk.bf16.vlgmr.msra.gmra.mxu1 %vm123_vm1, %v8152_v20 }
  0x5d   :  { %1091 = vmatpush1.bf16.msra.mxu0 %v8923_v11  ;;  %1108 = vmatprep.mubr.bf16.mxu0 %v11002_v3 }
  0x5e   :  { %7277 = vmatprep.subr.msk.bf16.mxu0 %vm127_vm0, %v8920_v10  ;;  %1134 = vmatpush1.bf16.msra.mxu1 %v8928_v14 }
  0x5f   :  { %1151 = vmatprep.mubr.bf16.mxu1 %v11002_v3  ;;  %7279 = vmatprep.subr.msk.bf16.mxu1 %vm127_vm0, %v122_v13  ;;  %v9196_v13 = vrot.slane %v75_v59, %v10999_v5 }
  0x64   :  { %7267 = vmatmul.mubr.msk.bf16.vlgmr.msra.gmra.mxu0 %vm123_vm1, %v8153_v21  ;;  %7269 = vmatmul.mubr.msk.bf16.vlgmr.msra.gmra.mxu1 %vm123_vm1, %v8153_v21 }
  0x65   :  { %1247 = vmatpush1.bf16.msra.mxu0 %v8923_v11  ;;  %1264 = vmatprep.mubr.bf16.mxu0 %v11002_v3 }
  0x66   :  { %1553 = vmatprep.subr.bf16.mxu0 %v9011_v22  ;;  %1290 = vmatpush1.bf16.msra.mxu1 %v8928_v14 }
  0x67   :  { %1307 = vmatprep.mubr.bf16.mxu1 %v11002_v3  ;;  %1596 = vmatprep.subr.bf16.mxu1 %v9013_v23 }
  0x6c   :  { %7278 = vmatmul.mubr.msk.bf16.vlgmr.msra.gmra.mxu0 %vm123_vm1, %v8156_v24  ;;  %7280 = vmatmul.mubr.msk.bf16.vlgmr.msra.gmra.mxu1 %vm123_vm1, %v8156_v24 }
  0x6d   :  { %1554 = vmatpush1.bf16.msra.mxu0 %v9024_v25  ;;  %1585 = vmatprep.mubr.bf16.mxu0 %v11002_v3 }
  0x6e   :  { %1555 = vmatprep.subr.bf16.mxu0 %v9028_v26  ;;  %1597 = vmatpush1.bf16.msra.mxu1 %v9030_v27 }
  0x6f   :  { %1628 = vmatprep.mubr.bf16.mxu1 %v11002_v3  ;;  %1598 = vmatprep.subr.bf16.mxu1 %v9032_v28 }
  0x71   :  { %1556 = vmatpush1.bf16.msra.mxu0 %v9034_v29 }
  0x72   :  { %1557 = vmatprep.subr.bf16.mxu0 %v9041_v30  ;;  %1599 = vmatpush1.bf16.msra.mxu1 %v9044_v31 }
  0x73   :  { %1600 = vmatprep.subr.bf16.mxu1 %v9048_v32 }
  0x75   :  { %1558 = vmatpush1.bf16.msra.mxu0 %v9051_v33 }
  0x76   :  { %1559 = vmatprep.subr.bf16.mxu0 %v9054_v34  ;;  %1601 = vmatpush1.bf16.msra.mxu1 %v9057_v35 }
  0x77   :  { %1602 = vmatprep.subr.bf16.mxu1 %v9060_v36 }
  0x79   :  { %1560 = vmatpush1.bf16.msra.mxu0 %v9063_v37 }
  0x7a   :  { %1561 = vmatprep.subr.bf16.mxu0 %v9066_v38  ;;  %1603 = vmatpush1.bf16.msra.mxu1 %v9069_v39 }
  0x7b   :  { %1604 = vmatprep.subr.bf16.mxu1 %v9072_v40 }
  0x7d   :  { %1562 = vmatpush1.bf16.msra.mxu0 %v9075_v41 }
  0x7e   :  { %1563 = vmatprep.subr.bf16.mxu0 %v9078_v42  ;;  %1605 = vmatpush1.bf16.msra.mxu1 %v9081_v43 }
  0x7f   :  { %1606 = vmatprep.subr.bf16.mxu1 %v9084_v44 }
  0x81   :  { %1564 = vmatpush1.bf16.msra.mxu0 %v9087_v45 }
  0x82   :  { %1565 = vmatprep.subr.bf16.mxu0 %v9090_v46  ;;  %1607 = vmatpush1.bf16.msra.mxu1 %v9093_v47 }
  0x83   :  { %1608 = vmatprep.subr.bf16.mxu1 %v9096_v48 }
  0x85   :  { %1566 = vmatpush1.bf16.msra.mxu0 %v9099_v49 }
  0x86   :  { %1567 = vmatprep.subr.bf16.mxu0 %v9102_v50  ;;  %1609 = vmatpush1.bf16.msra.mxu1 %v9105_v51 }
  0x87   :  { %1610 = vmatprep.subr.bf16.mxu1 %v9108_v52 }
  0x89   :  { %1568 = vmatpush1.bf16.msra.mxu0 %v9111_v53 }
  0x8a   :  { %1702 = vmatprep.subr.bf16.mxu0 %v9011_v22  ;;  %1611 = vmatpush1.bf16.msra.mxu1 %v9115_v54 }
  0x8b   :  { %1745 = vmatprep.subr.bf16.mxu1 %v9013_v23 }
  0x8c   :  { %1586 = vmatmul.mubr.bf16.vlgmr.msra.gmra.mxu0 %v11002_v3 }
  0x8d   :  { %1703 = vmatpush1.bf16.msra.mxu0 %v9024_v25  ;;  %1734 = vmatprep.mubr.bf16.mxu0 %v11002_v3 }
  0x8e   :  { %1629 = vmatmul.mubr.bf16.vlgmr.msra.gmra.mxu1 %v11002_v3  ;;  %1704 = vmatprep.subr.bf16.mxu0 %v9028_v26 }
  0x8f   :  { %1746 = vmatpush1.bf16.msra.mxu1 %v9030_v27  ;;  %1777 = vmatprep.mubr.bf16.mxu1 %v11002_v3 }
  0x90   :  { %1747 = vmatprep.subr.bf16.mxu1 %v9032_v28 }
  0x91   :  { %1705 = vmatpush1.bf16.msra.mxu0 %v9034_v29 }
  0x92   :  { %1706 = vmatprep.subr.bf16.mxu0 %v9041_v30 }
  0x93   :  { %1748 = vmatpush1.bf16.msra.mxu1 %v9044_v31 }
  0x94   :  { %1749 = vmatprep.subr.bf16.mxu1 %v9048_v32 }
  0x95   :  { %1707 = vmatpush1.bf16.msra.mxu0 %v9051_v33 }
  0x96   :  { %1708 = vmatprep.subr.bf16.mxu0 %v9054_v34 }
  0x97   :  { %1750 = vmatpush1.bf16.msra.mxu1 %v9057_v35 }
  0x98   :  { %1751 = vmatprep.subr.bf16.mxu1 %v9060_v36 }
  0x99   :  { %1709 = vmatpush1.bf16.msra.mxu0 %v9063_v37 }
  0x9a   :  { %1710 = vmatprep.subr.bf16.mxu0 %v9066_v38 }
  0x9b   :  { %1752 = vmatpush1.bf16.msra.mxu1 %v9069_v39 }
  0x9c   :  { %1753 = vmatprep.subr.bf16.mxu1 %v9072_v40 }
  0x9d   :  { %1711 = vmatpush1.bf16.msra.mxu0 %v9075_v41 }
  0x9e   :  { %1712 = vmatprep.subr.bf16.mxu0 %v9078_v42 }
  0x9f   :  { %1754 = vmatpush1.bf16.msra.mxu1 %v9081_v43 }
  0xa0   :  { %1755 = vmatprep.subr.bf16.mxu1 %v9084_v44 }
  0xa1   :  { %1713 = vmatpush1.bf16.msra.mxu0 %v9087_v45 }
  0xa2   :  { %1714 = vmatprep.subr.bf16.mxu0 %v9090_v46 }
  0xa3   :  { %1756 = vmatpush1.bf16.msra.mxu1 %v9093_v47 }
  0xa4   :  { %1757 = vmatprep.subr.bf16.mxu1 %v9096_v48 }
  0xa5   :  { %1715 = vmatpush1.bf16.msra.mxu0 %v9099_v49 }
  0xa6   :  { %1716 = vmatprep.subr.bf16.mxu0 %v9102_v50 }
  0xa7   :  { %1758 = vmatpush1.bf16.msra.mxu1 %v9105_v51 }
  0xa8   :  { %1759 = vmatprep.subr.bf16.mxu1 %v9108_v52 }
  0xa9   :  { %1717 = vmatpush1.bf16.msra.mxu0 %v9111_v53 }
  0xaa   :  { %1852 = vmatprep.subr.bf16.mxu0 %v9011_v22 }
  0xab   :  { %1760 = vmatpush1.bf16.msra.mxu1 %v9115_v54 }
  0xac   :  { %1895 = vmatprep.subr.bf16.mxu1 %v9013_v23 }
  0xf4   :  { %v9158_v55 = vpop.f32.mrf.mxu0  ;;  %v9162_v57 = vpop.f32.mrf.mxu1 }
  0xf6   :  { %v9160_v56 = vpop.f32.mrf.mxu0  ;;  %v9170_v61 = vpop.f32.mrf.mxu1 }
  0xf8   :  { %v9168_v60 = vpop.f32.mrf.mxu0  ;;  %v9176_v1 = vpop.f32.mrf.mxu1 }
  0xfa   :  { %v9174_v0 = vpop.f32.mrf.mxu0  ;;  %v9183_v6 = vpop.f32.mrf.mxu1 }
  0xfc   :  { %v330_v7 = vpop.f32.mrf.mxu0  ;;  %v373_v12 = vpop.f32.mrf.mxu1 }
  0xfd   :  { %v331_v10 = vadd.f32 %v330_v7, %v9180_v2  ;;  %v374_v15 = vadd.f32 %v373_v12, %v9191_v9 }
  0xfe   :  { %v332_v11 = vpop.f32.mrf.mxu0  ;;  %v375_v17 = vpop.f32.mrf.mxu1 }
  0xff   :  { %v333_v14 = vadd.f32 %v332_v11, %v9187_v8  ;;  %v376_v20 = vadd.f32 %v375_v17, %v9196_v13 }
 0x100   :  { %v334_v16 = vpop.f32.mrf.mxu0  ;;  %v377_v24 = vpop.f32.mrf.mxu1 }
 0x101   :  { %v9200_v18 = vpack.c.bf16 %v333_v14, %v331_v10  ;;  %v335_v19 = vadd.f32 %v334_v16, %v9180_v2  ;;  %v9204_v7 = vpack.c.bf16 %v376_v20, %v374_v15  ;;  %v378_v59 = vadd.f32 %v377_v24, %v9191_v9 }
 0x102   :  { %v336_v21 = vpop.f32.mrf.mxu0  ;;  %v379_v5 = vpop.f32.mrf.mxu1 }
 0x103   :  { %v337_v62 = vadd.f32 %v336_v21, %v9187_v8  ;;  %v380_v12 = vadd.f32 %v379_v5, %v9196_v13 }
 0x104   :  { %v486_v11 = vpop.f32.mrf.mxu0  ;;  %v529_v16 = vpop.f32.mrf.mxu1 }
 0x105   :  { %v9208_v63 = vpack.c.bf16 %v337_v62, %v335_v19  ;;  %v487_v10 = vadd.f32 %v486_v11, %v9180_v2  ;;  %v9212_v58 = vpack.c.bf16 %v380_v12, %v378_v59  ;;  %v530_v15 = vadd.f32 %v529_v16, %v9191_v9 }
 0x106   :  { %v488_v14 = vpop.f32.mrf.mxu0  ;;  %v531_v21 = vpop.f32.mrf.mxu1 }
 0x107   :  { %11050 = vst [vmem:[#allocation15_spill] sm:$0xff] %v9212_v58  ;;  %v489_v17 = vadd.f32 %v488_v14, %v9187_v8  ;;  %v532_v62 = vadd.f32 %v531_v21, %v9196_v13 }
 0x108   :  { %v490_v20 = vpop.f32.mrf.mxu0  ;;  %v533_v5 = vpop.f32.mrf.mxu1 }
 0x109   :  { %v9216_v3 = vpack.c.bf16 %v489_v17, %v487_v10  ;;  %v491_v24 = vadd.f32 %v490_v20, %v9180_v2  ;;  %v9220_v4 = vpack.c.bf16 %v532_v62, %v530_v15  ;;  %v534_v59 = vadd.f32 %v533_v5, %v9191_v9 }
 0x10a   :  { %v492_v19 = vpop.f32.mrf.mxu0  ;;  %v535_v12 = vpop.f32.mrf.mxu1 }
 0x10b   :  { %11051 = vst [vmem:[#allocation16_spill] sm:$0xff] %v9216_v3  ;;  %11052 = vst [vmem:[#allocation17_spill] sm:$0xff] %v9220_v4  ;;  %v493_v11 = vadd.f32 %v492_v19, %v9187_v8  ;;  %v536_v16 = vadd.f32 %v535_v12, %v9196_v13 }
 0x10c   :  { %v642_v14 = vpop.f32.mrf.mxu0  ;;  %v685_v20 = vpop.f32.mrf.mxu1 }
 0x10d   :  { %v9224_v58 = vpack.c.bf16 %v493_v11, %v491_v24  ;;  %v643_v10 = vadd.f32 %v642_v14, %v9180_v2  ;;  %v9228_v3 = vpack.c.bf16 %v536_v16, %v534_v59  ;;  %v686_v15 = vadd.f32 %v685_v20, %v9191_v9 }
 0x10e   :  { %v644_v17 = vpop.f32.mrf.mxu0  ;;  %v687_v19 = vpop.f32.mrf.mxu1 }
 0x10f   :  { %11053 = vst [vmem:[#allocation18_spill] sm:$0xff] %v9224_v58  ;;  %11054 = vst [vmem:[#allocation19_spill] sm:$0xff] %v9228_v3  ;;  %v645_v21 = vadd.f32 %v644_v17, %v9187_v8  ;;  %v688_v24 = vadd.f32 %v687_v19, %v9196_v13 }
 0x110   :  { %v646_v62 = vpop.f32.mrf.mxu0  ;;  %v689_v12 = vpop.f32.mrf.mxu1 }
 0x111   :  { %v9232_v4 = vpack.c.bf16 %v645_v21, %v643_v10  ;;  %v647_v5 = vadd.f32 %v646_v62, %v9180_v2  ;;  %v9236_v58 = vpack.c.bf16 %v688_v24, %v686_v15  ;;  %v690_v59 = vadd.f32 %v689_v12, %v9191_v9 }
 0x112   :  { %v648_v11 = vpop.f32.mrf.mxu0  ;;  %v691_v16 = vpop.f32.mrf.mxu1 }
 0x113   :  { %11055 = vst [vmem:[#allocation20_spill] sm:$0xff] %v9232_v4  ;;  %11056 = vst [vmem:[#allocation21_spill] sm:$0xff] %v9236_v58  ;;  %v649_v14 = vadd.f32 %v648_v11, %v9187_v8  ;;  %v692_v20 = vadd.f32 %v691_v16, %v9196_v13 }
 0x114   :  { %v798_v17 = vpop.f32.mrf.mxu0  ;;  %v841_v62 = vpop.f32.mrf.mxu1 }
 0x115   :  { %v9240_v3 = vpack.c.bf16 %v649_v14, %v647_v5  ;;  %v799_v10 = vadd.f32 %v798_v17, %v9180_v2  ;;  %v9244_v4 = vpack.c.bf16 %v692_v20, %v690_v59  ;;  %v842_v15 = vadd.f32 %v841_v62, %v9191_v9 }
 0x116   :  { %v800_v21 = vpop.f32.mrf.mxu0  ;;  %v843_v11 = vpop.f32.mrf.mxu1 }
 0x117   :  { %11057 = vst [vmem:[#allocation22_spill] sm:$0xff] %v9240_v3  ;;  %11058 = vst [vmem:[#allocation23_spill] sm:$0xff] %v9244_v4  ;;  %v801_v19 = vadd.f32 %v800_v21, %v9187_v8  ;;  %v844_v5 = vadd.f32 %v843_v11, %v9196_v13 }
 0x118   :  { %v802_v24 = vpop.f32.mrf.mxu0  ;;  %v845_v16 = vpop.f32.mrf.mxu1 }
 0x119   :  { %v9248_v58 = vpack.c.bf16 %v801_v19, %v799_v10  ;;  %v803_v12 = vadd.f32 %v802_v24, %v9180_v2  ;;  %v9252_v3 = vpack.c.bf16 %v844_v5, %v842_v15  ;;  %v846_v59 = vadd.f32 %v845_v16, %v9191_v9 }
 0x11a   :  { %v804_v14 = vpop.f32.mrf.mxu0  ;;  %v847_v20 = vpop.f32.mrf.mxu1 }
 0x11b   :  { %11059 = vst [vmem:[#allocation24_spill] sm:$0xff] %v9248_v58  ;;  %11060 = vst [vmem:[#allocation25_spill] sm:$0xff] %v9252_v3  ;;  %v805_v17 = vadd.f32 %v804_v14, %v9187_v8  ;;  %v848_v62 = vadd.f32 %v847_v20, %v9196_v13 }
 0x11c   :  { %v954_v21 = vpop.f32.mrf.mxu0  ;;  %v997_v24 = vpop.f32.mrf.mxu1 }
 0x11d   :  { %v9256_v4 = vpack.c.bf16 %v805_v17, %v803_v12  ;;  %v955_v10 = vadd.f32 %v954_v21, %v9180_v2  ;;  %v9260_v58 = vpack.c.bf16 %v848_v62, %v846_v59  ;;  %v998_v15 = vadd.f32 %v997_v24, %v9191_v9 }
 0x11e   :  { %v956_v19 = vpop.f32.mrf.mxu0  ;;  %v999_v14 = vpop.f32.mrf.mxu1 }
 0x11f   :  { %11061 = vst [vmem:[#allocation26_spill] sm:$0xff] %v9256_v4  ;;  %11062 = vst [vmem:[#allocation27_spill] sm:$0xff] %v9260_v58  ;;  %v957_v11 = vadd.f32 %v956_v19, %v9187_v8  ;;  %v1000_v12 = vadd.f32 %v999_v14, %v9196_v13 }
 0x120   :  { %v958_v5 = vpop.f32.mrf.mxu0  ;;  %v1001_v20 = vpop.f32.mrf.mxu1 }
 0x121   :  { %v9264_v3 = vpack.c.bf16 %v957_v11, %v955_v10  ;;  %v959_v16 = vadd.f32 %v958_v5, %v9180_v2  ;;  %v9268_v4 = vpack.c.bf16 %v1000_v12, %v998_v15  ;;  %v1002_v59 = vadd.f32 %v1001_v20, %v9191_v9 }
 0x122   :  { %v960_v17 = vpop.f32.mrf.mxu0  ;;  %v1003_v62 = vpop.f32.mrf.mxu1 }
 0x123   :  { %11063 = vst [vmem:[#allocation28_spill] sm:$0xff] %v9264_v3  ;;  %11064 = vst [vmem:[#allocation29_spill] sm:$0xff] %v9268_v4  ;;  %v961_v21 = vadd.f32 %v960_v17, %v9187_v8  ;;  %v1004_v24 = vadd.f32 %v1003_v62, %v9196_v13 }
 0x124   :  { %v1110_v19 = vpop.f32.mrf.mxu0  ;;  %v1153_v5 = vpop.f32.mrf.mxu1 }
 0x125   :  { %v9272_v58 = vpack.c.bf16 %v961_v21, %v959_v16  ;;  %v1111_v10 = vadd.f32 %v1110_v19, %v9180_v2  ;;  %v9276_v3 = vpack.c.bf16 %v1004_v24, %v1002_v59  ;;  %v1154_v15 = vadd.f32 %v1153_v5, %v9191_v9 }
 0x126   :  { %v1112_v11 = vpop.f32.mrf.mxu0  ;;  %v1155_v17 = vpop.f32.mrf.mxu1 }
 0x127   :  { %11065 = vst [vmem:[#allocation30_spill] sm:$0xff] %v9272_v58  ;;  %11066 = vst [vmem:[#allocation31_spill] sm:$0xff] %v9276_v3  ;;  %v1113_v14 = vadd.f32 %v1112_v11, %v9187_v8  ;;  %v1156_v16 = vadd.f32 %v1155_v17, %v9196_v13 }
 0x128   :  { %v1114_v12 = vpop.f32.mrf.mxu0  ;;  %v1157_v62 = vpop.f32.mrf.mxu1 }
 0x129   :  { %v9280_v4 = vpack.c.bf16 %v1113_v14, %v1111_v10  ;;  %v1115_v20 = vadd.f32 %v1114_v12, %v9180_v2  ;;  %v9284_v58 = vpack.c.bf16 %v1156_v16, %v1154_v15  ;;  %v1158_v59 = vadd.f32 %v1157_v62, %v9191_v9 }
 0x12a   :  { %v1116_v21 = vpop.f32.mrf.mxu0  ;;  %v1159_v24 = vpop.f32.mrf.mxu1 }
 0x12b   :  { %11067 = vst [vmem:[#allocation32_spill] sm:$0xff] %v9280_v4  ;;  %11068 = vst [vmem:[#allocation33_spill] sm:$0xff] %v9284_v58  ;;  %v1117_v19 = vadd.f32 %v1116_v21, %v9187_v8  ;;  %v1160_v5 = vadd.f32 %v1159_v24, %v9196_v13 }
 0x12c   :  { %v1266_v11 = vpop.f32.mrf.mxu0  ;;  %v1309_v12 = vpop.f32.mrf.mxu1 }
 0x12d   :  { %v9288_v3 = vpack.c.bf16 %v1117_v19, %v1115_v20  ;;  %v1267_v10 = vadd.f32 %v1266_v11, %v9180_v2  ;;  %v9292_v4 = vpack.c.bf16 %v1160_v5, %v1158_v59  ;;  %v1310_v15 = vadd.f32 %v1309_v12, %v9191_v9 }
 0x12e   :  { %v1268_v14 = vpop.f32.mrf.mxu0  ;;  %v1311_v21 = vpop.f32.mrf.mxu1 }
 0x12f   :  { %11069 = vst [vmem:[#allocation34_spill] sm:$0xff] %v9288_v3  ;;  %11070 = vst [vmem:[#allocation35_spill] sm:$0xff] %v9292_v4  ;;  %v1269_v17 = vadd.f32 %v1268_v14, %v9187_v8  ;;  %v1312_v20 = vadd.f32 %v1311_v21, %v9196_v13 }
 0x130   :  { %v1270_v16 = vpop.f32.mrf.mxu0  ;;  %v1313_v24 = vpop.f32.mrf.mxu1 }
 0x131   :  { %v9296_v58 = vpack.c.bf16 %v1269_v17, %v1267_v10  ;;  %v1271_v62 = vadd.f32 %v1270_v16, %v9180_v2  ;;  %v9300_v3 = vpack.c.bf16 %v1312_v20, %v1310_v15  ;;  %v1314_v59 = vadd.f32 %v1313_v24, %v9191_v9 }
 0x132   :  { %v1272_v19 = vpop.f32.mrf.mxu0  ;;  %v1315_v5 = vpop.f32.mrf.mxu1  ;;  %v177_v10 = vadd.f32 %v9160_v56, %v9187_v8  ;;  %v175_v17 = vadd.f32 %v9158_v55, %v9180_v2  ;;  %v218_v15 = vadd.f32 %v9162_v57, %v9191_v9  ;;  %v220_v16 = vadd.f32 %v9170_v61, %v9196_v13 }
 0x133   :  { %v1273_v11 = vadd.f32 %v1272_v19, %v9187_v8  ;;  %v1316_v12 = vadd.f32 %v1315_v5, %v9196_v13  ;;  %v179_v20 = vadd.f32 %v9168_v60, %v9180_v2  ;;  %v224_v56 = vadd.f32 %v9183_v6, %v9196_v13 }
 0x134   :  { %v7710_v21 = vpack.c.bf16 %v177_v10, %v175_v17  ;;  %v7711_v19 = vpack.c.bf16 %v220_v16, %v218_v15  ;;  %v222_v57 = vadd.f32 %v9176_v1, %v9191_v9 }
 0x135   :  { %v9304_v14 = vpack.c.bf16 %v1273_v11, %v1271_v62  ;;  %v9307_v4 = vpack.c.bf16 %v1316_v12, %v1314_v59  ;;  %v181_v62 = vadd.f32 %v9174_v0, %v9187_v8 }
 0x136   :  { %v1385_v11 = vunpack.c.l.bf16 %v7710_v21  ;;  %v1386_v5 = vunpack.c.h.bf16 %v7710_v21  ;;  %v1388_v10 = vunpack.c.h.bf16 %v7711_v19  ;;  %v7713_v17 = vpack.c.bf16 %v224_v56, %v222_v57 }
 0x137   :  { %v7712_v24 = vpack.c.bf16 %v181_v62, %v179_v20 }
 0x138   :  { %v1392_v1 = vunpack.c.h.bf16 %v7713_v17  ;;  %v1391_v57 = vunpack.c.l.bf16 %v7713_v17 }
 0x139   :  { %v1389_v8 = vunpack.c.l.bf16 %v7712_v24  ;;  %v1390_v6 = vunpack.c.h.bf16 %v7712_v24 }
 0x14c   :  { %v1587_v55 = vpop.f32.mrf.mxu0 }
 0x14d   :  { %v1639_v59 = vadd.f32 %v1587_v55, %v1385_v11  ;;  %v1387_v11 = vunpack.c.l.bf16 %v7711_v19 }
 0x14e   :  { %v1589_v61 = vpop.f32.mrf.mxu0  ;;  %v1630_v12 = vpop.f32.mrf.mxu1 }
 0x14f   :  { %8371 = vtanh.f32 %v1639_v59  ;;  %v1640_v0 = vadd.f32 %v1589_v61, %v1386_v5  ;;  %v1641_v5 = vadd.f32 %v1630_v12, %v1387_v11 }
 0x150   :  { %v1591_v60 = vpop.f32.mrf.mxu0  ;;  %v1632_v2 = vpop.f32.mrf.mxu1 }
 0x151   :  { %8373 = vtanh.f32 %v1640_v0  ;;  %v1643_v15 = vadd.f32 %v1591_v60, %v1389_v8  ;;  %v1642_v16 = vadd.f32 %v1632_v2, %v1388_v10 }
 0x152   :  { %v1593_v13 = vpop.f32.mrf.mxu0  ;;  %v1634_v62 = vpop.f32.mrf.mxu1 }
 0x153   :  { %8375 = vtanh.f32 %v1643_v15  ;;  %v1644_v20 = vadd.f32 %v1593_v13, %v1390_v6  ;;  %v1645_v10 = vadd.f32 %v1634_v62, %v1391_v57 }
 0x154   :  { %8377 = vtanh.f32 %v1642_v16  ;;  %v1636_v9 = vpop.f32.mrf.mxu1 }
 0x155   :  { %8379 = vtanh.f32 %v1644_v20  ;;  %v1646_v21 = vadd.f32 %v1636_v9, %v1392_v1 }
 0x157   :  { %8381 = vtanh.f32 %v1646_v21 }
 0x158   :  { %8383 = vtanh.f32 %v1641_v5 }
 0x159   :  { %8385 = vtanh.f32 %v1645_v10 }
 0x15c   :  { %v8372_v56 = vpop.eup %8371 }
 0x15d   :  { %v1655_v55 = vmul.f32 0.5, %v8372_v56 }
 0x15e   :  { %v8374_v59 = vpop.eup %8373 }
 0x15f   :  { %v1661_v61 = vadd.f32 0.5, %v1655_v55  ;;  %v1656_v0 = vmul.f32 0.5, %v8374_v59 }
 0x160   :  { %v8376_v24 = vpop.eup %8375 }
 0x161   :  { %v8378_v8 = vpop.eup %8377  ;;  %v1662_v60 = vadd.f32 0.5, %v1656_v0  ;;  %v1658_v2 = vmul.f32 0.5, %v8376_v24 }
 0x162   :  { %v8380_v15 = vpop.eup %8379  ;;  %v1669_v16 = vmul.f32 %v8378_v8, %v1661_v61  ;;  %v11071_v8 = vmov 0  }
 0x163   :  { %v1667_v6 = vmul.f32 0.0, %v1662_v60  ;;  %v1664_v13 = vadd.f32 0.5, %v1658_v2  ;;  %v1659_v20 = vmul.f32 0.5, %v8380_v15  ;;  %v1694_v60 = vunpack.c.l.bf16 %v9200_v18 }
 0x164   :  { %v8382_v1 = vpop.eup %8381 }
 0x165   :  { %v9325_v19 = vadd.f32 %v1669_v16, %v1667_v6  ;;  %v1665_v17 = vadd.f32 0.5, %v1659_v20  ;;  %v1670_v12 = vmul.f32 %v8382_v1, %v1664_v13  ;;  %v8384_v21 = vpop.eup %8383  ;;  %v1695_v6 = vunpack.c.h.bf16 %v9200_v18 }
 0x166   :  { %v8386_v56 = vpop.eup %8385  ;;  %v1657_v11 = vmul.f32 0.5, %v8384_v21  ;;  %v1697_v13 = vunpack.c.h.bf16 %v9204_v7 }
 0x167   :  { %v1668_v9 = vmul.f32 0.0, %v1665_v17  ;;  %8387 = vtanh.f32 %v9325_v19  ;;  %v1660_v55 = vmul.f32 0.5, %v8386_v56  ;;  %v1699_v56 = vunpack.c.h.bf16 %v9208_v63 }
 0x168   :  { %v1663_v59 = vadd.f32 0.5, %v1657_v11  ;;  %v11072_v11 = vld [vmem:[#allocation15_spill] sm:$0xff] }
 0x169   :  { %v9328_v62 = vadd.f32 %v1670_v12, %v1668_v9  ;;  %v1666_v5 = vadd.f32 0.5, %v1660_v55  ;;  %v1698_v12 = vunpack.c.l.bf16 %v9208_v63  ;;  %v1701_v55 = vunpack.c.h.bf16 %v11072_v11 }
 0x16b   :  { %8389 = vtanh.f32 %v9328_v62 }
 0x174   :  { %v8388_v57 = vpop.eup %8387 }
 0x175   :  { %v1675_v0 = vmul.f32 %v8388_v57, %v1663_v59 }
 0x178   :  { %v8390_v61 = vpop.eup %8389 }
 0x179   :  { %v1676_v10 = vmul.f32 %v8390_v61, %v1666_v5 }
 0x17b   :  { %v1677_v24 = vpack.c.bf16 %v1676_v10, %v1675_v0  ;;  %v1696_v0 = vunpack.c.l.bf16 %v9204_v7 }
 0x17d   :  { %7826 = vst [vmem:[#allocation2] sm:$0xff] %v1677_v24   ;;  %1735 = vmatmul.mubr.bf16.vlgmr.msra.gmra.mxu0 %v1677_v24  ;;  %1778 = vmatmul.mubr.bf16.vlgmr.msra.gmra.mxu1 %v1677_v24  ;;  %v1700_v24 = vunpack.c.l.bf16 %v11072_v11 }
 0x17e   :  { %1853 = vmatpush1.bf16.msra.mxu0 %v9024_v25  ;;  %1896 = vmatpush1.bf16.msra.mxu1 %v9030_v27 }
 0x17f   :  { %1854 = vmatprep.subr.bf16.mxu0 %v9028_v26  ;;  %1897 = vmatprep.subr.bf16.mxu1 %v9032_v28 }
 0x180   :  { %1884 = vmatprep.mubr.bf16.mxu0 %v11071_v8  ;;  %1927 = vmatprep.mubr.bf16.mxu1 %v11071_v8 }
 0x182   :  { %1855 = vmatpush1.bf16.msra.mxu0 %v9034_v29  ;;  %1898 = vmatpush1.bf16.msra.mxu1 %v9044_v31 }
 0x183   :  { %1856 = vmatprep.subr.bf16.mxu0 %v9041_v30  ;;  %1899 = vmatprep.subr.bf16.mxu1 %v9048_v32 }
 0x186   :  { %1857 = vmatpush1.bf16.msra.mxu0 %v9051_v33  ;;  %1900 = vmatpush1.bf16.msra.mxu1 %v9057_v35 }
 0x187   :  { %1858 = vmatprep.subr.bf16.mxu0 %v9054_v34  ;;  %1901 = vmatprep.subr.bf16.mxu1 %v9060_v36 }
 0x18a   :  { %1859 = vmatpush1.bf16.msra.mxu0 %v9063_v37  ;;  %1902 = vmatpush1.bf16.msra.mxu1 %v9069_v39 }
 0x18b   :  { %1860 = vmatprep.subr.bf16.mxu0 %v9066_v38  ;;  %1903 = vmatprep.subr.bf16.mxu1 %v9072_v40 }
 0x18e   :  { %1861 = vmatpush1.bf16.msra.mxu0 %v9075_v41  ;;  %1904 = vmatpush1.bf16.msra.mxu1 %v9081_v43 }
 0x18f   :  { %1862 = vmatprep.subr.bf16.mxu0 %v9078_v42  ;;  %1905 = vmatprep.subr.bf16.mxu1 %v9084_v44 }
 0x192   :  { %1863 = vmatpush1.bf16.msra.mxu0 %v9087_v45  ;;  %1906 = vmatpush1.bf16.msra.mxu1 %v9093_v47 }
 0x193   :  { %1864 = vmatprep.subr.bf16.mxu0 %v9090_v46  ;;  %1907 = vmatprep.subr.bf16.mxu1 %v9096_v48 }
 0x196   :  { %1865 = vmatpush1.bf16.msra.mxu0 %v9099_v49  ;;  %1908 = vmatpush1.bf16.msra.mxu1 %v9105_v51 }
 0x197   :  { %1866 = vmatprep.subr.bf16.mxu0 %v9102_v50  ;;  %1909 = vmatprep.subr.bf16.mxu1 %v9108_v52 }
 0x19a   :  { %1867 = vmatpush1.bf16.msra.mxu0 %v9111_v53  ;;  %1910 = vmatpush1.bf16.msra.mxu1 %v9115_v54 }
 0x19b   :  { %2002 = vmatprep.subr.bf16.mxu0 %v9011_v22  ;;  %2045 = vmatprep.subr.bf16.mxu1 %v9013_v23 }
 0x23d   :  { %v1736_v2 = vpop.f32.mrf.mxu0  ;;  %v1779_v15 = vpop.f32.mrf.mxu1 }
 0x23e   :  { %v1788_v16 = vadd.f32 %v1736_v2, %v1694_v60  ;;  %v1790_v2 = vadd.f32 %v1779_v15, %v1696_v0 }
 0x23f   :  { %v1738_v20 = vpop.f32.mrf.mxu0  ;;  %v1781_v1 = vpop.f32.mrf.mxu1 }
 0x240   :  { %8391 = vtanh.f32 %v1788_v16  ;;  %v1789_v17 = vadd.f32 %v1738_v20, %v1695_v6  ;;  %v1791_v9 = vadd.f32 %v1781_v1, %v1697_v13 }
 0x241   :  { %v1740_v21 = vpop.f32.mrf.mxu0  ;;  %v1783_v22 = vpop.f32.mrf.mxu1 }
 0x242   :  { %8393 = vtanh.f32 %v1789_v17  ;;  %v1792_v23 = vadd.f32 %v1740_v21, %v1698_v12  ;;  %v1794_v13 = vadd.f32 %v1783_v22, %v1700_v24 }
 0x243   :  { %8395 = vtanh.f32 %v1791_v9  ;;  %v1742_v57 = vpop.f32.mrf.mxu0  ;;  %v1785_v18 = vpop.f32.mrf.mxu1 }
 0x244   :  { %8397 = vtanh.f32 %v1792_v23  ;;  %v1793_v59 = vadd.f32 %v1742_v57, %v1699_v56  ;;  %v1795_v5 = vadd.f32 %v1785_v18, %v1701_v55 }
 0x246   :  { %8399 = vtanh.f32 %v1793_v59 }
 0x247   :  { %8401 = vtanh.f32 %v1795_v5 }
 0x248   :  { %8403 = vtanh.f32 %v1790_v2 }
 0x249   :  { %8405 = vtanh.f32 %v1794_v13 }
 0x24d   :  { %v8392_v61 = vpop.eup %8391 }
 0x24e   :  { %v1804_v10 = vmul.f32 0.5, %v8392_v61 }
 0x24f   :  { %v8394_v60 = vpop.eup %8393 }
 0x250   :  { %v8396_v16 = vpop.eup %8395  ;;  %v1810_v63 = vadd.f32 0.5, %v1804_v10  ;;  %v1805_v6 = vmul.f32 0.5, %v8394_v60 }
 0x251   :  { %v8398_v20 = vpop.eup %8397 }
 0x252   :  { %v1811_v1 = vadd.f32 0.5, %v1805_v6  ;;  %v1818_v17 = vmul.f32 %v8396_v16, %v1810_v63  ;;  %v1807_v9 = vmul.f32 0.5, %v8398_v20 }
 0x253   :  { %v8400_v12 = vpop.eup %8399 }
 0x254   :  { %v1816_v21 = vmul.f32 %v1811_v1, %v9325_v19  ;;  %v1813_v23 = vadd.f32 0.5, %v1807_v9  ;;  %v1808_v7 = vmul.f32 0.5, %v8400_v12  ;;  %v8402_v56 = vpop.eup %8401 }
 0x255   :  { %v8404_v18 = vpop.eup %8403 }
 0x256   :  { %v9374_v55 = vadd.f32 %v1818_v17, %v1816_v21  ;;  %v1814_v11 = vadd.f32 0.5, %v1808_v7  ;;  %v1819_v15 = vmul.f32 %v8402_v56, %v1813_v23  ;;  %v8406_v59 = vpop.eup %8405  ;;  %v1806_v5 = vmul.f32 0.5, %v8404_v18 }
 0x257   :  { %v1809_v19 = vmul.f32 0.5, %v8406_v59 }
 0x258   :  { %v1817_v57 = vmul.f32 %v1814_v11, %v9328_v62  ;;  %8407 = vtanh.f32 %v9374_v55  ;;  %v1812_v0 = vadd.f32 0.5, %v1806_v5 }
 0x259   :  { %v1815_v10 = vadd.f32 0.5, %v1809_v19 }
 0x25a   :  { %v9378_v22 = vadd.f32 %v1819_v15, %v1817_v57 }
 0x25c   :  { %8409 = vtanh.f32 %v9378_v22 }
 0x265   :  { %v8408_v61 = vpop.eup %8407 }
 0x266   :  { %v1824_v60 = vmul.f32 %v8408_v61, %v1812_v0 }
 0x269   :  { %v8410_v24 = vpop.eup %8409 }
 0x26a   :  { %v1825_v2 = vmul.f32 %v8410_v24, %v1815_v10 }
 0x26c   :  { %v1826_v16 = vpack.c.bf16 %v1825_v2, %v1824_v60 }
 0x26e   :  { %7831 = vst [vmem:[#allocation2 + $0x8] sm:$0xff] %v1826_v16   ;;  %1885 = vmatmul.mubr.bf16.vlgmr.msra.gmra.mxu0 %v1826_v16  ;;  %1928 = vmatmul.mubr.bf16.vlgmr.msra.gmra.mxu1 %v1826_v16 }
 0x26f   :  { %2003 = vmatpush1.bf16.msra.mxu0 %v9024_v25  ;;  %2046 = vmatpush1.bf16.msra.mxu1 %v9030_v27  ;;  %v9413_v25 = vld [vmem:[#allocation4 + $0xe4] ss:$16 sps:$4 sm:$0xff]  }
 0x270   :  { %2004 = vmatprep.subr.bf16.mxu0 %v9028_v26  ;;  %2047 = vmatprep.subr.bf16.mxu1 %v9032_v28  ;;  %v9416_v26 = vld [vmem:[#allocation4 + $0xec] ss:$16 sps:$4 sm:$0xff]   ;;  %v11073_v27 = vld [vmem:[#allocation16_spill] sm:$0xff] }
 0x271   :  { %2034 = vmatprep.mubr.bf16.mxu0 %v11071_v8  ;;  %2077 = vmatprep.mubr.bf16.mxu1 %v11071_v8  ;;  %v1844_v28 = vunpack.c.l.bf16 %v11073_v27 }
 0x273   :  { %2005 = vmatpush1.bf16.msra.mxu0 %v9034_v29  ;;  %2048 = vmatpush1.bf16.msra.mxu1 %v9044_v31 }
 0x274   :  { %2006 = vmatprep.subr.bf16.mxu0 %v9041_v30  ;;  %2049 = vmatprep.subr.bf16.mxu1 %v9048_v32  ;;  %v1845_v32 = vunpack.c.h.bf16 %v11073_v27 }
 0x277   :  { %2007 = vmatpush1.bf16.msra.mxu0 %v9051_v33  ;;  %2050 = vmatpush1.bf16.msra.mxu1 %v9057_v35  ;;  %v11074_v33 = vld [vmem:[#allocation17_spill] sm:$0xff] }
 0x278   :  { %2008 = vmatprep.subr.bf16.mxu0 %v9054_v34  ;;  %2051 = vmatprep.subr.bf16.mxu1 %v9060_v36  ;;  %v1847_v34 = vunpack.c.h.bf16 %v11074_v33 }
 0x27b   :  { %2009 = vmatpush1.bf16.msra.mxu0 %v9063_v37  ;;  %2052 = vmatpush1.bf16.msra.mxu1 %v9069_v39  ;;  %v11075_v39 = vld [vmem:[#allocation18_spill] sm:$0xff] }
 0x27c   :  { %2010 = vmatprep.subr.bf16.mxu0 %v9066_v38  ;;  %2053 = vmatprep.subr.bf16.mxu1 %v9072_v40  ;;  %v1848_v40 = vunpack.c.l.bf16 %v11075_v39 }
 0x27f   :  { %2011 = vmatpush1.bf16.msra.mxu0 %v9075_v41  ;;  %2054 = vmatpush1.bf16.msra.mxu1 %v9081_v43 }
 0x280   :  { %2012 = vmatprep.subr.bf16.mxu0 %v9078_v42  ;;  %2055 = vmatprep.subr.bf16.mxu1 %v9084_v44  ;;  %v1849_v44 = vunpack.c.h.bf16 %v11075_v39  ;;  %v9467_v39 = vld [vmem:[#allocation4 + $0x84] ss:$16 sps:$4 sm:$0xff]  }
 0x283   :  { %2013 = vmatpush1.bf16.msra.mxu0 %v9087_v45  ;;  %2056 = vmatpush1.bf16.msra.mxu1 %v9093_v47  ;;  %v11076_v45 = vld [vmem:[#allocation19_spill] sm:$0xff] }
 0x284   :  { %2014 = vmatprep.subr.bf16.mxu0 %v9090_v46  ;;  %2057 = vmatprep.subr.bf16.mxu1 %v9096_v48  ;;  %v1851_v46 = vunpack.c.h.bf16 %v11076_v45 }
 0x287   :  { %2015 = vmatpush1.bf16.msra.mxu0 %v9099_v49  ;;  %2058 = vmatpush1.bf16.msra.mxu1 %v9105_v51 }
 0x288   :  { %2016 = vmatprep.subr.bf16.mxu0 %v9102_v50  ;;  %2059 = vmatprep.subr.bf16.mxu1 %v9108_v52  ;;  %v1846_v52 = vunpack.c.l.bf16 %v11074_v33  ;;  %v9449_v33 = vld [vmem:[#allocation4 + $0xc0] ss:$16 sps:$4 sm:$0xff]  }
 0x28b   :  { %2017 = vmatpush1.bf16.msra.mxu0 %v9111_v53  ;;  %2060 = vmatpush1.bf16.msra.mxu1 %v9115_v54  ;;  %v1850_v54 = vunpack.c.l.bf16 %v11076_v45  ;;  %v9485_v45 = vld [vmem:[#allocation4 + $0x60] ss:$16 sps:$4 sm:$0xff]  }
 0x28c   :  { %2152 = vmatprep.subr.bf16.mxu0 %v9413_v25  ;;  %2195 = vmatprep.subr.bf16.mxu1 %v9416_v26 }
 0x32e   :  { %v1886_v29 = vpop.f32.mrf.mxu0  ;;  %v1929_v30 = vpop.f32.mrf.mxu1 }
 0x32f   :  { %v1938_v31 = vadd.f32 %v1886_v29, %v1844_v28  ;;  %v1940_v63 = vadd.f32 %v1929_v30, %v1846_v52  ;;  %v9438_v30 = vld [vmem:[#allocation4 + $0xe8] ss:$16 sps:$4 sm:$0xff]   ;;  %v9506_v52 = vld [vmem:[#allocation4 + $0x2c] ss:$16 sps:$4 sm:$0xff]  }
 0x330   :  { %v1888_v35 = vpop.f32.mrf.mxu0  ;;  %v1931_v36 = vpop.f32.mrf.mxu1 }
 0x331   :  { %8411 = vtanh.f32 %v1938_v31  ;;  %v1939_v37 = vadd.f32 %v1888_v35, %v1845_v32  ;;  %v1941_v38 = vadd.f32 %v1931_v36, %v1847_v34  ;;  %v9441_v31 = vld [vmem:[#allocation4 + $0xc4] ss:$16 sps:$4 sm:$0xff]   ;;  %v9444_v32 = vld [vmem:[#allocation4 + $0xcc] ss:$16 sps:$4 sm:$0xff]   ;;  %v9452_v34 = vld [vmem:[#allocation4 + $0xc8] ss:$16 sps:$4 sm:$0xff]  }
 0x332   :  { %v1890_v41 = vpop.f32.mrf.mxu0  ;;  %v1933_v42 = vpop.f32.mrf.mxu1  ;;  %v9455_v35 = vld [vmem:[#allocation4 + $0xa4] ss:$16 sps:$4 sm:$0xff]   ;;  %v9458_v36 = vld [vmem:[#allocation4 + $0xac] ss:$16 sps:$4 sm:$0xff]  }
 0x333   :  { %8413 = vtanh.f32 %v1939_v37  ;;  %v1942_v43 = vadd.f32 %v1890_v41, %v1848_v40  ;;  %v1944_v1 = vadd.f32 %v1933_v42, %v1850_v54  ;;  %v9461_v37 = vld [vmem:[#allocation4 + $0xa0] ss:$16 sps:$4 sm:$0xff]   ;;  %v9470_v40 = vld [vmem:[#allocation4 + $0x8c] ss:$16 sps:$4 sm:$0xff]   ;;  %v9476_v42 = vld [vmem:[#allocation4 + $0x88] ss:$16 sps:$4 sm:$0xff]  }
 0x334   :  { %8415 = vtanh.f32 %v1941_v38  ;;  %v1892_v47 = vpop.f32.mrf.mxu0  ;;  %v1935_v48 = vpop.f32.mrf.mxu1  ;;  %v9464_v38 = vld [vmem:[#allocation4 + $0xa8] ss:$16 sps:$4 sm:$0xff]   ;;  %v9473_v41 = vld [vmem:[#allocation4 + $0x80] ss:$16 sps:$4 sm:$0xff]  }
 0x335   :  { %8417 = vtanh.f32 %v1942_v43  ;;  %v1943_v49 = vadd.f32 %v1892_v47, %v1849_v44  ;;  %v1945_v50 = vadd.f32 %v1935_v48, %v1851_v46  ;;  %v9479_v43 = vld [vmem:[#allocation4 + $0x64] ss:$16 sps:$4 sm:$0xff]   ;;  %v9482_v44 = vld [vmem:[#allocation4 + $0x6c] ss:$16 sps:$4 sm:$0xff]   ;;  %v9488_v46 = vld [vmem:[#allocation4 + $0x68] ss:$16 sps:$4 sm:$0xff]  }
 0x336   :  { %v9491_v47 = vld [vmem:[#allocation4 + $0x44] ss:$16 sps:$4 sm:$0xff]   ;;  %v9494_v48 = vld [vmem:[#allocation4 + $0x4c] ss:$16 sps:$4 sm:$0xff]   ;;  %v9512_v54 = vld [vmem:[#allocation4 + $0x28] ss:$16 sps:$4 sm:$0xff]  }
 0x337   :  { %8419 = vtanh.f32 %v1943_v49  ;;  %v9497_v49 = vld [vmem:[#allocation4 + $0x40] ss:$16 sps:$4 sm:$0xff]  }
 0x338   :  { %8421 = vtanh.f32 %v1945_v50  ;;  %v9500_v50 = vld [vmem:[#allocation4 + $0x48] ss:$16 sps:$4 sm:$0xff]  }
 0x339   :  { %8423 = vtanh.f32 %v1940_v63  ;;  %v9518_v63 = vld [vmem:[#allocation4 + $0xc] ss:$16 sps:$4 sm:$0xff]  }
 0x33a   :  { %8425 = vtanh.f32 %v1944_v1 }
 0x33e   :  { %v8412_v51 = vpop.eup %8411 }
 0x33f   :  { %v1954_v53 = vmul.f32 0.5, %v8412_v51  ;;  %v9503_v51 = vld [vmem:[#allocation4 + $0x24] ss:$16 sps:$4 sm:$0xff]  }
 0x340   :  { %v8414_v62 = vpop.eup %8413 }
 0x341   :  { %v8416_v6 = vpop.eup %8415  ;;  %v1960_v13 = vadd.f32 0.5, %v1954_v53  ;;  %v1955_v20 = vmul.f32 0.5, %v8414_v62  ;;  %v9509_v53 = vld [vmem:[#allocation4 + $0x20] ss:$16 sps:$4 sm:$0xff]   ;;  %v9515_v62 = vld [vmem:[#allocation4 + $0x4] ss:$16 sps:$4 sm:$0xff]  }
 0x342   :  { %v8418_v17 = vpop.eup %8417 }
 0x343   :  { %v1961_v9 = vadd.f32 0.5, %v1955_v20  ;;  %v1968_v12 = vmul.f32 %v8416_v6, %v1960_v13  ;;  %v1957_v21 = vmul.f32 0.5, %v8418_v17  ;;  %v9521_v6 = vld [vmem:[#allocation4] ss:$16 sps:$4 sm:$0xff]   ;;  %v9524_v13 = vld [vmem:[#allocation4 + $0x8] ss:$16 sps:$4 sm:$0xff]  }
 0x344   :  { %v8420_v23 = vpop.eup %8419  ;;  %v11077_v20 = vld [vmem:[#allocation20_spill] sm:$0xff] }
 0x345   :  { %v1966_v7 = vmul.f32 %v1961_v9, %v9374_v55  ;;  %v1963_v56 = vadd.f32 0.5, %v1957_v21  ;;  %v1958_v11 = vmul.f32 0.5, %v8420_v23  ;;  %v8422_v15 = vpop.eup %8421  ;;  %v1994_v1 = vunpack.c.l.bf16 %v11077_v20  ;;  %v11078_v23 = vld [vmem:[#allocation21_spill] sm:$0xff] }
 0x346   :  { %v8424_v61 = vpop.eup %8423  ;;  %v1995_v21 = vunpack.c.h.bf16 %v11077_v20  ;;  %v1996_v20 = vunpack.c.l.bf16 %v11078_v23 }
 0x347   :  { %v9428_v57 = vadd.f32 %v1968_v12, %v1966_v7  ;;  %v1964_v18 = vadd.f32 0.5, %v1958_v11  ;;  %v1969_v59 = vmul.f32 %v8422_v15, %v1963_v56  ;;  %v8426_v0 = vpop.eup %8425  ;;  %v1956_v10 = vmul.f32 0.5, %v8424_v61 }
 0x348   :  { %v1959_v55 = vmul.f32 0.5, %v8426_v0  ;;  %v1997_v7 = vunpack.c.h.bf16 %v11078_v23 }
 0x349   :  { %v1967_v5 = vmul.f32 %v1964_v18, %v9378_v22  ;;  %8427 = vtanh.f32 %v9428_v57  ;;  %v1962_v60 = vadd.f32 0.5, %v1956_v10  ;;  %v9435_v22 = vld [vmem:[#allocation4 + $0xe0] ss:$16 sps:$4 sm:$0xff]  }
 0x34a   :  { %v1965_v2 = vadd.f32 0.5, %v1959_v55 }
 0x34b   :  { %v9432_v19 = vadd.f32 %v1969_v59, %v1967_v5  ;;  %v11079_v59 = vld [vmem:[#allocation22_spill] sm:$0xff] }
 0x34c   :  { %v1998_v5 = vunpack.c.l.bf16 %v11079_v59  ;;  %v1999_v55 = vunpack.c.h.bf16 %v11079_v59 }
 0x34d   :  { %8429 = vtanh.f32 %v9432_v19 }
 0x356   :  { %v8428_v24 = vpop.eup %8427 }
 0x357   :  { %v1974_v27 = vmul.f32 %v8428_v24, %v1962_v60  ;;  %v11080_v24 = vld [vmem:[#allocation23_spill] sm:$0xff] }
 0x358   :  { %v2001_v60 = vunpack.c.h.bf16 %v11080_v24 }
 0x35a   :  { %v8430_v16 = vpop.eup %8429 }
 0x35b   :  { %v1975_v28 = vmul.f32 %v8430_v16, %v1965_v2 }
 0x35d   :  { %v1976_v29 = vpack.c.bf16 %v1975_v28, %v1974_v27 }
 0x35f   :  { %7836 = vst [vmem:[#allocation2 + $0x10] sm:$0xff] %v1976_v29   ;;  %2035 = vmatmul.mubr.bf16.vlgmr.msra.gmra.mxu0 %v1976_v29  ;;  %2078 = vmatmul.mubr.bf16.vlgmr.msra.gmra.mxu1 %v1976_v29 }
 0x360   :  { %2153 = vmatpush1.bf16.msra.mxu0 %v9435_v22  ;;  %2196 = vmatpush1.bf16.msra.mxu1 %v9438_v30 }
 0x361   :  { %2154 = vmatprep.subr.bf16.mxu0 %v9441_v31  ;;  %2197 = vmatprep.subr.bf16.mxu1 %v9444_v32 }
 0x362   :  { %2184 = vmatprep.mubr.bf16.mxu0 %v11071_v8  ;;  %2227 = vmatprep.mubr.bf16.mxu1 %v11071_v8 }
 0x364   :  { %2155 = vmatpush1.bf16.msra.mxu0 %v9449_v33  ;;  %2198 = vmatpush1.bf16.msra.mxu1 %v9452_v34 }
 0x365   :  { %2156 = vmatprep.subr.bf16.mxu0 %v9455_v35  ;;  %2199 = vmatprep.subr.bf16.mxu1 %v9458_v36 }
 0x368   :  { %2157 = vmatpush1.bf16.msra.mxu0 %v9461_v37  ;;  %2200 = vmatpush1.bf16.msra.mxu1 %v9464_v38 }
 0x369   :  { %2158 = vmatprep.subr.bf16.mxu0 %v9467_v39  ;;  %2201 = vmatprep.subr.bf16.mxu1 %v9470_v40 }
 0x36c   :  { %2159 = vmatpush1.bf16.msra.mxu0 %v9473_v41  ;;  %2202 = vmatpush1.bf16.msra.mxu1 %v9476_v42 }
 0x36d   :  { %2160 = vmatprep.subr.bf16.mxu0 %v9479_v43  ;;  %2203 = vmatprep.subr.bf16.mxu1 %v9482_v44 }
 0x370   :  { %2161 = vmatpush1.bf16.msra.mxu0 %v9485_v45  ;;  %2204 = vmatpush1.bf16.msra.mxu1 %v9488_v46 }
 0x371   :  { %2162 = vmatprep.subr.bf16.mxu0 %v9491_v47  ;;  %2205 = vmatprep.subr.bf16.mxu1 %v9494_v48 }
 0x374   :  { %2163 = vmatpush1.bf16.msra.mxu0 %v9497_v49  ;;  %2206 = vmatpush1.bf16.msra.mxu1 %v9500_v50 }
 0x375   :  { %2164 = vmatprep.subr.bf16.mxu0 %v9503_v51  ;;  %2207 = vmatprep.subr.bf16.mxu1 %v9506_v52 }
 0x378   :  { %2165 = vmatpush1.bf16.msra.mxu0 %v9509_v53  ;;  %2208 = vmatpush1.bf16.msra.mxu1 %v9512_v54 }
 0x379   :  { %2166 = vmatprep.subr.bf16.mxu0 %v9515_v62  ;;  %2209 = vmatprep.subr.bf16.mxu1 %v9518_v63 }
 0x37c   :  { %2167 = vmatpush1.bf16.msra.mxu0 %v9521_v6  ;;  %2210 = vmatpush1.bf16.msra.mxu1 %v9524_v13 }
 0x37d   :  { %2302 = vmatprep.subr.bf16.mxu0 %v9413_v25  ;;  %2345 = vmatprep.subr.bf16.mxu1 %v9416_v26 }
 0x41f   :  { %v2036_v17 = vpop.f32.mrf.mxu0  ;;  %v2079_v9 = vpop.f32.mrf.mxu1 }
 0x420   :  { %v2088_v12 = vadd.f32 %v2036_v17, %v1994_v1  ;;  %v2000_v17 = vunpack.c.l.bf16 %v11080_v24 }
 0x421   :  { %v2038_v56 = vpop.f32.mrf.mxu0  ;;  %v2081_v11 = vpop.f32.mrf.mxu1 }
 0x422   :  { %8431 = vtanh.f32 %v2088_v12  ;;  %v2089_v15 = vadd.f32 %v2038_v56, %v1995_v21  ;;  %v2091_v18 = vadd.f32 %v2081_v11, %v1997_v7  ;;  %v2090_v21 = vadd.f32 %v2079_v9, %v1996_v20 }
 0x423   :  { %v2040_v61 = vpop.f32.mrf.mxu0  ;;  %v2083_v0 = vpop.f32.mrf.mxu1 }
 0x424   :  { %8433 = vtanh.f32 %v2089_v15  ;;  %v2092_v10 = vadd.f32 %v2040_v61, %v1998_v5  ;;  %v2094_v15 = vadd.f32 %v2083_v0, %v2000_v17 }
 0x425   :  { %8435 = vtanh.f32 %v2091_v18  ;;  %v2042_v2 = vpop.f32.mrf.mxu0  ;;  %v2085_v16 = vpop.f32.mrf.mxu1 }
 0x426   :  { %8437 = vtanh.f32 %v2092_v10  ;;  %v2093_v27 = vadd.f32 %v2042_v2, %v1999_v55  ;;  %v2095_v28 = vadd.f32 %v2085_v16, %v2001_v60 }
 0x428   :  { %8439 = vtanh.f32 %v2093_v27 }
 0x429   :  { %8441 = vtanh.f32 %v2095_v28 }
 0x42a   :  { %8443 = vtanh.f32 %v2090_v21 }
 0x42b   :  { %8445 = vtanh.f32 %v2094_v15 }
 0x42f   :  { %v8432_v29 = vpop.eup %8431 }
 0x430   :  { %v2104_v1 = vmul.f32 0.5, %v8432_v29 }
 0x431   :  { %v8434_v12 = vpop.eup %8433 }
 0x432   :  { %v8436_v7 = vpop.eup %8435  ;;  %v2110_v56 = vadd.f32 0.5, %v2104_v1  ;;  %v2105_v11 = vmul.f32 0.5, %v8434_v12 }
 0x433   :  { %v8438_v18 = vpop.eup %8437 }
 0x434   :  { %v2111_v59 = vadd.f32 0.5, %v2105_v11  ;;  %v2118_v5 = vmul.f32 %v8436_v7, %v2110_v56  ;;  %v2107_v61 = vmul.f32 0.5, %v8438_v18 }
 0x435   :  { %v8440_v10 = vpop.eup %8439 }
 0x436   :  { %v2116_v55 = vmul.f32 %v2111_v59, %v9428_v57  ;;  %v2113_v60 = vadd.f32 0.5, %v2107_v61  ;;  %v2108_v23 = vmul.f32 0.5, %v8440_v10  ;;  %v8442_v2 = vpop.eup %8441  ;;  %v11082_v10 = vld [vmem:[#allocation25_spill] sm:$0xff] }
 0x437   :  { %v8444_v28 = vpop.eup %8443 }
 0x438   :  { %v9538_v16 = vadd.f32 %v2118_v5, %v2116_v55  ;;  %v2114_v24 = vadd.f32 0.5, %v2108_v23  ;;  %v2119_v9 = vmul.f32 %v8442_v2, %v2113_v60  ;;  %v8446_v29 = vpop.eup %8445  ;;  %v2106_v20 = vmul.f32 0.5, %v8444_v28 }
 0x439   :  { %v2109_v57 = vmul.f32 0.5, %v8446_v29  ;;  %v2147_v55 = vunpack.c.h.bf16 %v11082_v10 }
 0x43a   :  { %v2117_v27 = vmul.f32 %v2114_v24, %v9432_v19  ;;  %8447 = vtanh.f32 %v9538_v16  ;;  %v2112_v17 = vadd.f32 0.5, %v2106_v20  ;;  %v11081_v19 = vld [vmem:[#allocation24_spill] sm:$0xff] }
 0x43b   :  { %v2115_v12 = vadd.f32 0.5, %v2109_v57  ;;  %v2144_v15 = vunpack.c.l.bf16 %v11081_v19  ;;  %v2145_v61 = vunpack.c.h.bf16 %v11081_v19  ;;  %v2146_v19 = vunpack.c.l.bf16 %v11082_v10 }
 0x43c   :  { %v9542_v0 = vadd.f32 %v2119_v9, %v2117_v27  ;;  %v11083_v9 = vld [vmem:[#allocation26_spill] sm:$0xff] }
 0x43d   :  { %v2148_v27 = vunpack.c.l.bf16 %v11083_v9  ;;  %v2149_v57 = vunpack.c.h.bf16 %v11083_v9 }
 0x43e   :  { %8449 = vtanh.f32 %v9542_v0 }
 0x447   :  { %v8448_v1 = vpop.eup %8447 }
 0x448   :  { %v2124_v7 = vmul.f32 %v8448_v1, %v2112_v17  ;;  %v11084_v1 = vld [vmem:[#allocation27_spill] sm:$0xff] }
 0x449   :  { %v2151_v17 = vunpack.c.h.bf16 %v11084_v1 }
 0x44b   :  { %v8450_v21 = vpop.eup %8449 }
 0x44c   :  { %v2125_v56 = vmul.f32 %v8450_v21, %v2115_v12 }
 0x44e   :  { %v2126_v11 = vpack.c.bf16 %v2125_v56, %v2124_v7 }
 0x450   :  { %7841 = vst [vmem:[#allocation2 + $0x18] sm:$0xff] %v2126_v11   ;;  %2185 = vmatmul.mubr.bf16.vlgmr.msra.gmra.mxu0 %v2126_v11  ;;  %2228 = vmatmul.mubr.bf16.vlgmr.msra.gmra.mxu1 %v2126_v11 }
 0x451   :  { %2303 = vmatpush1.bf16.msra.mxu0 %v9435_v22  ;;  %2346 = vmatpush1.bf16.msra.mxu1 %v9438_v30 }
 0x452   :  { %2304 = vmatprep.subr.bf16.mxu0 %v9441_v31  ;;  %2347 = vmatprep.subr.bf16.mxu1 %v9444_v32 }
 0x453   :  { %2334 = vmatprep.mubr.bf16.mxu0 %v11071_v8  ;;  %2377 = vmatprep.mubr.bf16.mxu1 %v11071_v8 }
 0x455   :  { %2305 = vmatpush1.bf16.msra.mxu0 %v9449_v33  ;;  %2348 = vmatpush1.bf16.msra.mxu1 %v9452_v34 }
 0x456   :  { %2306 = vmatprep.subr.bf16.mxu0 %v9455_v35  ;;  %2349 = vmatprep.subr.bf16.mxu1 %v9458_v36 }
 0x459   :  { %2307 = vmatpush1.bf16.msra.mxu0 %v9461_v37  ;;  %2350 = vmatpush1.bf16.msra.mxu1 %v9464_v38 }
 0x45a   :  { %2308 = vmatprep.subr.bf16.mxu0 %v9467_v39  ;;  %2351 = vmatprep.subr.bf16.mxu1 %v9470_v40 }
 0x45d   :  { %2309 = vmatpush1.bf16.msra.mxu0 %v9473_v41  ;;  %2352 = vmatpush1.bf16.msra.mxu1 %v9476_v42 }
 0x45e   :  { %2310 = vmatprep.subr.bf16.mxu0 %v9479_v43  ;;  %2353 = vmatprep.subr.bf16.mxu1 %v9482_v44 }
 0x461   :  { %2311 = vmatpush1.bf16.msra.mxu0 %v9485_v45  ;;  %2354 = vmatpush1.bf16.msra.mxu1 %v9488_v46 }
 0x462   :  { %2312 = vmatprep.subr.bf16.mxu0 %v9491_v47  ;;  %2355 = vmatprep.subr.bf16.mxu1 %v9494_v48 }
 0x465   :  { %2313 = vmatpush1.bf16.msra.mxu0 %v9497_v49  ;;  %2356 = vmatpush1.bf16.msra.mxu1 %v9500_v50 }
 0x466   :  { %2314 = vmatprep.subr.bf16.mxu0 %v9503_v51  ;;  %2357 = vmatprep.subr.bf16.mxu1 %v9506_v52 }
 0x469   :  { %2315 = vmatpush1.bf16.msra.mxu0 %v9509_v53  ;;  %2358 = vmatpush1.bf16.msra.mxu1 %v9512_v54 }
 0x46a   :  { %2316 = vmatprep.subr.bf16.mxu0 %v9515_v62  ;;  %2359 = vmatprep.subr.bf16.mxu1 %v9518_v63 }
 0x46d   :  { %2317 = vmatpush1.bf16.msra.mxu0 %v9521_v6  ;;  %2360 = vmatpush1.bf16.msra.mxu1 %v9524_v13 }
 0x46e   :  { %2452 = vmatprep.subr.bf16.mxu0 %v9413_v25  ;;  %2495 = vmatprep.subr.bf16.mxu1 %v9416_v26 }
 0x510   :  { %v2186_v18 = vpop.f32.mrf.mxu0  ;;  %v2229_v59 = vpop.f32.mrf.mxu1 }
 0x511   :  { %v2238_v5 = vadd.f32 %v2186_v18, %v2144_v15  ;;  %v2150_v18 = vunpack.c.l.bf16 %v11084_v1 }
 0x512   :  { %v2188_v60 = vpop.f32.mrf.mxu0  ;;  %v2231_v23 = vpop.f32.mrf.mxu1 }
 0x513   :  { %8451 = vtanh.f32 %v2238_v5  ;;  %v2239_v2 = vadd.f32 %v2188_v60, %v2145_v61  ;;  %v2241_v24 = vadd.f32 %v2231_v23, %v2147_v55  ;;  %v2240_v61 = vadd.f32 %v2229_v59, %v2146_v19 }
 0x514   :  { %v2190_v28 = vpop.f32.mrf.mxu0  ;;  %v2233_v29 = vpop.f32.mrf.mxu1 }
 0x515   :  { %8453 = vtanh.f32 %v2239_v2  ;;  %v2242_v20 = vadd.f32 %v2190_v28, %v2148_v27  ;;  %v2244_v2 = vadd.f32 %v2233_v29, %v2150_v18 }
 0x516   :  { %8455 = vtanh.f32 %v2241_v24  ;;  %v2192_v12 = vpop.f32.mrf.mxu0  ;;  %v2235_v21 = vpop.f32.mrf.mxu1 }
 0x517   :  { %8457 = vtanh.f32 %v2242_v20  ;;  %v2243_v7 = vadd.f32 %v2192_v12, %v2149_v57  ;;  %v2245_v56 = vadd.f32 %v2235_v21, %v2151_v17 }
 0x519   :  { %8459 = vtanh.f32 %v2243_v7 }
 0x51a   :  { %8461 = vtanh.f32 %v2245_v56 }
 0x51b   :  { %8463 = vtanh.f32 %v2240_v61 }
 0x51c   :  { %8465 = vtanh.f32 %v2244_v2 }
 0x520   :  { %v8452_v11 = vpop.eup %8451 }
 0x521   :  { %v2254_v15 = vmul.f32 0.5, %v8452_v11 }
 0x522   :  { %v8454_v5 = vpop.eup %8453 }
 0x523   :  { %v8456_v55 = vpop.eup %8455  ;;  %v2260_v60 = vadd.f32 0.5, %v2254_v15  ;;  %v2255_v23 = vmul.f32 0.5, %v8454_v5 }
 0x524   :  { %v8458_v24 = vpop.eup %8457 }
 0x525   :  { %v2261_v9 = vadd.f32 0.5, %v2255_v23  ;;  %v2268_v27 = vmul.f32 %v8456_v55, %v2260_v60  ;;  %v2257_v28 = vmul.f32 0.5, %v8458_v24 }
 0x526   :  { %v8460_v20 = vpop.eup %8459 }
 0x527   :  { %v2266_v57 = vmul.f32 %v2261_v9, %v9538_v16  ;;  %v2263_v17 = vadd.f32 0.5, %v2257_v28  ;;  %v2258_v10 = vmul.f32 0.5, %v8460_v20  ;;  %v8462_v12 = vpop.eup %8461  ;;  %v11086_v20 = vld [vmem:[#allocation29_spill] sm:$0xff] }
 0x528   :  { %v8464_v56 = vpop.eup %8463 }
 0x529   :  { %v9588_v21 = vadd.f32 %v2268_v27, %v2266_v57  ;;  %v2264_v1 = vadd.f32 0.5, %v2258_v10  ;;  %v2269_v59 = vmul.f32 %v8462_v12, %v2263_v17  ;;  %v8466_v11 = vpop.eup %8465  ;;  %v2256_v19 = vmul.f32 0.5, %v8464_v56 }
 0x52a   :  { %v2259_v16 = vmul.f32 0.5, %v8466_v11  ;;  %v2297_v57 = vunpack.c.h.bf16 %v11086_v20 }
 0x52b   :  { %v2267_v7 = vmul.f32 %v2264_v1, %v9542_v0  ;;  %8467 = vtanh.f32 %v9588_v21  ;;  %v2262_v18 = vadd.f32 0.5, %v2256_v19  ;;  %v11085_v0 = vld [vmem:[#allocation28_spill] sm:$0xff]  ;;  %v11088_v19 = vld [vmem:[#allocation31_spill] sm:$0xff] }
 0x52c   :  { %v2265_v5 = vadd.f32 0.5, %v2259_v16  ;;  %v2294_v2 = vunpack.c.l.bf16 %v11085_v0  ;;  %v2295_v28 = vunpack.c.h.bf16 %v11085_v0  ;;  %v2301_v16 = vunpack.c.h.bf16 %v11088_v19 }
 0x52d   :  { %v9592_v29 = vadd.f32 %v2269_v59, %v2267_v7  ;;  %v11087_v59 = vld [vmem:[#allocation30_spill] sm:$0xff]  ;;  %v2300_v0 = vunpack.c.l.bf16 %v11088_v19 }
 0x52e   :  { %v2298_v7 = vunpack.c.l.bf16 %v11087_v59  ;;  %v2299_v11 = vunpack.c.h.bf16 %v11087_v59 }
 0x52f   :  { %8469 = vtanh.f32 %v9592_v29 }
 0x538   :  { %v8468_v15 = vpop.eup %8467 }
 0x539   :  { %v2274_v55 = vmul.f32 %v8468_v15, %v2262_v18 }
 0x53c   :  { %v8470_v61 = vpop.eup %8469 }
 0x53d   :  { %v2275_v60 = vmul.f32 %v8470_v61, %v2265_v5 }
 0x53f   :  { %v2276_v23 = vpack.c.bf16 %v2275_v60, %v2274_v55  ;;  %v2296_v60 = vunpack.c.l.bf16 %v11086_v20 }
 0x541   :  { %7846 = vst [vmem:[#allocation2 + $0x20] sm:$0xff] %v2276_v23   ;;  %2335 = vmatmul.mubr.bf16.vlgmr.msra.gmra.mxu0 %v2276_v23  ;;  %2378 = vmatmul.mubr.bf16.vlgmr.msra.gmra.mxu1 %v2276_v23 }
 0x542   :  { %2453 = vmatpush1.bf16.msra.mxu0 %v9435_v22  ;;  %2496 = vmatpush1.bf16.msra.mxu1 %v9438_v30 }
 0x543   :  { %2454 = vmatprep.subr.bf16.mxu0 %v9441_v31  ;;  %2497 = vmatprep.subr.bf16.mxu1 %v9444_v32 }
 0x544   :  { %2484 = vmatprep.mubr.bf16.mxu0 %v11071_v8  ;;  %2527 = vmatprep.mubr.bf16.mxu1 %v11071_v8 }
 0x546   :  { %2455 = vmatpush1.bf16.msra.mxu0 %v9449_v33  ;;  %2498 = vmatpush1.bf16.msra.mxu1 %v9452_v34 }
 0x547   :  { %2456 = vmatprep.subr.bf16.mxu0 %v9455_v35  ;;  %2499 = vmatprep.subr.bf16.mxu1 %v9458_v36 }
 0x54a   :  { %2457 = vmatpush1.bf16.msra.mxu0 %v9461_v37  ;;  %2500 = vmatpush1.bf16.msra.mxu1 %v9464_v38 }
 0x54b   :  { %2458 = vmatprep.subr.bf16.mxu0 %v9467_v39  ;;  %2501 = vmatprep.subr.bf16.mxu1 %v9470_v40 }
 0x54e   :  { %2459 = vmatpush1.bf16.msra.mxu0 %v9473_v41  ;;  %2502 = vmatpush1.bf16.msra.mxu1 %v9476_v42 }
 0x54f   :  { %2460 = vmatprep.subr.bf16.mxu0 %v9479_v43  ;;  %2503 = vmatprep.subr.bf16.mxu1 %v9482_v44 }
 0x552   :  { %2461 = vmatpush1.bf16.msra.mxu0 %v9485_v45  ;;  %2504 = vmatpush1.bf16.msra.mxu1 %v9488_v46 }
 0x553   :  { %2462 = vmatprep.subr.bf16.mxu0 %v9491_v47  ;;  %2505 = vmatprep.subr.bf16.mxu1 %v9494_v48 }
 0x556   :  { %2463 = vmatpush1.bf16.msra.mxu0 %v9497_v49  ;;  %2506 = vmatpush1.bf16.msra.mxu1 %v9500_v50 }
 0x557   :  { %2464 = vmatprep.subr.bf16.mxu0 %v9503_v51  ;;  %2507 = vmatprep.subr.bf16.mxu1 %v9506_v52 }
 0x55a   :  { %2465 = vmatpush1.bf16.msra.mxu0 %v9509_v53  ;;  %2508 = vmatpush1.bf16.msra.mxu1 %v9512_v54 }
 0x55b   :  { %2466 = vmatprep.subr.bf16.mxu0 %v9515_v62  ;;  %2509 = vmatprep.subr.bf16.mxu1 %v9518_v63 }
 0x55e   :  { %2467 = vmatpush1.bf16.msra.mxu0 %v9521_v6  ;;  %2510 = vmatpush1.bf16.msra.mxu1 %v9524_v13 }
 0x55f   :  { %2602 = vmatprep.subr.bf16.mxu0 %v9413_v25  ;;  %2645 = vmatprep.subr.bf16.mxu1 %v9416_v26 }
 0x601   :  { %v2336_v24 = vpop.f32.mrf.mxu0  ;;  %v2379_v9 = vpop.f32.mrf.mxu1 }
 0x602   :  { %v2388_v27 = vadd.f32 %v2336_v24, %v2294_v2  ;;  %v2390_v24 = vadd.f32 %v2379_v9, %v2296_v60 }
 0x603   :  { %v2338_v17 = vpop.f32.mrf.mxu0  ;;  %v2381_v10 = vpop.f32.mrf.mxu1 }
 0x604   :  { %8471 = vtanh.f32 %v2388_v27  ;;  %v2389_v12 = vadd.f32 %v2338_v17, %v2295_v28  ;;  %v2391_v1 = vadd.f32 %v2381_v10, %v2297_v57 }
 0x605   :  { %v2340_v56 = vpop.f32.mrf.mxu0  ;;  %v2383_v25 = vpop.f32.mrf.mxu1 }
 0x606   :  { %8473 = vtanh.f32 %v2389_v12  ;;  %v2392_v26 = vadd.f32 %v2340_v56, %v2298_v7  ;;  %v2394_v17 = vadd.f32 %v2383_v25, %v2300_v0 }
 0x607   :  { %8475 = vtanh.f32 %v2391_v1  ;;  %v2342_v15 = vpop.f32.mrf.mxu0  ;;  %v2385_v18 = vpop.f32.mrf.mxu1 }
 0x608   :  { %8477 = vtanh.f32 %v2392_v26  ;;  %v2393_v5 = vadd.f32 %v2342_v15, %v2299_v11  ;;  %v2395_v61 = vadd.f32 %v2385_v18, %v2301_v16 }
 0x60a   :  { %8479 = vtanh.f32 %v2393_v5 }
 0x60b   :  { %8481 = vtanh.f32 %v2395_v61 }
 0x60c   :  { %8483 = vtanh.f32 %v2390_v24 }
 0x60d   :  { %8485 = vtanh.f32 %v2394_v17 }
 0x611   :  { %v8472_v55 = vpop.eup %8471 }
 0x612   :  { %v2404_v23 = vmul.f32 0.5, %v8472_v55 }
 0x613   :  { %v8474_v2 = vpop.eup %8473 }
 0x614   :  { %v8476_v27 = vpop.eup %8475  ;;  %v2410_v28 = vadd.f32 0.5, %v2404_v23  ;;  %v2405_v57 = vmul.f32 0.5, %v8474_v2 }
 0x615   :  { %v8478_v10 = vpop.eup %8477 }
 0x616   :  { %v2411_v12 = vadd.f32 0.5, %v2405_v57  ;;  %v2418_v1 = vmul.f32 %v8476_v27, %v2410_v28  ;;  %v2407_v59 = vmul.f32 0.5, %v8478_v10 }
 0x617   :  { %v8480_v7 = vpop.eup %8479 }
 0x618   :  { %v2416_v56 = vmul.f32 %v2411_v12, %v9588_v21  ;;  %v2413_v26 = vadd.f32 0.5, %v2407_v59  ;;  %v2408_v20 = vmul.f32 0.5, %v8480_v7  ;;  %v8482_v11 = vpop.eup %8481 }
 0x619   :  { %v8484_v18 = vpop.eup %8483 }
 0x61a   :  { %v9638_v16 = vadd.f32 %v2418_v1, %v2416_v56  ;;  %v2414_v19 = vadd.f32 0.5, %v2408_v20  ;;  %v2419_v9 = vmul.f32 %v8482_v11, %v2413_v26  ;;  %v8486_v5 = vpop.eup %8485  ;;  %v2406_v61 = vmul.f32 0.5, %v8484_v18 }
 0x61b   :  { %v2409_v21 = vmul.f32 0.5, %v8486_v5 }
 0x61c   :  { %v2417_v15 = vmul.f32 %v2414_v19, %v9592_v29  ;;  %8487 = vtanh.f32 %v9638_v16  ;;  %v2412_v60 = vadd.f32 0.5, %v2406_v61 }
 0x61d   :  { %v2415_v23 = vadd.f32 0.5, %v2409_v21 }
 0x61e   :  { %v9642_v25 = vadd.f32 %v2419_v9, %v2417_v15 }
 0x620   :  { %8489 = vtanh.f32 %v9642_v25 }
 0x629   :  { %v8488_v55 = vpop.eup %8487 }
 0x62a   :  { %v2424_v2 = vmul.f32 %v8488_v55, %v2412_v60 }
 0x62d   :  { %v8490_v0 = vpop.eup %8489 }
 0x62e   :  { %v2425_v24 = vmul.f32 %v8490_v0, %v2415_v23 }
 0x630   :  { %v2426_v27 = vpack.c.bf16 %v2425_v24, %v2424_v2 }
 0x632   :  { %7851 = vst [vmem:[#allocation2 + $0x28] sm:$0xff] %v2426_v27   ;;  %2485 = vmatmul.mubr.bf16.vlgmr.msra.gmra.mxu0 %v2426_v27  ;;  %2528 = vmatmul.mubr.bf16.vlgmr.msra.gmra.mxu1 %v2426_v27 }
 0x633   :  { %2603 = vmatpush1.bf16.msra.mxu0 %v9435_v22  ;;  %2646 = vmatpush1.bf16.msra.mxu1 %v9438_v30  ;;  %v9677_v22 = vld [vmem:[#allocation7 + $0xe4] ss:$16 sps:$4 sm:$0xff]   ;;  %v9679_v30 = vld [vmem:[#allocation7 + $0xec] ss:$16 sps:$4 sm:$0xff]  }
 0x634   :  { %2604 = vmatprep.subr.bf16.mxu0 %v9441_v31  ;;  %2647 = vmatprep.subr.bf16.mxu1 %v9444_v32  ;;  %v11089_v31 = vld [vmem:[#allocation32_spill] sm:$0xff] }
 0x635   :  { %2634 = vmatprep.mubr.bf16.mxu0 %v11071_v8  ;;  %2677 = vmatprep.mubr.bf16.mxu1 %v11071_v8  ;;  %v2444_v32 = vunpack.c.l.bf16 %v11089_v31 }
 0x637   :  { %2605 = vmatpush1.bf16.msra.mxu0 %v9449_v33  ;;  %2648 = vmatpush1.bf16.msra.mxu1 %v9452_v34 }
 0x638   :  { %2606 = vmatprep.subr.bf16.mxu0 %v9455_v35  ;;  %2649 = vmatprep.subr.bf16.mxu1 %v9458_v36  ;;  %v2445_v36 = vunpack.c.h.bf16 %v11089_v31 }
 0x63b   :  { %2607 = vmatpush1.bf16.msra.mxu0 %v9461_v37  ;;  %2650 = vmatpush1.bf16.msra.mxu1 %v9464_v38  ;;  %v11090_v37 = vld [vmem:[#allocation33_spill] sm:$0xff] }
 0x63c   :  { %2608 = vmatprep.subr.bf16.mxu0 %v9467_v39  ;;  %2651 = vmatprep.subr.bf16.mxu1 %v9470_v40  ;;  %v2447_v38 = vunpack.c.h.bf16 %v11090_v37 }
 0x63f   :  { %2609 = vmatpush1.bf16.msra.mxu0 %v9473_v41  ;;  %2652 = vmatpush1.bf16.msra.mxu1 %v9476_v42 }
 0x640   :  { %2610 = vmatprep.subr.bf16.mxu0 %v9479_v43  ;;  %2653 = vmatprep.subr.bf16.mxu1 %v9482_v44  ;;  %v11091_v43 = vld [vmem:[#allocation34_spill] sm:$0xff] }
 0x641   :  { %v2448_v44 = vunpack.c.l.bf16 %v11091_v43 }
 0x643   :  { %2611 = vmatpush1.bf16.msra.mxu0 %v9485_v45  ;;  %2654 = vmatpush1.bf16.msra.mxu1 %v9488_v46 }
 0x644   :  { %2612 = vmatprep.subr.bf16.mxu0 %v9491_v47  ;;  %2655 = vmatprep.subr.bf16.mxu1 %v9494_v48  ;;  %v2449_v48 = vunpack.c.h.bf16 %v11091_v43  ;;  %v9729_v43 = vld [vmem:[#allocation7 + $0x84] ss:$16 sps:$4 sm:$0xff]  }
 0x647   :  { %2613 = vmatpush1.bf16.msra.mxu0 %v9497_v49  ;;  %2656 = vmatpush1.bf16.msra.mxu1 %v9500_v50  ;;  %v11092_v49 = vld [vmem:[#allocation35_spill] sm:$0xff] }
 0x648   :  { %2614 = vmatprep.subr.bf16.mxu0 %v9503_v51  ;;  %2657 = vmatprep.subr.bf16.mxu1 %v9506_v52  ;;  %v2451_v50 = vunpack.c.h.bf16 %v11092_v49 }
 0x64b   :  { %2615 = vmatpush1.bf16.msra.mxu0 %v9509_v53  ;;  %2658 = vmatpush1.bf16.msra.mxu1 %v9512_v54 }
 0x64c   :  { %2616 = vmatprep.subr.bf16.mxu0 %v9515_v62  ;;  %2659 = vmatprep.subr.bf16.mxu1 %v9518_v63  ;;  %v2446_v63 = vunpack.c.l.bf16 %v11090_v37  ;;  %v9709_v37 = vld [vmem:[#allocation7 + $0xc0] ss:$16 sps:$4 sm:$0xff]  }
 0x64f   :  { %2617 = vmatpush1.bf16.msra.mxu0 %v9521_v6  ;;  %2660 = vmatpush1.bf16.msra.mxu1 %v9524_v13  ;;  %v2450_v13 = vunpack.c.l.bf16 %v11092_v49  ;;  %v9747_v49 = vld [vmem:[#allocation7 + $0x60] ss:$16 sps:$4 sm:$0xff]  }
 0x650   :  { %2959 = vmatprep.subr.bf16.mxu0 %v9677_v22  ;;  %3002 = vmatprep.subr.bf16.mxu1 %v9679_v30 }
 0x6f2   :  { %v2486_v33 = vpop.f32.mrf.mxu0  ;;  %v2529_v34 = vpop.f32.mrf.mxu1 }
 0x6f3   :  { %v2538_v35 = vadd.f32 %v2486_v33, %v2444_v32  ;;  %v2540_v28 = vadd.f32 %v2529_v34, %v2446_v63  ;;  %v9699_v33 = vld [vmem:[#allocation7 + $0xe0] ss:$16 sps:$4 sm:$0xff]   ;;  %v9701_v34 = vld [vmem:[#allocation7 + $0xe8] ss:$16 sps:$4 sm:$0xff]   ;;  %v9767_v63 = vld [vmem:[#allocation7 + $0x2c] ss:$16 sps:$4 sm:$0xff]  }
 0x6f4   :  { %v2488_v39 = vpop.f32.mrf.mxu0  ;;  %v2531_v40 = vpop.f32.mrf.mxu1 }
 0x6f5   :  { %8491 = vtanh.f32 %v2538_v35  ;;  %v2539_v41 = vadd.f32 %v2488_v39, %v2445_v36  ;;  %v2541_v42 = vadd.f32 %v2531_v40, %v2447_v38  ;;  %v9703_v35 = vld [vmem:[#allocation7 + $0xc4] ss:$16 sps:$4 sm:$0xff]   ;;  %v9705_v36 = vld [vmem:[#allocation7 + $0xcc] ss:$16 sps:$4 sm:$0xff]   ;;  %v9711_v38 = vld [vmem:[#allocation7 + $0xc8] ss:$16 sps:$4 sm:$0xff]  }
 0x6f6   :  { %v2490_v45 = vpop.f32.mrf.mxu0  ;;  %v2533_v46 = vpop.f32.mrf.mxu1  ;;  %v9715_v39 = vld [vmem:[#allocation7 + $0xa4] ss:$16 sps:$4 sm:$0xff]   ;;  %v9717_v40 = vld [vmem:[#allocation7 + $0xac] ss:$16 sps:$4 sm:$0xff]  }
 0x6f7   :  { %8493 = vtanh.f32 %v2539_v41  ;;  %v2542_v47 = vadd.f32 %v2490_v45, %v2448_v44  ;;  %v2544_v12 = vadd.f32 %v2533_v46, %v2450_v13  ;;  %v9723_v41 = vld [vmem:[#allocation7 + $0xa0] ss:$16 sps:$4 sm:$0xff]   ;;  %v9731_v44 = vld [vmem:[#allocation7 + $0x8c] ss:$16 sps:$4 sm:$0xff]   ;;  %v9737_v46 = vld [vmem:[#allocation7 + $0x88] ss:$16 sps:$4 sm:$0xff]  }
 0x6f8   :  { %8495 = vtanh.f32 %v2541_v42  ;;  %v2492_v51 = vpop.f32.mrf.mxu0  ;;  %v2535_v52 = vpop.f32.mrf.mxu1  ;;  %v9725_v42 = vld [vmem:[#allocation7 + $0xa8] ss:$16 sps:$4 sm:$0xff]   ;;  %v9735_v45 = vld [vmem:[#allocation7 + $0x80] ss:$16 sps:$4 sm:$0xff]  }
 0x6f9   :  { %8497 = vtanh.f32 %v2542_v47  ;;  %v2543_v53 = vadd.f32 %v2492_v51, %v2449_v48  ;;  %v2545_v54 = vadd.f32 %v2535_v52, %v2451_v50  ;;  %v9741_v47 = vld [vmem:[#allocation7 + $0x64] ss:$16 sps:$4 sm:$0xff]   ;;  %v9743_v48 = vld [vmem:[#allocation7 + $0x6c] ss:$16 sps:$4 sm:$0xff]   ;;  %v9749_v50 = vld [vmem:[#allocation7 + $0x68] ss:$16 sps:$4 sm:$0xff]  }
 0x6fa   :  { %v9753_v51 = vld [vmem:[#allocation7 + $0x44] ss:$16 sps:$4 sm:$0xff]   ;;  %v9755_v52 = vld [vmem:[#allocation7 + $0x4c] ss:$16 sps:$4 sm:$0xff]   ;;  %v9773_v13 = vld [vmem:[#allocation7 + $0x28] ss:$16 sps:$4 sm:$0xff]  }
 0x6fb   :  { %8499 = vtanh.f32 %v2543_v53  ;;  %v9759_v53 = vld [vmem:[#allocation7 + $0x40] ss:$16 sps:$4 sm:$0xff]  }
 0x6fc   :  { %8501 = vtanh.f32 %v2545_v54  ;;  %v9761_v54 = vld [vmem:[#allocation7 + $0x48] ss:$16 sps:$4 sm:$0xff]  }
 0x6fd   :  { %8503 = vtanh.f32 %v2540_v28  ;;  %v9779_v28 = vld [vmem:[#allocation7 + $0xc] ss:$16 sps:$4 sm:$0xff]  }
 0x6fe   :  { %8505 = vtanh.f32 %v2544_v12  ;;  %v8252_v12 = vld [vmem:[#allocation2 + $0x8] sm:$0xff]  }
 0x702   :  { %v8492_v62 = vpop.eup %8491 }
 0x703   :  { %v2554_v6 = vmul.f32 0.5, %v8492_v62  ;;  %v9765_v62 = vld [vmem:[#allocation7 + $0x24] ss:$16 sps:$4 sm:$0xff]  }
 0x704   :  { %v8494_v29 = vpop.eup %8493 }
 0x705   :  { %v8496_v57 = vpop.eup %8495  ;;  %v2560_v17 = vadd.f32 0.5, %v2554_v6  ;;  %v2555_v10 = vmul.f32 0.5, %v8494_v29  ;;  %v9771_v6 = vld [vmem:[#allocation7 + $0x20] ss:$16 sps:$4 sm:$0xff]   ;;  %v9777_v29 = vld [vmem:[#allocation7 + $0x4] ss:$16 sps:$4 sm:$0xff]  }
 0x706   :  { %v8498_v1 = vpop.eup %8497 }
 0x707   :  { %v2561_v59 = vadd.f32 0.5, %v2555_v10  ;;  %v2568_v7 = vmul.f32 %v8496_v57, %v2560_v17  ;;  %v2557_v56 = vmul.f32 0.5, %v8498_v1  ;;  %v9783_v57 = vld [vmem:[#allocation7] ss:$16 sps:$4 sm:$0xff]   ;;  %v9785_v17 = vld [vmem:[#allocation7 + $0x8] ss:$16 sps:$4 sm:$0xff]  }
 0x708   :  { %v8500_v26 = vpop.eup %8499  ;;  %v8251_v10 = vld [vmem:[#allocation2] sm:$0xff]   ;;  %v8253_v1 = vld [vmem:[#allocation2 + $0x10] sm:$0xff]  }
 0x709   :  { %v2566_v20 = vmul.f32 %v2561_v59, %v9638_v16  ;;  %v2563_v11 = vadd.f32 0.5, %v2557_v56  ;;  %v2558_v19 = vmul.f32 0.5, %v8500_v26  ;;  %v8502_v9 = vpop.eup %8501  ;;  %v8254_v59 = vld [vmem:[#allocation2 + $0x18] sm:$0xff]   ;;  %v8255_v26 = vld [vmem:[#allocation2 + $0x20] sm:$0xff]  }
 0x70a   :  { %v8504_v55 = vpop.eup %8503  ;;  %v9933_v56 = vld [vmem:[#allocation7 + $0xe8] ss:$16 sps:$4 sm:$0xff]  }
 0x70b   :  { %v9692_v15 = vadd.f32 %v2568_v7, %v2566_v20  ;;  %v2564_v18 = vadd.f32 0.5, %v2558_v19  ;;  %v2569_v5 = vmul.f32 %v8502_v9, %v2563_v11  ;;  %v8506_v60 = vpop.eup %8505  ;;  %v2556_v23 = vmul.f32 0.5, %v8504_v55  ;;  %v9931_v7 = vld [vmem:[#allocation7 + $0xe0] ss:$16 sps:$4 sm:$0xff]   ;;  %v9937_v20 = vld [vmem:[#allocation7 + $0xc4] ss:$16 sps:$4 sm:$0xff]  }
 0x70c   :  { %v2559_v16 = vmul.f32 0.5, %v8506_v60  ;;  %v9939_v11 = vld [vmem:[#allocation7 + $0xcc] ss:$16 sps:$4 sm:$0xff]   ;;  %v9943_v19 = vld [vmem:[#allocation7 + $0xc0] ss:$16 sps:$4 sm:$0xff]  }
 0x70d   :  { %v2567_v61 = vmul.f32 %v2564_v18, %v9642_v25  ;;  %8507 = vtanh.f32 %v9692_v15  ;;  %v2562_v2 = vadd.f32 0.5, %v2556_v23  ;;  %v9945_v9 = vld [vmem:[#allocation7 + $0xc8] ss:$16 sps:$4 sm:$0xff]   ;;  %v9949_v18 = vld [vmem:[#allocation7 + $0xa4] ss:$16 sps:$4 sm:$0xff]  }
 0x70e   :  { %v2565_v24 = vadd.f32 0.5, %v2559_v16  ;;  %v9959_v55 = vld [vmem:[#allocation7 + $0xa8] ss:$16 sps:$4 sm:$0xff]   ;;  %v9963_v60 = vld [vmem:[#allocation7 + $0x84] ss:$16 sps:$4 sm:$0xff]  }
 0x70f   :  { %v9696_v21 = vadd.f32 %v2569_v5, %v2567_v61  ;;  %v9951_v5 = vld [vmem:[#allocation7 + $0xac] ss:$16 sps:$4 sm:$0xff]   ;;  %v9957_v61 = vld [vmem:[#allocation7 + $0xa0] ss:$16 sps:$4 sm:$0xff]  }
 0x710   :  { %v9965_v23 = vld [vmem:[#allocation7 + $0x8c] ss:$16 sps:$4 sm:$0xff]   ;;  %v9969_v16 = vld [vmem:[#allocation7 + $0x80] ss:$16 sps:$4 sm:$0xff]  }
 0x711   :  { %8509 = vtanh.f32 %v9696_v21 }
 0x71a   :  { %v8508_v0 = vpop.eup %8507 }
 0x71b   :  { %v2574_v31 = vmul.f32 %v8508_v0, %v2562_v2  ;;  %v9971_v0 = vld [vmem:[#allocation7 + $0x88] ss:$16 sps:$4 sm:$0xff]   ;;  %v9975_v2 = vld [vmem:[#allocation7 + $0x64] ss:$16 sps:$4 sm:$0xff]  }
 0x71e   :  { %v8510_v27 = vpop.eup %8509 }
 0x71f   :  { %v2575_v32 = vmul.f32 %v8510_v27, %v2565_v24  ;;  %v9977_v24 = vld [vmem:[#allocation7 + $0x6c] ss:$16 sps:$4 sm:$0xff]   ;;  %v9981_v27 = vld [vmem:[#allocation7 + $0x60] ss:$16 sps:$4 sm:$0xff]  }
 0x721   :  { %v2576_v25 = vpack.c.bf16 %v2575_v32, %v2574_v31  ;;  %v9983_v31 = vld [vmem:[#allocation7 + $0x68] ss:$16 sps:$4 sm:$0xff]   ;;  %v9987_v32 = vld [vmem:[#allocation7 + $0x44] ss:$16 sps:$4 sm:$0xff]  }
 0x723   :  { %7856 = vst [vmem:[#allocation2 + $0x30] sm:$0xff] %v2576_v25   ;;  %2635 = vmatmul.mubr.bf16.vlgmr.msra.gmra.mxu0 %v2576_v25  ;;  %2678 = vmatmul.mubr.bf16.vlgmr.msra.gmra.mxu1 %v2576_v25  ;;  %v9995_v25 = vld [vmem:[#allocation7 + $0x48] ss:$16 sps:$4 sm:$0xff]  }
 0x724   :  { %2960 = vmatpush1.bf16.msra.mxu0 %v9699_v33  ;;  %3003 = vmatpush1.bf16.msra.mxu1 %v9701_v34 }
 0x725   :  { %2961 = vmatprep.subr.bf16.mxu0 %v9703_v35  ;;  %3004 = vmatprep.subr.bf16.mxu1 %v9705_v36 }
 0x726   :  { %2991 = vmatprep.mubr.bf16.mxu0 %v11071_v8  ;;  %3034 = vmatprep.mubr.bf16.mxu1 %v11071_v8 }
 0x728   :  { %2962 = vmatpush1.bf16.msra.mxu0 %v9709_v37  ;;  %3005 = vmatpush1.bf16.msra.mxu1 %v9711_v38 }
 0x729   :  { %2963 = vmatprep.subr.bf16.mxu0 %v9715_v39  ;;  %3006 = vmatprep.subr.bf16.mxu1 %v9717_v40 }
 0x72c   :  { %2964 = vmatpush1.bf16.msra.mxu0 %v9723_v41  ;;  %3007 = vmatpush1.bf16.msra.mxu1 %v9725_v42 }
 0x72d   :  { %2965 = vmatprep.subr.bf16.mxu0 %v9729_v43  ;;  %3008 = vmatprep.subr.bf16.mxu1 %v9731_v44 }
 0x730   :  { %2966 = vmatpush1.bf16.msra.mxu0 %v9735_v45  ;;  %3009 = vmatpush1.bf16.msra.mxu1 %v9737_v46 }
 0x731   :  { %2967 = vmatprep.subr.bf16.mxu0 %v9741_v47  ;;  %3010 = vmatprep.subr.bf16.mxu1 %v9743_v48 }
 0x734   :  { %2968 = vmatpush1.bf16.msra.mxu0 %v9747_v49  ;;  %3011 = vmatpush1.bf16.msra.mxu1 %v9749_v50 }
 0x735   :  { %2969 = vmatprep.subr.bf16.mxu0 %v9753_v51  ;;  %3012 = vmatprep.subr.bf16.mxu1 %v9755_v52 }
 0x738   :  { %2970 = vmatpush1.bf16.msra.mxu0 %v9759_v53  ;;  %3013 = vmatpush1.bf16.msra.mxu1 %v9761_v54 }
 0x739   :  { %2971 = vmatprep.subr.bf16.mxu0 %v9765_v62  ;;  %3014 = vmatprep.subr.bf16.mxu1 %v9767_v63 }
 0x73c   :  { %2972 = vmatpush1.bf16.msra.mxu0 %v9771_v6  ;;  %3015 = vmatpush1.bf16.msra.mxu1 %v9773_v13 }
 0x73d   :  { %2973 = vmatprep.subr.bf16.mxu0 %v9777_v29  ;;  %3016 = vmatprep.subr.bf16.mxu1 %v9779_v28 }
 0x740   :  { %2974 = vmatpush1.bf16.msra.mxu0 %v9783_v57  ;;  %3017 = vmatpush1.bf16.msra.mxu1 %v9785_v17 }
 0x741   :  { %3273 = vmatprep.subr.bf16.mxu0 %v9677_v22  ;;  %3316 = vmatprep.subr.bf16.mxu1 %v9679_v30 }
 0x743   :  { %2992 = vmatmul.mubr.bf16.vlgmr.msra.gmra.mxu0 %v8251_v10  ;;  %3035 = vmatmul.mubr.bf16.vlgmr.msra.gmra.mxu1 %v8251_v10 }
 0x744   :  { %3274 = vmatpush1.bf16.msra.mxu0 %v9699_v33  ;;  %3317 = vmatpush1.bf16.msra.mxu1 %v9701_v34 }
 0x745   :  { %3275 = vmatprep.subr.bf16.mxu0 %v9703_v35  ;;  %3318 = vmatprep.subr.bf16.mxu1 %v9705_v36 }
 0x746   :  { %3305 = vmatprep.mubr.bf16.mxu0 %v11071_v8  ;;  %3348 = vmatprep.mubr.bf16.mxu1 %v11071_v8 }
 0x748   :  { %3276 = vmatpush1.bf16.msra.mxu0 %v9709_v37  ;;  %3319 = vmatpush1.bf16.msra.mxu1 %v9711_v38 }
 0x749   :  { %3277 = vmatprep.subr.bf16.mxu0 %v9715_v39  ;;  %3320 = vmatprep.subr.bf16.mxu1 %v9717_v40 }
 0x74c   :  { %3278 = vmatpush1.bf16.msra.mxu0 %v9723_v41  ;;  %3321 = vmatpush1.bf16.msra.mxu1 %v9725_v42 }
 0x74d   :  { %3279 = vmatprep.subr.bf16.mxu0 %v9729_v43  ;;  %3322 = vmatprep.subr.bf16.mxu1 %v9731_v44 }
 0x750   :  { %3280 = vmatpush1.bf16.msra.mxu0 %v9735_v45  ;;  %3323 = vmatpush1.bf16.msra.mxu1 %v9737_v46 }
 0x751   :  { %3281 = vmatprep.subr.bf16.mxu0 %v9741_v47  ;;  %3324 = vmatprep.subr.bf16.mxu1 %v9743_v48 }
 0x754   :  { %3282 = vmatpush1.bf16.msra.mxu0 %v9747_v49  ;;  %3325 = vmatpush1.bf16.msra.mxu1 %v9749_v50 }
 0x755   :  { %3283 = vmatprep.subr.bf16.mxu0 %v9753_v51  ;;  %3326 = vmatprep.subr.bf16.mxu1 %v9755_v52 }
 0x758   :  { %3284 = vmatpush1.bf16.msra.mxu0 %v9759_v53  ;;  %3327 = vmatpush1.bf16.msra.mxu1 %v9761_v54 }
 0x759   :  { %3285 = vmatprep.subr.bf16.mxu0 %v9765_v62  ;;  %3328 = vmatprep.subr.bf16.mxu1 %v9767_v63 }
 0x75c   :  { %3286 = vmatpush1.bf16.msra.mxu0 %v9771_v6  ;;  %3329 = vmatpush1.bf16.msra.mxu1 %v9773_v13 }
 0x75d   :  { %3287 = vmatprep.subr.bf16.mxu0 %v9777_v29  ;;  %3330 = vmatprep.subr.bf16.mxu1 %v9779_v28 }
 0x760   :  { %3288 = vmatpush1.bf16.msra.mxu0 %v9783_v57  ;;  %3331 = vmatpush1.bf16.msra.mxu1 %v9785_v17 }
 0x761   :  { %3587 = vmatprep.subr.bf16.mxu0 %v9677_v22  ;;  %3630 = vmatprep.subr.bf16.mxu1 %v9679_v30 }
 0x763   :  { %3306 = vmatmul.mubr.bf16.vlgmr.msra.gmra.mxu0 %v8252_v12  ;;  %3349 = vmatmul.mubr.bf16.vlgmr.msra.gmra.mxu1 %v8252_v12 }
 0x764   :  { %3588 = vmatpush1.bf16.msra.mxu0 %v9699_v33  ;;  %3631 = vmatpush1.bf16.msra.mxu1 %v9701_v34 }
 0x765   :  { %3589 = vmatprep.subr.bf16.mxu0 %v9703_v35  ;;  %3632 = vmatprep.subr.bf16.mxu1 %v9705_v36 }
 0x766   :  { %3619 = vmatprep.mubr.bf16.mxu0 %v11071_v8  ;;  %3662 = vmatprep.mubr.bf16.mxu1 %v11071_v8 }
 0x768   :  { %3590 = vmatpush1.bf16.msra.mxu0 %v9709_v37  ;;  %3633 = vmatpush1.bf16.msra.mxu1 %v9711_v38 }
 0x769   :  { %3591 = vmatprep.subr.bf16.mxu0 %v9715_v39  ;;  %3634 = vmatprep.subr.bf16.mxu1 %v9717_v40 }
 0x76c   :  { %3592 = vmatpush1.bf16.msra.mxu0 %v9723_v41  ;;  %3635 = vmatpush1.bf16.msra.mxu1 %v9725_v42 }
 0x76d   :  { %3593 = vmatprep.subr.bf16.mxu0 %v9729_v43  ;;  %3636 = vmatprep.subr.bf16.mxu1 %v9731_v44 }
 0x770   :  { %3594 = vmatpush1.bf16.msra.mxu0 %v9735_v45  ;;  %3637 = vmatpush1.bf16.msra.mxu1 %v9737_v46 }
 0x771   :  { %3595 = vmatprep.subr.bf16.mxu0 %v9741_v47  ;;  %3638 = vmatprep.subr.bf16.mxu1 %v9743_v48 }
 0x774   :  { %3596 = vmatpush1.bf16.msra.mxu0 %v9747_v49  ;;  %3639 = vmatpush1.bf16.msra.mxu1 %v9749_v50 }
 0x775   :  { %3597 = vmatprep.subr.bf16.mxu0 %v9753_v51  ;;  %3640 = vmatprep.subr.bf16.mxu1 %v9755_v52 }
 0x778   :  { %3598 = vmatpush1.bf16.msra.mxu0 %v9759_v53  ;;  %3641 = vmatpush1.bf16.msra.mxu1 %v9761_v54 }
 0x779   :  { %3599 = vmatprep.subr.bf16.mxu0 %v9765_v62  ;;  %3642 = vmatprep.subr.bf16.mxu1 %v9767_v63 }
 0x77c   :  { %3600 = vmatpush1.bf16.msra.mxu0 %v9771_v6  ;;  %3643 = vmatpush1.bf16.msra.mxu1 %v9773_v13 }
 0x77d   :  { %3601 = vmatprep.subr.bf16.mxu0 %v9777_v29  ;;  %3644 = vmatprep.subr.bf16.mxu1 %v9779_v28 }
 0x780   :  { %3602 = vmatpush1.bf16.msra.mxu0 %v9783_v57  ;;  %3645 = vmatpush1.bf16.msra.mxu1 %v9785_v17 }
 0x781   :  { %3901 = vmatprep.subr.bf16.mxu0 %v9677_v22  ;;  %3944 = vmatprep.subr.bf16.mxu1 %v9679_v30 }
 0x783   :  { %3620 = vmatmul.mubr.bf16.vlgmr.msra.gmra.mxu0 %v8253_v1  ;;  %3663 = vmatmul.mubr.bf16.vlgmr.msra.gmra.mxu1 %v8253_v1 }
 0x784   :  { %3902 = vmatpush1.bf16.msra.mxu0 %v9699_v33  ;;  %3945 = vmatpush1.bf16.msra.mxu1 %v9701_v34 }
 0x785   :  { %3903 = vmatprep.subr.bf16.mxu0 %v9703_v35  ;;  %3946 = vmatprep.subr.bf16.mxu1 %v9705_v36 }
 0x786   :  { %3933 = vmatprep.mubr.bf16.mxu0 %v11071_v8  ;;  %3976 = vmatprep.mubr.bf16.mxu1 %v11071_v8 }
 0x788   :  { %3904 = vmatpush1.bf16.msra.mxu0 %v9709_v37  ;;  %3947 = vmatpush1.bf16.msra.mxu1 %v9711_v38 }
 0x789   :  { %3905 = vmatprep.subr.bf16.mxu0 %v9715_v39  ;;  %3948 = vmatprep.subr.bf16.mxu1 %v9717_v40 }
 0x78c   :  { %3906 = vmatpush1.bf16.msra.mxu0 %v9723_v41  ;;  %3949 = vmatpush1.bf16.msra.mxu1 %v9725_v42 }
 0x78d   :  { %3907 = vmatprep.subr.bf16.mxu0 %v9729_v43  ;;  %3950 = vmatprep.subr.bf16.mxu1 %v9731_v44 }
 0x790   :  { %3908 = vmatpush1.bf16.msra.mxu0 %v9735_v45  ;;  %3951 = vmatpush1.bf16.msra.mxu1 %v9737_v46 }
 0x791   :  { %3909 = vmatprep.subr.bf16.mxu0 %v9741_v47  ;;  %3952 = vmatprep.subr.bf16.mxu1 %v9743_v48 }
 0x794   :  { %3910 = vmatpush1.bf16.msra.mxu0 %v9747_v49  ;;  %3953 = vmatpush1.bf16.msra.mxu1 %v9749_v50 }
 0x795   :  { %3911 = vmatprep.subr.bf16.mxu0 %v9753_v51  ;;  %3954 = vmatprep.subr.bf16.mxu1 %v9755_v52 }
 0x798   :  { %3912 = vmatpush1.bf16.msra.mxu0 %v9759_v53  ;;  %3955 = vmatpush1.bf16.msra.mxu1 %v9761_v54 }
 0x799   :  { %3913 = vmatprep.subr.bf16.mxu0 %v9765_v62  ;;  %3956 = vmatprep.subr.bf16.mxu1 %v9767_v63 }
 0x79c   :  { %3914 = vmatpush1.bf16.msra.mxu0 %v9771_v6  ;;  %3957 = vmatpush1.bf16.msra.mxu1 %v9773_v13 }
 0x79d   :  { %3915 = vmatprep.subr.bf16.mxu0 %v9777_v29  ;;  %3958 = vmatprep.subr.bf16.mxu1 %v9779_v28 }
 0x7a0   :  { %3916 = vmatpush1.bf16.msra.mxu0 %v9783_v57  ;;  %3959 = vmatpush1.bf16.msra.mxu1 %v9785_v17 }
 0x7a1   :  { %4215 = vmatprep.subr.bf16.mxu0 %v9677_v22  ;;  %4258 = vmatprep.subr.bf16.mxu1 %v9679_v30  ;;  %v9925_v22 = vld [vmem:[#allocation7 + $0xe4] ss:$16 sps:$4 sm:$0xff]   ;;  %v9927_v30 = vld [vmem:[#allocation7 + $0xec] ss:$16 sps:$4 sm:$0xff]  }
 0x7a3   :  { %3934 = vmatmul.mubr.bf16.vlgmr.msra.gmra.mxu0 %v8254_v59  ;;  %3977 = vmatmul.mubr.bf16.vlgmr.msra.gmra.mxu1 %v8254_v59  ;;  %v2600_v59 = vunpack.c.l.bf16 %v9307_v4 }
 0x7a4   :  { %4216 = vmatpush1.bf16.msra.mxu0 %v9699_v33  ;;  %4259 = vmatpush1.bf16.msra.mxu1 %v9701_v34  ;;  %v9989_v33 = vld [vmem:[#allocation7 + $0x4c] ss:$16 sps:$4 sm:$0xff]   ;;  %v9993_v34 = vld [vmem:[#allocation7 + $0x40] ss:$16 sps:$4 sm:$0xff]  }
 0x7a5   :  { %4217 = vmatprep.subr.bf16.mxu0 %v9703_v35  ;;  %4260 = vmatprep.subr.bf16.mxu1 %v9705_v36  ;;  %v9999_v35 = vld [vmem:[#allocation7 + $0x24] ss:$16 sps:$4 sm:$0xff]   ;;  %v10001_v36 = vld [vmem:[#allocation7 + $0x2c] ss:$16 sps:$4 sm:$0xff]  }
 0x7a6   :  { %4247 = vmatprep.mubr.bf16.mxu0 %v11071_v8  ;;  %4290 = vmatprep.mubr.bf16.mxu1 %v11071_v8 }
 0x7a8   :  { %4218 = vmatpush1.bf16.msra.mxu0 %v9709_v37  ;;  %4261 = vmatpush1.bf16.msra.mxu1 %v9711_v38  ;;  %v10005_v37 = vld [vmem:[#allocation7 + $0x20] ss:$16 sps:$4 sm:$0xff]   ;;  %v10007_v38 = vld [vmem:[#allocation7 + $0x28] ss:$16 sps:$4 sm:$0xff]  }
 0x7a9   :  { %4219 = vmatprep.subr.bf16.mxu0 %v9715_v39  ;;  %4262 = vmatprep.subr.bf16.mxu1 %v9717_v40  ;;  %v10011_v39 = vld [vmem:[#allocation7 + $0x4] ss:$16 sps:$4 sm:$0xff]   ;;  %v10013_v40 = vld [vmem:[#allocation7 + $0xc] ss:$16 sps:$4 sm:$0xff]  }
 0x7ac   :  { %4220 = vmatpush1.bf16.msra.mxu0 %v9723_v41  ;;  %4263 = vmatpush1.bf16.msra.mxu1 %v9725_v42  ;;  %v10017_v41 = vld [vmem:[#allocation7] ss:$16 sps:$4 sm:$0xff]   ;;  %v10019_v42 = vld [vmem:[#allocation7 + $0x8] ss:$16 sps:$4 sm:$0xff]  }
 0x7ad   :  { %4221 = vmatprep.subr.bf16.mxu0 %v9729_v43  ;;  %4264 = vmatprep.subr.bf16.mxu1 %v9731_v44  ;;  %v8304_v43 = vld [vmem:[#allocation2 + $0x28] sm:$0xff]   ;;  %v2594_v44 = vunpack.c.l.bf16 %v9296_v58 }
 0x7b0   :  { %4222 = vmatpush1.bf16.msra.mxu0 %v9735_v45  ;;  %4265 = vmatpush1.bf16.msra.mxu1 %v9737_v46 }
 0x7b1   :  { %4223 = vmatprep.subr.bf16.mxu0 %v9741_v47  ;;  %4266 = vmatprep.subr.bf16.mxu1 %v9743_v48  ;;  %v2595_v48 = vunpack.c.h.bf16 %v9296_v58 }
 0x7b4   :  { %4224 = vmatpush1.bf16.msra.mxu0 %v9747_v49  ;;  %4267 = vmatpush1.bf16.msra.mxu1 %v9749_v50  ;;  %v2597_v49 = vunpack.c.h.bf16 %v9300_v3 }
 0x7b5   :  { %4225 = vmatprep.subr.bf16.mxu0 %v9753_v51  ;;  %4268 = vmatprep.subr.bf16.mxu1 %v9755_v52 }
 0x7b8   :  { %4226 = vmatpush1.bf16.msra.mxu0 %v9759_v53  ;;  %4269 = vmatpush1.bf16.msra.mxu1 %v9761_v54  ;;  %v2598_v54 = vunpack.c.l.bf16 %v9304_v14 }
 0x7b9   :  { %4227 = vmatprep.subr.bf16.mxu0 %v9765_v62  ;;  %4270 = vmatprep.subr.bf16.mxu1 %v9767_v63 }
 0x7bc   :  { %4228 = vmatpush1.bf16.msra.mxu0 %v9771_v6  ;;  %4271 = vmatpush1.bf16.msra.mxu1 %v9773_v13  ;;  %v2599_v6 = vunpack.c.h.bf16 %v9304_v14  ;;  %v2601_v13 = vunpack.c.h.bf16 %v9307_v4  ;;  %v2596_v14 = vunpack.c.l.bf16 %v9300_v3 }
 0x7bd   :  { %4229 = vmatprep.subr.bf16.mxu0 %v9777_v29  ;;  %4272 = vmatprep.subr.bf16.mxu1 %v9779_v28 }
 0x7c0   :  { %4230 = vmatpush1.bf16.msra.mxu0 %v9783_v57  ;;  %4273 = vmatpush1.bf16.msra.mxu1 %v9785_v17 }
 0x7c1   :  { %4529 = vmatprep.subr.bf16.mxu0 %v9925_v22  ;;  %4572 = vmatprep.subr.bf16.mxu1 %v9927_v30 }
 0x7c3   :  { %4248 = vmatmul.mubr.bf16.vlgmr.msra.gmra.mxu0 %v8255_v26  ;;  %4291 = vmatmul.mubr.bf16.vlgmr.msra.gmra.mxu1 %v8255_v26 }
 0x7c4   :  { %4530 = vmatpush1.bf16.msra.mxu0 %v9931_v7  ;;  %4573 = vmatpush1.bf16.msra.mxu1 %v9933_v56 }
 0x7c5   :  { %4531 = vmatprep.subr.bf16.mxu0 %v9937_v20  ;;  %4574 = vmatprep.subr.bf16.mxu1 %v9939_v11 }
 0x7c6   :  { %4561 = vmatprep.mubr.bf16.mxu0 %v11071_v8  ;;  %4604 = vmatprep.mubr.bf16.mxu1 %v11071_v8 }
 0x7c8   :  { %4532 = vmatpush1.bf16.msra.mxu0 %v9943_v19  ;;  %4575 = vmatpush1.bf16.msra.mxu1 %v9945_v9 }
 0x7c9   :  { %4533 = vmatprep.subr.bf16.mxu0 %v9949_v18  ;;  %4576 = vmatprep.subr.bf16.mxu1 %v9951_v5 }
 0x7cc   :  { %4534 = vmatpush1.bf16.msra.mxu0 %v9957_v61  ;;  %4577 = vmatpush1.bf16.msra.mxu1 %v9959_v55 }
 0x7cd   :  { %4535 = vmatprep.subr.bf16.mxu0 %v9963_v60  ;;  %4578 = vmatprep.subr.bf16.mxu1 %v9965_v23 }
 0x7d0   :  { %4536 = vmatpush1.bf16.msra.mxu0 %v9969_v16  ;;  %4579 = vmatpush1.bf16.msra.mxu1 %v9971_v0 }
 0x7d1   :  { %4537 = vmatprep.subr.bf16.mxu0 %v9975_v2  ;;  %4580 = vmatprep.subr.bf16.mxu1 %v9977_v24 }
 0x7d4   :  { %4538 = vmatpush1.bf16.msra.mxu0 %v9981_v27  ;;  %4581 = vmatpush1.bf16.msra.mxu1 %v9983_v31 }
 0x7d5   :  { %4539 = vmatprep.subr.bf16.mxu0 %v9987_v32  ;;  %4582 = vmatprep.subr.bf16.mxu1 %v9989_v33 }
 0x7d8   :  { %4540 = vmatpush1.bf16.msra.mxu0 %v9993_v34  ;;  %4583 = vmatpush1.bf16.msra.mxu1 %v9995_v25 }
 0x7d9   :  { %4541 = vmatprep.subr.bf16.mxu0 %v9999_v35  ;;  %4584 = vmatprep.subr.bf16.mxu1 %v10001_v36 }
 0x7dc   :  { %4542 = vmatpush1.bf16.msra.mxu0 %v10005_v37  ;;  %4585 = vmatpush1.bf16.msra.mxu1 %v10007_v38 }
 0x7dd   :  { %4543 = vmatprep.subr.bf16.mxu0 %v10011_v39  ;;  %4586 = vmatprep.subr.bf16.mxu1 %v10013_v40 }
 0x7e0   :  { %4544 = vmatpush1.bf16.msra.mxu0 %v10017_v41  ;;  %4587 = vmatpush1.bf16.msra.mxu1 %v10019_v42 }
 0x7e1   :  { %4843 = vmatprep.subr.bf16.mxu0 %v9925_v22  ;;  %4886 = vmatprep.subr.bf16.mxu1 %v9927_v30 }
 0x7e3   :  { %4562 = vmatmul.mubr.bf16.vlgmr.msra.gmra.mxu0 %v8304_v43  ;;  %4605 = vmatmul.mubr.bf16.vlgmr.msra.gmra.mxu1 %v8304_v43  ;;  %v2636_v45 = vpop.f32.mrf.mxu0  ;;  %v2679_v46 = vpop.f32.mrf.mxu1 }
 0x7e4   :  { %v2688_v47 = vadd.f32 %v2636_v45, %v2594_v44  ;;  %4844 = vmatpush1.bf16.msra.mxu0 %v9931_v7  ;;  %4887 = vmatpush1.bf16.msra.mxu1 %v9933_v56  ;;  %v2690_v10 = vadd.f32 %v2679_v46, %v2596_v14  ;;  %v10153_v14 = vld [vmem:[#allocation9 + $0xc0] ss:$16 sps:$4 sm:$0xff]  }
 0x7e5   :  { %v2638_v50 = vpop.f32.mrf.mxu0  ;;  %v2681_v51 = vpop.f32.mrf.mxu1  ;;  %4845 = vmatprep.subr.bf16.mxu0 %v9937_v20  ;;  %4888 = vmatprep.subr.bf16.mxu1 %v9939_v11 }
 0x7e6   :  { %8511 = vtanh.f32 %v2688_v47  ;;  %v2689_v52 = vadd.f32 %v2638_v50, %v2595_v48  ;;  %v2691_v53 = vadd.f32 %v2681_v51, %v2597_v49  ;;  %4875 = vmatprep.mubr.bf16.mxu0 %v11071_v8  ;;  %4918 = vmatprep.mubr.bf16.mxu1 %v11071_v8 }
 0x7e7   :  { %v2640_v62 = vpop.f32.mrf.mxu0  ;;  %v2683_v63 = vpop.f32.mrf.mxu1 }
 0x7e8   :  { %8513 = vtanh.f32 %v2689_v52  ;;  %v2692_v58 = vadd.f32 %v2640_v62, %v2598_v54  ;;  %4846 = vmatpush1.bf16.msra.mxu0 %v9943_v19  ;;  %4889 = vmatpush1.bf16.msra.mxu1 %v9945_v9  ;;  %v2694_v45 = vadd.f32 %v2683_v63, %v2600_v59  ;;  %v10158_v59 = vld [vmem:[#allocation9 + $0xc8] ss:$16 sps:$4 sm:$0xff]  }
 0x7e9   :  { %8515 = vtanh.f32 %v2691_v53  ;;  %v2642_v29 = vpop.f32.mrf.mxu0  ;;  %v2685_v28 = vpop.f32.mrf.mxu1  ;;  %4847 = vmatprep.subr.bf16.mxu0 %v9949_v18  ;;  %4890 = vmatprep.subr.bf16.mxu1 %v9951_v5 }
 0x7ea   :  { %8517 = vtanh.f32 %v2692_v58  ;;  %v2693_v57 = vadd.f32 %v2642_v29, %v2599_v6  ;;  %v2695_v17 = vadd.f32 %v2685_v28, %v2601_v13 }
 0x7ec   :  { %8519 = vtanh.f32 %v2693_v57  ;;  %4848 = vmatpush1.bf16.msra.mxu0 %v9957_v61  ;;  %4891 = vmatpush1.bf16.msra.mxu1 %v9959_v55 }
 0x7ed   :  { %4849 = vmatprep.subr.bf16.mxu0 %v9963_v60  ;;  %4892 = vmatprep.subr.bf16.mxu1 %v9965_v23  ;;  %8521 = vtanh.f32 %v2695_v17 }
 0x7ee   :  { %8523 = vtanh.f32 %v2690_v10 }
 0x7ef   :  { %8525 = vtanh.f32 %v2694_v45  ;;  %v10166_v45 = vld [vmem:[#allocation9 + $0xac] ss:$16 sps:$4 sm:$0xff]  }
 0x7f0   :  { %4850 = vmatpush1.bf16.msra.mxu0 %v9969_v16  ;;  %4893 = vmatpush1.bf16.msra.mxu1 %v9971_v0 }
 0x7f1   :  { %4851 = vmatprep.subr.bf16.mxu0 %v9975_v2  ;;  %4894 = vmatprep.subr.bf16.mxu1 %v9977_v24 }
 0x7f3   :  { %v8512_v12 = vpop.eup %8511 }
 0x7f4   :  { %v2704_v1 = vmul.f32 0.5, %v8512_v12  ;;  %4852 = vmatpush1.bf16.msra.mxu0 %v9981_v27  ;;  %4895 = vmatpush1.bf16.msra.mxu1 %v9983_v31 }
 0x7f5   :  { %v8514_v26 = vpop.eup %8513  ;;  %4853 = vmatprep.subr.bf16.mxu0 %v9987_v32  ;;  %4896 = vmatprep.subr.bf16.mxu1 %v9989_v33 }
 0x7f6   :  { %v8516_v3 = vpop.eup %8515  ;;  %v2710_v43 = vadd.f32 0.5, %v2704_v1  ;;  %v2705_v44 = vmul.f32 0.5, %v8514_v26  ;;  %v10160_v26 = vld [vmem:[#allocation9 + $0xa4] ss:$16 sps:$4 sm:$0xff]  }
 0x7f7   :  { %v8518_v47 = vpop.eup %8517 }
 0x7f8   :  { %v2711_v46 = vadd.f32 0.5, %v2705_v44  ;;  %v2718_v48 = vmul.f32 %v8516_v3, %v2710_v43  ;;  %v2707_v49 = vmul.f32 0.5, %v8518_v47  ;;  %4854 = vmatpush1.bf16.msra.mxu0 %v9993_v34  ;;  %4897 = vmatpush1.bf16.msra.mxu1 %v9995_v25 }
 0x7f9   :  { %v8520_v4 = vpop.eup %8519  ;;  %4855 = vmatprep.subr.bf16.mxu0 %v9999_v35  ;;  %4898 = vmatprep.subr.bf16.mxu1 %v10001_v36 }
 0x7fa   :  { %v2716_v50 = vmul.f32 %v2711_v46, %v9692_v15  ;;  %v2713_v51 = vadd.f32 0.5, %v2707_v49  ;;  %v2708_v52 = vmul.f32 0.5, %v8520_v4  ;;  %v8522_v53 = vpop.eup %8521  ;;  %v8305_v15 = vld [vmem:[#allocation2 + $0x30] sm:$0xff]  }
 0x7fb   :  { %v8524_v13 = vpop.eup %8523  ;;  %v10175_v4 = vld [vmem:[#allocation9 + $0xa0] ss:$16 sps:$4 sm:$0xff]  }
 0x7fc   :  { %v2720_v54 = vadd.f32 %v2718_v48, %v2716_v50  ;;  %v2714_v62 = vadd.f32 0.5, %v2708_v52  ;;  %v2719_v63 = vmul.f32 %v8522_v53, %v2713_v51  ;;  %4856 = vmatpush1.bf16.msra.mxu0 %v10005_v37  ;;  %4899 = vmatpush1.bf16.msra.mxu1 %v10007_v38  ;;  %v10179_v52 = vld [vmem:[#allocation9 + $0xa8] ss:$16 sps:$4 sm:$0xff]   ;;  %v10181_v53 = vld [vmem:[#allocation9 + $0x84] ss:$16 sps:$4 sm:$0xff]  }
 0x7fd   :  { %4857 = vmatprep.subr.bf16.mxu0 %v10011_v39  ;;  %4900 = vmatprep.subr.bf16.mxu1 %v10013_v40 }
 0x7fe   :  { %8527 = vtanh.f32 %v2720_v54  ;;  %v2717_v58 = vmul.f32 %v2714_v62, %v9696_v21  ;;  %v2706_v21 = vmul.f32 0.5, %v8524_v13 }
 0x800   :  { %v2721_v6 = vadd.f32 %v2719_v63, %v2717_v58  ;;  %4858 = vmatpush1.bf16.msra.mxu0 %v10017_v41  ;;  %4901 = vmatpush1.bf16.msra.mxu1 %v10019_v42 }
 0x801   :  { %5157 = vmatprep.subr.bf16.mxu0 %v9925_v22  ;;  %5200 = vmatprep.subr.bf16.mxu1 %v9927_v30  ;;  %v8526_v22 = vpop.eup %8525  ;;  %v2712_v30 = vadd.f32 0.5, %v2706_v21  ;;  %v10195_v21 = vld [vmem:[#allocation9 + $0x80] ss:$16 sps:$4 sm:$0xff]  }
 0x802   :  { %8529 = vtanh.f32 %v2721_v6  ;;  %v10188_v6 = vld [vmem:[#allocation9 + $0x8c] ss:$16 sps:$4 sm:$0xff]  }
 0x803   :  { %4876 = vmatmul.mubr.bf16.vlgmr.msra.gmra.mxu0 %v8305_v15  ;;  %4919 = vmatmul.mubr.bf16.vlgmr.msra.gmra.mxu1 %v8305_v15 }
 0x804   :  { %5158 = vmatpush1.bf16.msra.mxu0 %v9931_v7  ;;  %5201 = vmatpush1.bf16.msra.mxu1 %v9933_v56  ;;  %v2709_v7 = vmul.f32 0.5, %v8526_v22  ;;  %v10199_v22 = vld [vmem:[#allocation9 + $0x88] ss:$16 sps:$4 sm:$0xff]  }
 0x805   :  { %5159 = vmatprep.subr.bf16.mxu0 %v9937_v20  ;;  %5202 = vmatprep.subr.bf16.mxu1 %v9939_v11 }
 0x806   :  { %5189 = vmatprep.mubr.bf16.mxu0 %v11071_v8  ;;  %5232 = vmatprep.mubr.bf16.mxu1 %v11071_v8  ;;  %v2715_v11 = vadd.f32 0.5, %v2709_v7  ;;  %v10204_v7 = vld [vmem:[#allocation9 + $0x6c] ss:$16 sps:$4 sm:$0xff]  }
 0x808   :  { %5160 = vmatpush1.bf16.msra.mxu0 %v9943_v19  ;;  %5203 = vmatpush1.bf16.msra.mxu1 %v9945_v9 }
 0x809   :  { %5161 = vmatprep.subr.bf16.mxu0 %v9949_v18  ;;  %5204 = vmatprep.subr.bf16.mxu1 %v9951_v5  ;;  %v10090_v18 = vpop.f32.mrf.mxu0  ;;  %v10092_v5 = vpop.f32.mrf.mxu1 }
 0x80b   :  { %v8528_v56 = vpop.eup %8527 }
 0x80c   :  { %v2724_v20 = vmul.f32 %v8528_v56, %v2712_v30  ;;  %5162 = vmatpush1.bf16.msra.mxu0 %v9957_v61  ;;  %5205 = vmatpush1.bf16.msra.mxu1 %v9959_v55  ;;  %v10098_v61 = vpop.f32.mrf.mxu0  ;;  %v10100_v55 = vpop.f32.mrf.mxu1  ;;  %v10201_v30 = vld [vmem:[#allocation9 + $0x64] ss:$16 sps:$4 sm:$0xff]   ;;  %v10207_v56 = vld [vmem:[#allocation9 + $0x60] ss:$16 sps:$4 sm:$0xff]  }
 0x80d   :  { %5163 = vmatprep.subr.bf16.mxu0 %v9963_v60  ;;  %5206 = vmatprep.subr.bf16.mxu1 %v9965_v23 }
 0x80e   :  { %v10106_v60 = vpop.f32.mrf.mxu0  ;;  %v10108_v23 = vpop.f32.mrf.mxu1 }
 0x80f   :  { %v8530_v19 = vpop.eup %8529 }
 0x810   :  { %v2725_v29 = vmul.f32 %v8530_v19, %v2715_v11  ;;  %5164 = vmatpush1.bf16.msra.mxu0 %v9969_v16  ;;  %5207 = vmatpush1.bf16.msra.mxu1 %v9971_v0  ;;  %v10112_v16 = vld [vmem:[#allocation9 + $0xe4] ss:$16 sps:$4 sm:$0xff]   ;;  %v10115_v0 = vld [vmem:[#allocation9 + $0xec] ss:$16 sps:$4 sm:$0xff]  }
 0x811   :  { %5165 = vmatprep.subr.bf16.mxu0 %v9975_v2  ;;  %5208 = vmatprep.subr.bf16.mxu1 %v9977_v24  ;;  %v2737_v2 = vld [vmem:[%s10994_s6] sm:$0xf]  ;;  %v10213_v11 = vld [vmem:[#allocation9 + $0x44] ss:$16 sps:$4 sm:$0xff]   ;;  %v10216_v19 = vld [vmem:[#allocation9 + $0x4c] ss:$16 sps:$4 sm:$0xff]  }
 0x812   :  { %v7860_v9 = vpack.c.bf16 %v2725_v29, %v2724_v20  ;;  %v10121_v24 = vld [vmem:[#allocation9 + $0xe0] ss:$16 sps:$4 sm:$0xff]   ;;  %v10211_v20 = vld [vmem:[#allocation9 + $0x68] ss:$16 sps:$4 sm:$0xff]  }
 0x813   :  { %v10219_v29 = vld [vmem:[#allocation9 + $0x40] ss:$16 sps:$4 sm:$0xff]  }
 0x814   :  { %7861 = vst [vmem:[#allocation2 + $0x38] sm:$0xff] %v7860_v9   ;;  %5166 = vmatpush1.bf16.msra.mxu0 %v9981_v27  ;;  %5209 = vmatpush1.bf16.msra.mxu1 %v9983_v31  ;;  %v10123_v27 = vpop.f32.mrf.mxu0  ;;  %v10125_v31 = vpop.f32.mrf.mxu1  ;;  %v10223_v9 = vld [vmem:[#allocation9 + $0x48] ss:$16 sps:$4 sm:$0xff]  }
 0x815   :  { %5167 = vmatprep.subr.bf16.mxu0 %v9987_v32  ;;  %5210 = vmatprep.subr.bf16.mxu1 %v9989_v33  ;;  %v10129_v33 = vld [vmem:[#allocation9 + $0xe8] ss:$16 sps:$4 sm:$0xff]  }
 0x818   :  { %5168 = vmatpush1.bf16.msra.mxu0 %v9993_v34  ;;  %5211 = vmatpush1.bf16.msra.mxu1 %v9995_v25  ;;  %v10131_v34 = vld [vmem:[#allocation9 + $0xc4] ss:$16 sps:$4 sm:$0xff]   ;;  %v10134_v25 = vld [vmem:[#allocation9 + $0xcc] ss:$16 sps:$4 sm:$0xff]  }
 0x819   :  { %5169 = vmatprep.subr.bf16.mxu0 %v9999_v35  ;;  %5212 = vmatprep.subr.bf16.mxu1 %v10001_v36  ;;  %v11093_v35 = vld [vmem:[#allocation14_spill] sm:$0xff] }
 0x81a   :  { %v11094_v36 = vsub.s32 0, %v11093_v35  ;;  %v11097_v57 = vsub.s32 3, %v11093_v35 }
 0x81b   :  { %v8306_v32 = vld [vmem:[#allocation2 + $0x38] sm:$0xff]  }
 0x81c   :  { %5170 = vmatpush1.bf16.msra.mxu0 %v10005_v37  ;;  %5213 = vmatpush1.bf16.msra.mxu1 %v10007_v38  ;;  %v10138_v37 = vrot.slane %v2737_v2, %v11094_v36  ;;  %v10150_v17 = vrot.slane %v2737_v2, %v11097_v57  ;;  %v10235_v36 = vld [vmem:[#allocation9 + $0x28] ss:$16 sps:$4 sm:$0xff]  }
 0x81d   :  { %5171 = vmatprep.subr.bf16.mxu0 %v10011_v39  ;;  %5214 = vmatprep.subr.bf16.mxu1 %v10013_v40  ;;  %v11095_v40 = vsub.s32 2, %v11093_v35 }
 0x820   :  { %5172 = vmatpush1.bf16.msra.mxu0 %v10017_v41  ;;  %5215 = vmatpush1.bf16.msra.mxu1 %v10019_v42  ;;  %v10142_v41 = vrot.slane %v2737_v2, %v11095_v40  ;;  %v11096_v42 = vsub.s32 1, %v11093_v35  ;;  %v10231_v35 = vld [vmem:[#allocation9 + $0x20] ss:$16 sps:$4 sm:$0xff]  }
 0x821   :  { %5475 = vmatprep.subr.bf16.mxu0 %v10112_v16  ;;  %5518 = vmatprep.subr.bf16.mxu1 %v10115_v0  ;;  %v10243_v40 = vld [vmem:[#allocation9] ss:$16 sps:$4 sm:$0xff]  }
 0x822   :  { %v10146_v28 = vrot.slane %v2737_v2, %v11096_v42  ;;  %v10225_v2 = vld [vmem:[#allocation9 + $0x24] ss:$16 sps:$4 sm:$0xff]   ;;  %v10247_v42 = vld [vmem:[#allocation9 + $0x8] ss:$16 sps:$4 sm:$0xff]  }
 0x823   :  { %v3307_v38 = vpop.f32.mrf.mxu0  ;;  %v3350_v39 = vpop.f32.mrf.mxu1  ;;  %5190 = vmatmul.mubr.bf16.vlgmr.msra.gmra.mxu0 %v8306_v32  ;;  %5233 = vmatmul.mubr.bf16.vlgmr.msra.gmra.mxu1 %v8306_v32  ;;  %v10228_v32 = vld [vmem:[#allocation9 + $0x2c] ss:$16 sps:$4 sm:$0xff]  }
 0x824   :  { %5476 = vmatpush1.bf16.msra.mxu0 %v10121_v24  ;;  %v3308_v10 = vadd.f32 %v3307_v38, %v10138_v37  ;;  %5519 = vmatpush1.bf16.msra.mxu1 %v10129_v33  ;;  %v3351_v3 = vadd.f32 %v3350_v39, %v10142_v41  ;;  %v10237_v38 = vld [vmem:[#allocation9 + $0x4] ss:$16 sps:$4 sm:$0xff]   ;;  %v10240_v39 = vld [vmem:[#allocation9 + $0xc] ss:$16 sps:$4 sm:$0xff]  }
 0x825   :  { %v3309_v12 = vpop.f32.mrf.mxu0  ;;  %v3352_v1 = vpop.f32.mrf.mxu1  ;;  %5477 = vmatprep.subr.bf16.mxu0 %v10131_v34  ;;  %5520 = vmatprep.subr.bf16.mxu1 %v10134_v25 }
 0x826   :  { %v3310_v43 = vadd.f32 %v3309_v12, %v10146_v28  ;;  %v3353_v44 = vadd.f32 %v3352_v1, %v10150_v17  ;;  %5507 = vmatprep.mubr.bf16.mxu0 %v11071_v8  ;;  %5550 = vmatprep.mubr.bf16.mxu1 %v11071_v8 }
 0x827   :  { %v3311_v47 = vpop.f32.mrf.mxu0  ;;  %v3354_v46 = vpop.f32.mrf.mxu1 }
 0x828   :  { %v10170_v48 = vpack.c.bf16 %v3310_v43, %v3308_v10  ;;  %v10172_v49 = vpack.c.bf16 %v3353_v44, %v3351_v3  ;;  %5478 = vmatpush1.bf16.msra.mxu0 %v10153_v14  ;;  %5521 = vmatpush1.bf16.msra.mxu1 %v10158_v59  ;;  %v3312_v54 = vadd.f32 %v3311_v47, %v10138_v37 }
 0x829   :  { %v3313_v50 = vpop.f32.mrf.mxu0  ;;  %v3356_v51 = vpop.f32.mrf.mxu1  ;;  %5479 = vmatprep.subr.bf16.mxu0 %v10160_v26  ;;  %v3355_v62 = vadd.f32 %v3354_v46, %v10142_v41  ;;  %5522 = vmatprep.subr.bf16.mxu1 %v10166_v45 }
 0x82a   :  { %11098 = vst [vmem:[#allocation15_spill] sm:$0xff] %v10172_v49  ;;  %v3314_v63 = vadd.f32 %v3313_v50, %v10146_v28  ;;  %v3357_v58 = vadd.f32 %v3356_v51, %v10150_v17 }
 0x82c   :  { %v10190_v15 = vpack.c.bf16 %v3314_v63, %v3312_v54  ;;  %v10192_v13 = vpack.c.bf16 %v3357_v58, %v3355_v62  ;;  %5480 = vmatpush1.bf16.msra.mxu0 %v10175_v4  ;;  %5523 = vmatpush1.bf16.msra.mxu1 %v10179_v52 }
 0x82d   :  { %5481 = vmatprep.subr.bf16.mxu0 %v10181_v53  ;;  %5524 = vmatprep.subr.bf16.mxu1 %v10188_v6 }
 0x82e   :  { %11099 = vst [vmem:[#allocation16_spill] sm:$0xff] %v10190_v15  ;;  %11100 = vst [vmem:[#allocation17_spill] sm:$0xff] %v10192_v13 }
 0x830   :  { %5482 = vmatpush1.bf16.msra.mxu0 %v10195_v21  ;;  %5525 = vmatpush1.bf16.msra.mxu1 %v10199_v22 }
 0x831   :  { %5483 = vmatprep.subr.bf16.mxu0 %v10201_v30  ;;  %5526 = vmatprep.subr.bf16.mxu1 %v10204_v7 }
 0x834   :  { %5484 = vmatpush1.bf16.msra.mxu0 %v10207_v56  ;;  %5527 = vmatpush1.bf16.msra.mxu1 %v10211_v20 }
 0x835   :  { %5485 = vmatprep.subr.bf16.mxu0 %v10213_v11  ;;  %5528 = vmatprep.subr.bf16.mxu1 %v10216_v19 }
 0x838   :  { %5486 = vmatpush1.bf16.msra.mxu0 %v10219_v29  ;;  %5529 = vmatpush1.bf16.msra.mxu1 %v10223_v9 }
 0x839   :  { %5487 = vmatprep.subr.bf16.mxu0 %v10225_v2  ;;  %5530 = vmatprep.subr.bf16.mxu1 %v10228_v32 }
 0x83c   :  { %5488 = vmatpush1.bf16.msra.mxu0 %v10231_v35  ;;  %5531 = vmatpush1.bf16.msra.mxu1 %v10235_v36 }
 0x83d   :  { %5489 = vmatprep.subr.bf16.mxu0 %v10237_v38  ;;  %5532 = vmatprep.subr.bf16.mxu1 %v10240_v39 }
 0x840   :  { %5490 = vmatpush1.bf16.msra.mxu0 %v10243_v40  ;;  %5533 = vmatpush1.bf16.msra.mxu1 %v10247_v42 }
 0x841   :  { %5621 = vmatprep.subr.bf16.mxu0 %v10112_v16  ;;  %5664 = vmatprep.subr.bf16.mxu1 %v10115_v0 }
 0x843   :  { %v3621_v57 = vpop.f32.mrf.mxu0  ;;  %v3664_v10 = vpop.f32.mrf.mxu1  ;;  %5508 = vmatmul.mubr.bf16.vlgmr.msra.gmra.mxu0 %v11071_v8  ;;  %5551 = vmatmul.mubr.bf16.vlgmr.msra.gmra.mxu1 %v11071_v8 }
 0x844   :  { %5622 = vmatpush1.bf16.msra.mxu0 %v10121_v24  ;;  %v3622_v12 = vadd.f32 %v3621_v57, %v10138_v37  ;;  %5665 = vmatpush1.bf16.msra.mxu1 %v10129_v33  ;;  %v3665_v43 = vadd.f32 %v3664_v10, %v10142_v41 }
 0x845   :  { %v3623_v1 = vpop.f32.mrf.mxu0  ;;  %v3666_v3 = vpop.f32.mrf.mxu1  ;;  %5623 = vmatprep.subr.bf16.mxu0 %v10131_v34  ;;  %5666 = vmatprep.subr.bf16.mxu1 %v10134_v25 }
 0x846   :  { %v3624_v44 = vadd.f32 %v3623_v1, %v10146_v28  ;;  %v3667_v47 = vadd.f32 %v3666_v3, %v10150_v17  ;;  %5653 = vmatprep.mubr.bf16.mxu0 %v11071_v8  ;;  %5696 = vmatprep.mubr.bf16.mxu1 %v11071_v8 }
 0x847   :  { %v3625_v46 = vpop.f32.mrf.mxu0  ;;  %v3668_v50 = vpop.f32.mrf.mxu1 }
 0x848   :  { %v10266_v51 = vpack.c.bf16 %v3624_v44, %v3622_v12  ;;  %v10268_v54 = vpack.c.bf16 %v3667_v47, %v3665_v43  ;;  %5624 = vmatpush1.bf16.msra.mxu0 %v10153_v14  ;;  %5667 = vmatpush1.bf16.msra.mxu1 %v10158_v59  ;;  %v3626_v58 = vadd.f32 %v3625_v46, %v10138_v37 }
 0x849   :  { %v3627_v62 = vpop.f32.mrf.mxu0  ;;  %v3670_v63 = vpop.f32.mrf.mxu1  ;;  %5625 = vmatprep.subr.bf16.mxu0 %v10160_v26  ;;  %v3669_v57 = vadd.f32 %v3668_v50, %v10142_v41  ;;  %5668 = vmatprep.subr.bf16.mxu1 %v10166_v45 }
 0x84a   :  { %11101 = vst [vmem:[#allocation18_spill] sm:$0xff] %v10266_v51  ;;  %11102 = vst [vmem:[#allocation19_spill] sm:$0xff] %v10268_v54  ;;  %v3628_v10 = vadd.f32 %v3627_v62, %v10146_v28  ;;  %v3671_v1 = vadd.f32 %v3670_v63, %v10150_v17 }
 0x84c   :  { %v10278_v12 = vpack.c.bf16 %v3628_v10, %v3626_v58  ;;  %v10280_v3 = vpack.c.bf16 %v3671_v1, %v3669_v57  ;;  %5626 = vmatpush1.bf16.msra.mxu0 %v10175_v4  ;;  %5669 = vmatpush1.bf16.msra.mxu1 %v10179_v52 }
 0x84d   :  { %5627 = vmatprep.subr.bf16.mxu0 %v10181_v53  ;;  %5670 = vmatprep.subr.bf16.mxu1 %v10188_v6 }
 0x84e   :  { %11103 = vst [vmem:[#allocation20_spill] sm:$0xff] %v10278_v12  ;;  %11104 = vst [vmem:[#allocation21_spill] sm:$0xff] %v10280_v3 }
 0x850   :  { %5628 = vmatpush1.bf16.msra.mxu0 %v10195_v21  ;;  %5671 = vmatpush1.bf16.msra.mxu1 %v10199_v22 }
 0x851   :  { %5629 = vmatprep.subr.bf16.mxu0 %v10201_v30  ;;  %5672 = vmatprep.subr.bf16.mxu1 %v10204_v7 }
 0x854   :  { %5630 = vmatpush1.bf16.msra.mxu0 %v10207_v56  ;;  %5673 = vmatpush1.bf16.msra.mxu1 %v10211_v20 }
 0x855   :  { %5631 = vmatprep.subr.bf16.mxu0 %v10213_v11  ;;  %5674 = vmatprep.subr.bf16.mxu1 %v10216_v19 }
 0x858   :  { %5632 = vmatpush1.bf16.msra.mxu0 %v10219_v29  ;;  %5675 = vmatpush1.bf16.msra.mxu1 %v10223_v9 }
 0x859   :  { %5633 = vmatprep.subr.bf16.mxu0 %v10225_v2  ;;  %5676 = vmatprep.subr.bf16.mxu1 %v10228_v32 }
 0x85c   :  { %5634 = vmatpush1.bf16.msra.mxu0 %v10231_v35  ;;  %5677 = vmatpush1.bf16.msra.mxu1 %v10235_v36 }
 0x85d   :  { %5635 = vmatprep.subr.bf16.mxu0 %v10237_v38  ;;  %5678 = vmatprep.subr.bf16.mxu1 %v10240_v39 }
 0x860   :  { %5636 = vmatpush1.bf16.msra.mxu0 %v10243_v40  ;;  %5679 = vmatpush1.bf16.msra.mxu1 %v10247_v42 }
 0x861   :  { %5767 = vmatprep.subr.bf16.mxu0 %v10112_v16  ;;  %5810 = vmatprep.subr.bf16.mxu1 %v10115_v0 }
 0x863   :  { %v3935_v43 = vpop.f32.mrf.mxu0  ;;  %v3978_v44 = vpop.f32.mrf.mxu1 }
 0x864   :  { %v3936_v50 = vadd.f32 %v3935_v43, %v10138_v37  ;;  %v3979_v62 = vadd.f32 %v3978_v44, %v10142_v41 }
 0x865   :  { %v3937_v47 = vpop.f32.mrf.mxu0  ;;  %v3980_v46 = vpop.f32.mrf.mxu1 }
 0x866   :  { %v3938_v63 = vadd.f32 %v3937_v47, %v10146_v28  ;;  %v3981_v58 = vadd.f32 %v3980_v46, %v10150_v17 }
 0x867   :  { %v3939_v57 = vpop.f32.mrf.mxu0  ;;  %v3982_v10 = vpop.f32.mrf.mxu1 }
 0x868   :  { %v10310_v1 = vpack.c.bf16 %v3938_v63, %v3936_v50  ;;  %v10312_v3 = vpack.c.bf16 %v3981_v58, %v3979_v62  ;;  %v3940_v51 = vadd.f32 %v3939_v57, %v10138_v37  ;;  %v3983_v13 = vadd.f32 %v3982_v10, %v10142_v41 }
 0x869   :  { %v3941_v12 = vpop.f32.mrf.mxu0  ;;  %v3984_v54 = vpop.f32.mrf.mxu1 }
 0x86a   :  { %11105 = vst [vmem:[#allocation22_spill] sm:$0xff] %v10310_v1  ;;  %11106 = vst [vmem:[#allocation23_spill] sm:$0xff] %v10312_v3  ;;  %v3942_v43 = vadd.f32 %v3941_v12, %v10146_v28  ;;  %v3985_v44 = vadd.f32 %v3984_v54, %v10150_v17 }
 0x86c   :  { %v10318_v15 = vpack.c.bf16 %v3942_v43, %v3940_v51  ;;  %v10320_v47 = vpack.c.bf16 %v3985_v44, %v3983_v13 }
 0x86e   :  { %11107 = vst [vmem:[#allocation24_spill] sm:$0xff] %v10318_v15  ;;  %11108 = vst [vmem:[#allocation25_spill] sm:$0xff] %v10320_v47 }
 0x883   :  { %v4249_v46 = vpop.f32.mrf.mxu0  ;;  %v4292_v49 = vpop.f32.mrf.mxu1 }
 0x884   :  { %v4250_v62 = vadd.f32 %v4249_v46, %v10138_v37  ;;  %v4293_v58 = vadd.f32 %v4292_v49, %v10142_v41 }
 0x885   :  { %v4251_v50 = vpop.f32.mrf.mxu0  ;;  %v4294_v63 = vpop.f32.mrf.mxu1 }
 0x886   :  { %v4252_v57 = vadd.f32 %v4251_v50, %v10146_v28  ;;  %v4295_v10 = vadd.f32 %v4294_v63, %v10150_v17 }
 0x887   :  { %v4253_v3 = vpop.f32.mrf.mxu0  ;;  %v4296_v12 = vpop.f32.mrf.mxu1 }
 0x888   :  { %v10326_v1 = vpack.c.bf16 %v4252_v57, %v4250_v62  ;;  %v10328_v51 = vpack.c.bf16 %v4295_v10, %v4293_v58  ;;  %v4254_v43 = vadd.f32 %v4253_v3, %v10138_v37  ;;  %v4297_v44 = vadd.f32 %v4296_v12, %v10142_v41 }
 0x889   :  { %v4255_v13 = vpop.f32.mrf.mxu0  ;;  %v4298_v54 = vpop.f32.mrf.mxu1 }
 0x88a   :  { %11109 = vst [vmem:[#allocation26_spill] sm:$0xff] %v10326_v1  ;;  %11110 = vst [vmem:[#allocation27_spill] sm:$0xff] %v10328_v51  ;;  %v4256_v46 = vadd.f32 %v4255_v13, %v10146_v28  ;;  %v4299_v49 = vadd.f32 %v4298_v54, %v10150_v17 }
 0x88c   :  { %v10334_v47 = vpack.c.bf16 %v4256_v46, %v4254_v43  ;;  %v10336_v50 = vpack.c.bf16 %v4299_v49, %v4297_v44 }
 0x88e   :  { %11111 = vst [vmem:[#allocation28_spill] sm:$0xff] %v10334_v47  ;;  %11112 = vst [vmem:[#allocation29_spill] sm:$0xff] %v10336_v50 }
 0x8a3   :  { %v4563_v63 = vpop.f32.mrf.mxu0  ;;  %v4606_v15 = vpop.f32.mrf.mxu1 }
 0x8a4   :  { %v4564_v58 = vadd.f32 %v4563_v63, %v10138_v37  ;;  %v4607_v10 = vadd.f32 %v4606_v15, %v10142_v41 }
 0x8a5   :  { %v4565_v62 = vpop.f32.mrf.mxu0  ;;  %v4608_v57 = vpop.f32.mrf.mxu1 }
 0x8a6   :  { %v4566_v3 = vadd.f32 %v4565_v62, %v10146_v28  ;;  %v4609_v12 = vadd.f32 %v4608_v57, %v10150_v17 }
 0x8a7   :  { %v4567_v51 = vpop.f32.mrf.mxu0  ;;  %v4610_v13 = vpop.f32.mrf.mxu1 }
 0x8a8   :  { %v10342_v1 = vpack.c.bf16 %v4566_v3, %v4564_v58  ;;  %v10344_v54 = vpack.c.bf16 %v4609_v12, %v4607_v10  ;;  %v4568_v46 = vadd.f32 %v4567_v51, %v10138_v37  ;;  %v4611_v49 = vadd.f32 %v4610_v13, %v10142_v41 }
 0x8a9   :  { %v4569_v43 = vpop.f32.mrf.mxu0  ;;  %v4612_v44 = vpop.f32.mrf.mxu1 }
 0x8aa   :  { %11113 = vst [vmem:[#allocation30_spill] sm:$0xff] %v10342_v1  ;;  %11114 = vst [vmem:[#allocation31_spill] sm:$0xff] %v10344_v54  ;;  %v4570_v63 = vadd.f32 %v4569_v43, %v10146_v28  ;;  %v4613_v15 = vadd.f32 %v4612_v44, %v10150_v17 }
 0x8ac   :  { %v10350_v50 = vpack.c.bf16 %v4570_v63, %v4568_v46  ;;  %v10352_v62 = vpack.c.bf16 %v4613_v15, %v4611_v49 }
 0x8ae   :  { %11115 = vst [vmem:[#allocation32_spill] sm:$0xff] %v10350_v50  ;;  %11116 = vst [vmem:[#allocation33_spill] sm:$0xff] %v10352_v62 }
 0x8c3   :  { %v4877_v57 = vpop.f32.mrf.mxu0  ;;  %v4920_v47 = vpop.f32.mrf.mxu1 }
 0x8c4   :  { %v4878_v10 = vadd.f32 %v4877_v57, %v10138_v37  ;;  %v4921_v12 = vadd.f32 %v4920_v47, %v10142_v41 }
 0x8c5   :  { %v4879_v58 = vpop.f32.mrf.mxu0  ;;  %v4922_v3 = vpop.f32.mrf.mxu1 }
 0x8c6   :  { %v4880_v51 = vadd.f32 %v4879_v58, %v10146_v28  ;;  %v4923_v13 = vadd.f32 %v4922_v3, %v10150_v17 }
 0x8c7   :  { %v4881_v54 = vpop.f32.mrf.mxu0  ;;  %v4924_v43 = vpop.f32.mrf.mxu1 }
 0x8c8   :  { %v10358_v1 = vpack.c.bf16 %v4880_v51, %v4878_v10  ;;  %v10360_v44 = vpack.c.bf16 %v4923_v13, %v4921_v12  ;;  %v4882_v63 = vadd.f32 %v4881_v54, %v10138_v37  ;;  %v4925_v15 = vadd.f32 %v4924_v43, %v10142_v41 }
 0x8c9   :  { %v4883_v46 = vpop.f32.mrf.mxu0  ;;  %v4926_v49 = vpop.f32.mrf.mxu1 }
 0x8ca   :  { %11117 = vst [vmem:[#allocation34_spill] sm:$0xff] %v10360_v44  ;;  %v4884_v57 = vadd.f32 %v4883_v46, %v10146_v28  ;;  %v4927_v47 = vadd.f32 %v4926_v49, %v10150_v17 }
 0x8cc   :  { %v10366_v62 = vpack.c.bf16 %v4884_v57, %v4882_v63  ;;  %v10368_v58 = vpack.c.bf16 %v4927_v47, %v4925_v15 }
 0x8ce   :  { %11118 = vst [vmem:[#allocation35_spill] sm:$0xff] %v10366_v62  ;;  %11119 = vst [vmem:[#allocation14_spill] sm:$0xff] %v10368_v58 }
 0x8e3   :  { %v5191_v3 = vpop.f32.mrf.mxu0  ;;  %v5234_v50 = vpop.f32.mrf.mxu1 }
 0x8e4   :  { %v5192_v12 = vadd.f32 %v5191_v3, %v10138_v37  ;;  %v5235_v54 = vadd.f32 %v5234_v50, %v10142_v41 }
 0x8e5   :  { %v5193_v10 = vpop.f32.mrf.mxu0  ;;  %v5236_v13 = vpop.f32.mrf.mxu1 }
 0x8e6   :  { %v5194_v51 = vadd.f32 %v5193_v10, %v10146_v28  ;;  %v5237_v43 = vadd.f32 %v5236_v13, %v10150_v17 }
 0x8e7   :  { %v5195_v44 = vpop.f32.mrf.mxu0  ;;  %v5238_v49 = vpop.f32.mrf.mxu1 }
 0x8e8   :  { %v10374_v46 = vpack.c.bf16 %v5194_v51, %v5192_v12  ;;  %v10376_v63 = vpack.c.bf16 %v5237_v43, %v5235_v54  ;;  %v5196_v57 = vadd.f32 %v5195_v44, %v10138_v37  ;;  %v5239_v3 = vadd.f32 %v5238_v49, %v10142_v41 }
 0x8e9   :  { %v5197_v15 = vpop.f32.mrf.mxu0  ;;  %v5240_v58 = vpop.f32.mrf.mxu1  ;;  %v2996_v12 = vadd.f32 %v10098_v61, %v10146_v28  ;;  %v2994_v51 = vadd.f32 %v10090_v18, %v10138_v37  ;;  %v3039_v44 = vadd.f32 %v10100_v55, %v10150_v17  ;;  %v3000_v54 = vadd.f32 %v10123_v27, %v10146_v28 }
 0x8ea   :  { %v5198_v47 = vadd.f32 %v5197_v15, %v10146_v28  ;;  %v5241_v10 = vadd.f32 %v5240_v58, %v10150_v17  ;;  %v3037_v58 = vadd.f32 %v10092_v5, %v10142_v41  ;;  %v2998_v43 = vadd.f32 %v10106_v60, %v10138_v37 }
 0x8eb   :  { %v7758_v13 = vpack.c.bf16 %v2996_v12, %v2994_v51  ;;  %v3043_v61 = vadd.f32 %v10125_v31, %v10150_v17  ;;  %v3041_v55 = vadd.f32 %v10108_v23, %v10142_v41 }
 0x8ec   :  { %v10382_v62 = vpack.c.bf16 %v5198_v47, %v5196_v57  ;;  %v10384_v50 = vpack.c.bf16 %v5241_v10, %v5239_v3  ;;  %v7759_v49 = vpack.c.bf16 %v3039_v44, %v3037_v58  ;;  %v7760_v15 = vpack.c.bf16 %v3000_v54, %v2998_v43 }
 0x8ed   :  { %v5307_v57 = vunpack.c.l.bf16 %v7758_v13  ;;  %v5308_v10 = vunpack.c.h.bf16 %v7758_v13  ;;  %v7761_v12 = vpack.c.bf16 %v3043_v61, %v3041_v55 }
 0x8ee   :  { %v5310_v28 = vunpack.c.h.bf16 %v7759_v49  ;;  %v5311_v60 = vunpack.c.l.bf16 %v7760_v15  ;;  %v5312_v17 = vunpack.c.h.bf16 %v7760_v15 }
 0x8ef   :  { %v5314_v41 = vunpack.c.h.bf16 %v7761_v12  ;;  %v5313_v55 = vunpack.c.l.bf16 %v7761_v12 }
 0x903   :  { %v5509_v18 = vpop.f32.mrf.mxu0  ;;  %v5552_v3 = vpop.f32.mrf.mxu1 }
 0x904   :  { %v5561_v47 = vadd.f32 %v5509_v18, %v5307_v57  ;;  %v5309_v57 = vunpack.c.l.bf16 %v7759_v49 }
 0x905   :  { %v5511_v27 = vpop.f32.mrf.mxu0  ;;  %v5554_v51 = vpop.f32.mrf.mxu1 }
 0x906   :  { %8531 = vtanh.f32 %v5561_v47  ;;  %v5562_v5 = vadd.f32 %v5511_v27, %v5308_v10  ;;  %v5564_v37 = vadd.f32 %v5554_v51, %v5310_v28  ;;  %v5563_v10 = vadd.f32 %v5552_v3, %v5309_v57 }
 0x907   :  { %v5513_v44 = vpop.f32.mrf.mxu0  ;;  %v5556_v31 = vpop.f32.mrf.mxu1 }
 0x908   :  { %8533 = vtanh.f32 %v5562_v5  ;;  %v5565_v54 = vadd.f32 %v5513_v44, %v5311_v60  ;;  %v5567_v51 = vadd.f32 %v5556_v31, %v5313_v55 }
 0x909   :  { %8535 = vtanh.f32 %v5564_v37  ;;  %v5515_v58 = vpop.f32.mrf.mxu0  ;;  %v5558_v43 = vpop.f32.mrf.mxu1 }
 0x90a   :  { %8537 = vtanh.f32 %v5565_v54  ;;  %v5566_v23 = vadd.f32 %v5515_v58, %v5312_v17  ;;  %v5568_v13 = vadd.f32 %v5558_v43, %v5314_v41 }
 0x90c   :  { %8539 = vtanh.f32 %v5566_v23 }
 0x90d   :  { %8541 = vtanh.f32 %v5568_v13 }
 0x90e   :  { %8543 = vtanh.f32 %v5563_v10 }
 0x90f   :  { %8545 = vtanh.f32 %v5567_v51 }
 0x913   :  { %v8532_v61 = vpop.eup %8531 }
 0x914   :  { %v5577_v18 = vmul.f32 0.5, %v8532_v61 }
 0x915   :  { %v8534_v47 = vpop.eup %8533 }
 0x916   :  { %v8536_v27 = vpop.eup %8535  ;;  %v5583_v28 = vadd.f32 0.5, %v5577_v18  ;;  %v5578_v5 = vmul.f32 0.5, %v8534_v47 }
 0x917   :  { %v8538_v15 = vpop.eup %8537 }
 0x918   :  { %v5584_v60 = vadd.f32 0.5, %v5578_v5  ;;  %v5591_v37 = vmul.f32 %v8536_v27, %v5583_v28  ;;  %v5580_v44 = vmul.f32 0.5, %v8538_v15  ;;  %v5613_v15 = vunpack.c.l.bf16 %v10170_v48 }
 0x919   :  { %v8540_v54 = vpop.eup %8539 }
 0x91a   :  { %v5589_v17 = vmul.f32 0.0, %v5584_v60  ;;  %v5586_v58 = vadd.f32 0.5, %v5580_v44  ;;  %v5581_v23 = vmul.f32 0.5, %v8540_v54  ;;  %v8542_v12 = vpop.eup %8541  ;;  %v5614_v54 = vunpack.c.h.bf16 %v10170_v48 }
 0x91b   :  { %v8544_v31 = vpop.eup %8543 }
 0x91c   :  { %v10402_v41 = vadd.f32 %v5591_v37, %v5589_v17  ;;  %v5587_v49 = vadd.f32 0.5, %v5581_v23  ;;  %v5592_v3 = vmul.f32 %v8542_v12, %v5586_v58  ;;  %v8546_v61 = vpop.eup %8545  ;;  %v5579_v57 = vmul.f32 0.5, %v8544_v31  ;;  %v11120_v17 = vld [vmem:[#allocation15_spill] sm:$0xff] }
 0x91d   :  { %v5582_v18 = vmul.f32 0.5, %v8546_v61  ;;  %v5616_v58 = vunpack.c.h.bf16 %v11120_v17 }
 0x91e   :  { %v5590_v43 = vmul.f32 0.0, %v5587_v49  ;;  %8547 = vtanh.f32 %v10402_v41  ;;  %v5585_v47 = vadd.f32 0.5, %v5579_v57 }
 0x91f   :  { %v5588_v10 = vadd.f32 0.5, %v5582_v18 }
 0x920   :  { %v10405_v13 = vadd.f32 %v5592_v3, %v5590_v43  ;;  %v11121_v3 = vld [vmem:[#allocation16_spill] sm:$0xff] }
 0x921   :  { %v5617_v31 = vunpack.c.l.bf16 %v11121_v3 }
 0x922   :  { %8549 = vtanh.f32 %v10405_v13 }
 0x92b   :  { %v8548_v55 = vpop.eup %8547 }
 0x92c   :  { %v5597_v28 = vmul.f32 %v8548_v55, %v5585_v47  ;;  %v5618_v55 = vunpack.c.h.bf16 %v11121_v3  ;;  %v11122_v47 = vld [vmem:[#allocation17_spill] sm:$0xff] }
 0x92f   :  { %v8550_v27 = vpop.eup %8549 }
 0x930   :  { %v5598_v5 = vmul.f32 %v8550_v27, %v5588_v10  ;;  %v5620_v10 = vunpack.c.h.bf16 %v11122_v47 }
 0x932   :  { %v5599_v51 = vpack.c.bf16 %v5598_v5, %v5597_v28 }
 0x934   :  { %7866 = vst [vmem:[#allocation2] sm:$0xff] %v5599_v51   ;;  %5654 = vmatmul.mubr.bf16.vlgmr.msra.gmra.mxu0 %v5599_v51  ;;  %5697 = vmatmul.mubr.bf16.vlgmr.msra.gmra.mxu1 %v5599_v51 }
 0x935   :  { %5768 = vmatpush1.bf16.msra.mxu0 %v10121_v24  ;;  %5811 = vmatpush1.bf16.msra.mxu1 %v10129_v33 }
 0x936   :  { %5769 = vmatprep.subr.bf16.mxu0 %v10131_v34  ;;  %5812 = vmatprep.subr.bf16.mxu1 %v10134_v25 }
 0x937   :  { %5799 = vmatprep.mubr.bf16.mxu0 %v11071_v8  ;;  %5842 = vmatprep.mubr.bf16.mxu1 %v11071_v8 }
 0x939   :  { %5770 = vmatpush1.bf16.msra.mxu0 %v10153_v14  ;;  %5813 = vmatpush1.bf16.msra.mxu1 %v10158_v59 }
 0x93a   :  { %5771 = vmatprep.subr.bf16.mxu0 %v10160_v26  ;;  %5814 = vmatprep.subr.bf16.mxu1 %v10166_v45 }
 0x93d   :  { %5772 = vmatpush1.bf16.msra.mxu0 %v10175_v4  ;;  %5815 = vmatpush1.bf16.msra.mxu1 %v10179_v52 }
 0x93e   :  { %5773 = vmatprep.subr.bf16.mxu0 %v10181_v53  ;;  %5816 = vmatprep.subr.bf16.mxu1 %v10188_v6 }
 0x941   :  { %5774 = vmatpush1.bf16.msra.mxu0 %v10195_v21  ;;  %5817 = vmatpush1.bf16.msra.mxu1 %v10199_v22 }
 0x942   :  { %5775 = vmatprep.subr.bf16.mxu0 %v10201_v30  ;;  %5818 = vmatprep.subr.bf16.mxu1 %v10204_v7 }
 0x945   :  { %5776 = vmatpush1.bf16.msra.mxu0 %v10207_v56  ;;  %5819 = vmatpush1.bf16.msra.mxu1 %v10211_v20 }
 0x946   :  { %5777 = vmatprep.subr.bf16.mxu0 %v10213_v11  ;;  %5820 = vmatprep.subr.bf16.mxu1 %v10216_v19 }
 0x949   :  { %5778 = vmatpush1.bf16.msra.mxu0 %v10219_v29  ;;  %5821 = vmatpush1.bf16.msra.mxu1 %v10223_v9 }
 0x94a   :  { %5779 = vmatprep.subr.bf16.mxu0 %v10225_v2  ;;  %5822 = vmatprep.subr.bf16.mxu1 %v10228_v32 }
 0x94d   :  { %5780 = vmatpush1.bf16.msra.mxu0 %v10231_v35  ;;  %5823 = vmatpush1.bf16.msra.mxu1 %v10235_v36 }
 0x94e   :  { %5781 = vmatprep.subr.bf16.mxu0 %v10237_v38  ;;  %5824 = vmatprep.subr.bf16.mxu1 %v10240_v39 }
 0x951   :  { %5782 = vmatpush1.bf16.msra.mxu0 %v10243_v40  ;;  %5825 = vmatpush1.bf16.msra.mxu1 %v10247_v42 }
 0x952   :  { %5913 = vmatprep.subr.bf16.mxu0 %v10112_v16  ;;  %5956 = vmatprep.subr.bf16.mxu1 %v10115_v0 }
 0x9f4   :  { %v5655_v60 = vpop.f32.mrf.mxu0  ;;  %v5698_v37 = vpop.f32.mrf.mxu1 }
 0x9f5   :  { %v5707_v44 = vadd.f32 %v5655_v60, %v5613_v15  ;;  %v5615_v15 = vunpack.c.l.bf16 %v11120_v17 }
 0x9f6   :  { %v5657_v23 = vpop.f32.mrf.mxu0  ;;  %v5700_v49 = vpop.f32.mrf.mxu1 }
 0x9f7   :  { %8551 = vtanh.f32 %v5707_v44  ;;  %v5708_v12 = vadd.f32 %v5657_v23, %v5614_v54  ;;  %v5710_v43 = vadd.f32 %v5700_v49, %v5616_v58  ;;  %v5619_v44 = vunpack.c.l.bf16 %v11122_v47 }
 0x9f8   :  { %v5659_v61 = vpop.f32.mrf.mxu0  ;;  %v5702_v57 = vpop.f32.mrf.mxu1  ;;  %v5709_v58 = vadd.f32 %v5698_v37, %v5615_v15 }
 0x9f9   :  { %8553 = vtanh.f32 %v5708_v12  ;;  %v5711_v18 = vadd.f32 %v5659_v61, %v5617_v31  ;;  %v5713_v3 = vadd.f32 %v5702_v57, %v5619_v44 }
 0x9fa   :  { %8555 = vtanh.f32 %v5710_v43  ;;  %v5661_v27 = vpop.f32.mrf.mxu0  ;;  %v5704_v48 = vpop.f32.mrf.mxu1 }
 0x9fb   :  { %8557 = vtanh.f32 %v5711_v18  ;;  %v5712_v28 = vadd.f32 %v5661_v27, %v5618_v55  ;;  %v5714_v5 = vadd.f32 %v5704_v48, %v5620_v10 }
 0x9fd   :  { %8559 = vtanh.f32 %v5712_v28 }
 0x9fe   :  { %8561 = vtanh.f32 %v5714_v5 }
 0x9ff   :  { %8563 = vtanh.f32 %v5709_v58 }
 0xa00   :  { %8565 = vtanh.f32 %v5713_v3 }
 0xa04   :  { %v8552_v51 = vpop.eup %8551 }
 0xa05   :  { %v5723_v60 = vmul.f32 0.5, %v8552_v51 }
 0xa06   :  { %v8554_v54 = vpop.eup %8553 }
 0xa07   :  { %v8556_v23 = vpop.eup %8555  ;;  %v5729_v49 = vadd.f32 0.5, %v5723_v60  ;;  %v5724_v12 = vmul.f32 0.5, %v8554_v54 }
 0xa08   :  { %v8558_v43 = vpop.eup %8557 }
 0xa09   :  { %v5730_v31 = vadd.f32 0.5, %v5724_v12  ;;  %v5737_v61 = vmul.f32 %v8556_v23, %v5729_v49  ;;  %v5726_v18 = vmul.f32 0.5, %v8558_v43 }
 0xa0a   :  { %v8560_v55 = vpop.eup %8559 }
 0xa0b   :  { %v5735_v10 = vmul.f32 %v5730_v31, %v10402_v41  ;;  %v5732_v27 = vadd.f32 0.5, %v5726_v18  ;;  %v5727_v17 = vmul.f32 0.5, %v8560_v55  ;;  %v8562_v48 = vpop.eup %8561 }
 0xa0c   :  { %v8564_v51 = vpop.eup %8563 }
 0xa0d   :  { %v10451_v28 = vadd.f32 %v5737_v61, %v5735_v10  ;;  %v5733_v47 = vadd.f32 0.5, %v5727_v17  ;;  %v5738_v37 = vmul.f32 %v8562_v48, %v5732_v27  ;;  %v8566_v15 = vpop.eup %8565  ;;  %v5725_v60 = vmul.f32 0.5, %v8564_v51  ;;  %v11125_v61 = vld [vmem:[#allocation20_spill] sm:$0xff]  ;;  %v11126_v27 = vld [vmem:[#allocation21_spill] sm:$0xff] }
 0xa0e   :  { %v5728_v41 = vmul.f32 0.5, %v8566_v15  ;;  %v5763_v18 = vunpack.c.l.bf16 %v11125_v61  ;;  %v5764_v10 = vunpack.c.h.bf16 %v11125_v61  ;;  %v5766_v17 = vunpack.c.h.bf16 %v11126_v27 }
 0xa0f   :  { %v5736_v5 = vmul.f32 %v5733_v47, %v10405_v13  ;;  %8567 = vtanh.f32 %v10451_v28  ;;  %v5731_v54 = vadd.f32 0.5, %v5725_v60 }
 0xa10   :  { %v5734_v58 = vadd.f32 0.5, %v5728_v41  ;;  %v5765_v41 = vunpack.c.l.bf16 %v11126_v27 }
 0xa11   :  { %v10455_v57 = vadd.f32 %v5738_v37, %v5736_v5 }
 0xa13   :  { %8569 = vtanh.f32 %v10455_v57 }
 0xa1c   :  { %v8568_v44 = vpop.eup %8567 }
 0xa1d   :  { %v5743_v49 = vmul.f32 %v8568_v44, %v5731_v54 }
 0xa20   :  { %v8570_v23 = vpop.eup %8569 }
 0xa21   :  { %v5744_v12 = vmul.f32 %v8570_v23, %v5734_v58 }
 0xa23   :  { %v5745_v3 = vpack.c.bf16 %v5744_v12, %v5743_v49 }
 0xa25   :  { %7871 = vst [vmem:[#allocation2 + $0x8] sm:$0xff] %v5745_v3   ;;  %5800 = vmatmul.mubr.bf16.vlgmr.msra.gmra.mxu0 %v5745_v3  ;;  %5843 = vmatmul.mubr.bf16.vlgmr.msra.gmra.mxu1 %v5745_v3 }
 0xa26   :  { %5914 = vmatpush1.bf16.msra.mxu0 %v10121_v24  ;;  %5957 = vmatpush1.bf16.msra.mxu1 %v10129_v33  ;;  %v11123_v24 = vld [vmem:[#allocation18_spill] sm:$0xff] }
 0xa27   :  { %5915 = vmatprep.subr.bf16.mxu0 %v10131_v34  ;;  %5958 = vmatprep.subr.bf16.mxu1 %v10134_v25  ;;  %v5759_v33 = vunpack.c.l.bf16 %v11123_v24 }
 0xa28   :  { %5945 = vmatprep.mubr.bf16.mxu0 %v11071_v8  ;;  %5988 = vmatprep.mubr.bf16.mxu1 %v11071_v8 }
 0xa2a   :  { %5916 = vmatpush1.bf16.msra.mxu0 %v10153_v14  ;;  %5959 = vmatpush1.bf16.msra.mxu1 %v10158_v59  ;;  %v5760_v59 = vunpack.c.h.bf16 %v11123_v24 }
 0xa2b   :  { %5917 = vmatprep.subr.bf16.mxu0 %v10160_v26  ;;  %5960 = vmatprep.subr.bf16.mxu1 %v10166_v45  ;;  %v11124_v26 = vld [vmem:[#allocation19_spill] sm:$0xff] }
 0xa2c   :  { %v5762_v45 = vunpack.c.h.bf16 %v11124_v26  ;;  %v5761_v15 = vunpack.c.l.bf16 %v11124_v26 }
 0xa2e   :  { %5918 = vmatpush1.bf16.msra.mxu0 %v10175_v4  ;;  %5961 = vmatpush1.bf16.msra.mxu1 %v10179_v52 }
 0xa2f   :  { %5919 = vmatprep.subr.bf16.mxu0 %v10181_v53  ;;  %5962 = vmatprep.subr.bf16.mxu1 %v10188_v6 }
 0xa32   :  { %5920 = vmatpush1.bf16.msra.mxu0 %v10195_v21  ;;  %5963 = vmatpush1.bf16.msra.mxu1 %v10199_v22 }
 0xa33   :  { %5921 = vmatprep.subr.bf16.mxu0 %v10201_v30  ;;  %5964 = vmatprep.subr.bf16.mxu1 %v10204_v7 }
 0xa36   :  { %5922 = vmatpush1.bf16.msra.mxu0 %v10207_v56  ;;  %5965 = vmatpush1.bf16.msra.mxu1 %v10211_v20 }
 0xa37   :  { %5923 = vmatprep.subr.bf16.mxu0 %v10213_v11  ;;  %5966 = vmatprep.subr.bf16.mxu1 %v10216_v19 }
 0xa3a   :  { %5924 = vmatpush1.bf16.msra.mxu0 %v10219_v29  ;;  %5967 = vmatpush1.bf16.msra.mxu1 %v10223_v9 }
 0xa3b   :  { %5925 = vmatprep.subr.bf16.mxu0 %v10225_v2  ;;  %5968 = vmatprep.subr.bf16.mxu1 %v10228_v32 }
 0xa3e   :  { %5926 = vmatpush1.bf16.msra.mxu0 %v10231_v35  ;;  %5969 = vmatpush1.bf16.msra.mxu1 %v10235_v36 }
 0xa3f   :  { %5927 = vmatprep.subr.bf16.mxu0 %v10237_v38  ;;  %5970 = vmatprep.subr.bf16.mxu1 %v10240_v39 }
 0xa42   :  { %5928 = vmatpush1.bf16.msra.mxu0 %v10243_v40  ;;  %5971 = vmatpush1.bf16.msra.mxu1 %v10247_v42 }
 0xa43   :  { %6059 = vmatprep.subr.bf16.mxu0 %v10112_v16  ;;  %6102 = vmatprep.subr.bf16.mxu1 %v10115_v0 }
 0xae5   :  { %v5801_v34 = vpop.f32.mrf.mxu0  ;;  %v5844_v25 = vpop.f32.mrf.mxu1 }
 0xae6   :  { %v5853_v14 = vadd.f32 %v5801_v34, %v5759_v33  ;;  %v5855_v54 = vadd.f32 %v5844_v25, %v5761_v15  ;;  %v10517_v15 = vld [vmem:[#allocation9 + $0xcc] ss:$16 sps:$4 sm:$0xff]  }
 0xae7   :  { %v5803_v4 = vpop.f32.mrf.mxu0  ;;  %v5846_v13 = vpop.f32.mrf.mxu1 }
 0xae8   :  { %8571 = vtanh.f32 %v5853_v14  ;;  %v5854_v43 = vadd.f32 %v5803_v4, %v5760_v59  ;;  %v5856_v31 = vadd.f32 %v5846_v13, %v5762_v45 }
 0xae9   :  { %v5805_v55 = vpop.f32.mrf.mxu0  ;;  %v5848_v16 = vpop.f32.mrf.mxu1 }
 0xaea   :  { %8573 = vtanh.f32 %v5854_v43  ;;  %v5857_v0 = vadd.f32 %v5805_v55, %v5763_v18  ;;  %v5859_v12 = vadd.f32 %v5848_v16, %v5765_v41  ;;  %v10525_v41 = vld [vmem:[#allocation9 + $0xc8] ss:$16 sps:$4 sm:$0xff]  }
 0xaeb   :  { %8575 = vtanh.f32 %v5856_v31  ;;  %v5807_v48 = vpop.f32.mrf.mxu0  ;;  %v5850_v47 = vpop.f32.mrf.mxu1 }
 0xaec   :  { %8577 = vtanh.f32 %v5857_v0  ;;  %v5858_v37 = vadd.f32 %v5807_v48, %v5764_v10  ;;  %v5860_v5 = vadd.f32 %v5850_v47, %v5766_v17 }
 0xaee   :  { %8579 = vtanh.f32 %v5858_v37 }
 0xaef   :  { %8581 = vtanh.f32 %v5860_v5  ;;  %v10511_v5 = vld [vmem:[#allocation9 + $0xe8] ss:$16 sps:$4 sm:$0xff]  }
 0xaf0   :  { %8583 = vtanh.f32 %v5855_v54  ;;  %v10531_v54 = vld [vmem:[#allocation9 + $0xac] ss:$16 sps:$4 sm:$0xff]  }
 0xaf1   :  { %8585 = vtanh.f32 %v5859_v12 }
 0xaf5   :  { %v8572_v51 = vpop.eup %8571 }
 0xaf6   :  { %v5869_v60 = vmul.f32 0.5, %v8572_v51  ;;  %v10514_v51 = vld [vmem:[#allocation9 + $0xc4] ss:$16 sps:$4 sm:$0xff]  }
 0xaf7   :  { %v8574_v44 = vpop.eup %8573 }
 0xaf8   :  { %v8576_v58 = vpop.eup %8575  ;;  %v5875_v23 = vadd.f32 0.5, %v5869_v60  ;;  %v5870_v49 = vmul.f32 0.5, %v8574_v44  ;;  %v10522_v60 = vld [vmem:[#allocation9 + $0xc0] ss:$16 sps:$4 sm:$0xff]   ;;  %v10528_v44 = vld [vmem:[#allocation9 + $0xa4] ss:$16 sps:$4 sm:$0xff]  }
 0xaf9   :  { %v8578_v3 = vpop.eup %8577 }
 0xafa   :  { %v5876_v24 = vadd.f32 0.5, %v5870_v49  ;;  %v5883_v33 = vmul.f32 %v8576_v58, %v5875_v23  ;;  %v5872_v34 = vmul.f32 0.5, %v8578_v3  ;;  %v10534_v58 = vld [vmem:[#allocation9 + $0xa0] ss:$16 sps:$4 sm:$0xff]  }
 0xafb   :  { %v8580_v14 = vpop.eup %8579 }
 0xafc   :  { %v5881_v59 = vmul.f32 %v5876_v24, %v10451_v28  ;;  %v5878_v45 = vadd.f32 0.5, %v5872_v34  ;;  %v5873_v26 = vmul.f32 0.5, %v8580_v14  ;;  %v8582_v4 = vpop.eup %8581 }
 0xafd   :  { %v8584_v18 = vpop.eup %8583 }
 0xafe   :  { %v10501_v13 = vadd.f32 %v5883_v33, %v5881_v59  ;;  %v5879_v43 = vadd.f32 0.5, %v5873_v26  ;;  %v5884_v25 = vmul.f32 %v8582_v4, %v5878_v45  ;;  %v8586_v55 = vpop.eup %8585  ;;  %v5871_v16 = vmul.f32 0.5, %v8584_v18 }
 0xaff   :  { %v5874_v28 = vmul.f32 0.5, %v8586_v55 }
 0xb00   :  { %v5882_v31 = vmul.f32 %v5879_v43, %v10455_v57  ;;  %8587 = vtanh.f32 %v10501_v13  ;;  %v5877_v10 = vadd.f32 0.5, %v5871_v16  ;;  %v10508_v57 = vld [vmem:[#allocation9 + $0xe0] ss:$16 sps:$4 sm:$0xff]  }
 0xb01   :  { %v5880_v27 = vadd.f32 0.5, %v5874_v28 }
 0xb02   :  { %v10505_v61 = vadd.f32 %v5884_v25, %v5882_v31 }
 0xb04   :  { %8589 = vtanh.f32 %v10505_v61 }
 0xb0d   :  { %v8588_v0 = vpop.eup %8587 }
 0xb0e   :  { %v5889_v48 = vmul.f32 %v8588_v0, %v5877_v10 }
 0xb11   :  { %v8590_v17 = vpop.eup %8589 }
 0xb12   :  { %v5890_v47 = vmul.f32 %v8590_v17, %v5880_v27 }
 0xb14   :  { %v5891_v37 = vpack.c.bf16 %v5890_v47, %v5889_v48 }
 0xb16   :  { %7876 = vst [vmem:[#allocation2 + $0x10] sm:$0xff] %v5891_v37   ;;  %5946 = vmatmul.mubr.bf16.vlgmr.msra.gmra.mxu0 %v5891_v37  ;;  %5989 = vmatmul.mubr.bf16.vlgmr.msra.gmra.mxu1 %v5891_v37 }
 0xb17   :  { %6060 = vmatpush1.bf16.msra.mxu0 %v10508_v57  ;;  %6103 = vmatpush1.bf16.msra.mxu1 %v10511_v5 }
 0xb18   :  { %6061 = vmatprep.subr.bf16.mxu0 %v10514_v51  ;;  %6104 = vmatprep.subr.bf16.mxu1 %v10517_v15 }
 0xb19   :  { %6091 = vmatprep.mubr.bf16.mxu0 %v11071_v8  ;;  %6134 = vmatprep.mubr.bf16.mxu1 %v11071_v8 }
 0xb1b   :  { %6062 = vmatpush1.bf16.msra.mxu0 %v10522_v60  ;;  %6105 = vmatpush1.bf16.msra.mxu1 %v10525_v41 }
 0xb1c   :  { %6063 = vmatprep.subr.bf16.mxu0 %v10528_v44  ;;  %6106 = vmatprep.subr.bf16.mxu1 %v10531_v54 }
 0xb1f   :  { %6064 = vmatpush1.bf16.msra.mxu0 %v10534_v58  ;;  %6107 = vmatpush1.bf16.msra.mxu1 %v10179_v52  ;;  %v10558_v52 = vld [vmem:[#allocation9 + $0xe4] ss:$16 sps:$4 sm:$0xff]  }
 0xb20   :  { %6065 = vmatprep.subr.bf16.mxu0 %v10181_v53  ;;  %6108 = vmatprep.subr.bf16.mxu1 %v10188_v6  ;;  %v10561_v53 = vld [vmem:[#allocation9 + $0xec] ss:$16 sps:$4 sm:$0xff]   ;;  %v11127_v6 = vld [vmem:[#allocation22_spill] sm:$0xff] }
 0xb23   :  { %6066 = vmatpush1.bf16.msra.mxu0 %v10195_v21  ;;  %6109 = vmatpush1.bf16.msra.mxu1 %v10199_v22  ;;  %v5905_v21 = vunpack.c.l.bf16 %v11127_v6 }
 0xb24   :  { %6067 = vmatprep.subr.bf16.mxu0 %v10201_v30  ;;  %6110 = vmatprep.subr.bf16.mxu1 %v10204_v7 }
 0xb27   :  { %6068 = vmatpush1.bf16.msra.mxu0 %v10207_v56  ;;  %6111 = vmatpush1.bf16.msra.mxu1 %v10211_v20  ;;  %v5906_v56 = vunpack.c.h.bf16 %v11127_v6  ;;  %v11128_v20 = vld [vmem:[#allocation23_spill] sm:$0xff] }
 0xb28   :  { %6069 = vmatprep.subr.bf16.mxu0 %v10213_v11  ;;  %6112 = vmatprep.subr.bf16.mxu1 %v10216_v19  ;;  %v5908_v11 = vunpack.c.h.bf16 %v11128_v20  ;;  %v5907_v34 = vunpack.c.l.bf16 %v11128_v20 }
 0xb2b   :  { %6070 = vmatpush1.bf16.msra.mxu0 %v10219_v29  ;;  %6113 = vmatpush1.bf16.msra.mxu1 %v10223_v9 }
 0xb2c   :  { %6071 = vmatprep.subr.bf16.mxu0 %v10225_v2  ;;  %6114 = vmatprep.subr.bf16.mxu1 %v10228_v32  ;;  %v11129_v32 = vld [vmem:[#allocation24_spill] sm:$0xff] }
 0xb2f   :  { %6072 = vmatpush1.bf16.msra.mxu0 %v10231_v35  ;;  %6115 = vmatpush1.bf16.msra.mxu1 %v10235_v36  ;;  %v5909_v35 = vunpack.c.l.bf16 %v11129_v32 }
 0xb30   :  { %6073 = vmatprep.subr.bf16.mxu0 %v10237_v38  ;;  %6116 = vmatprep.subr.bf16.mxu1 %v10240_v39 }
 0xb33   :  { %6074 = vmatpush1.bf16.msra.mxu0 %v10243_v40  ;;  %6117 = vmatpush1.bf16.msra.mxu1 %v10247_v42  ;;  %v5910_v40 = vunpack.c.h.bf16 %v11129_v32  ;;  %v11130_v42 = vld [vmem:[#allocation25_spill] sm:$0xff] }
 0xb34   :  { %6205 = vmatprep.subr.bf16.mxu0 %v10558_v52  ;;  %6248 = vmatprep.subr.bf16.mxu1 %v10561_v53  ;;  %v5912_v23 = vunpack.c.h.bf16 %v11130_v42  ;;  %v5911_v59 = vunpack.c.l.bf16 %v11130_v42  ;;  %v10609_v42 = vld [vmem:[#allocation9 + $0x6c] ss:$16 sps:$4 sm:$0xff]  }
 0xbd6   :  { %v5947_v22 = vpop.f32.mrf.mxu0  ;;  %v5990_v30 = vpop.f32.mrf.mxu1 }
 0xbd7   :  { %v5999_v7 = vadd.f32 %v5947_v22, %v5905_v21  ;;  %v6001_v26 = vadd.f32 %v5990_v30, %v5907_v34  ;;  %v10630_v34 = vld [vmem:[#allocation9 + $0x24] ss:$16 sps:$4 sm:$0xff]  }
 0xbd8   :  { %v5949_v19 = vpop.f32.mrf.mxu0  ;;  %v5992_v29 = vpop.f32.mrf.mxu1 }
 0xbd9   :  { %8591 = vtanh.f32 %v5999_v7  ;;  %v6000_v9 = vadd.f32 %v5949_v19, %v5906_v56  ;;  %v6002_v2 = vadd.f32 %v5992_v29, %v5908_v11 }
 0xbda   :  { %v5951_v36 = vpop.f32.mrf.mxu0  ;;  %v5994_v38 = vpop.f32.mrf.mxu1 }
 0xbdb   :  { %8593 = vtanh.f32 %v6000_v9  ;;  %v6003_v39 = vadd.f32 %v5951_v36, %v5909_v35  ;;  %v6005_v31 = vadd.f32 %v5994_v38, %v5911_v59  ;;  %v10594_v35 = vld [vmem:[#allocation9 + $0x84] ss:$16 sps:$4 sm:$0xff]   ;;  %v10597_v36 = vld [vmem:[#allocation9 + $0x8c] ss:$16 sps:$4 sm:$0xff]   ;;  %v10600_v38 = vld [vmem:[#allocation9 + $0x80] ss:$16 sps:$4 sm:$0xff]  }
 0xbdc   :  { %8595 = vtanh.f32 %v6002_v2  ;;  %v5953_v49 = vpop.f32.mrf.mxu0  ;;  %v5996_v12 = vpop.f32.mrf.mxu1  ;;  %v10636_v59 = vld [vmem:[#allocation9 + $0x20] ss:$16 sps:$4 sm:$0xff]  }
 0xbdd   :  { %8597 = vtanh.f32 %v6003_v39  ;;  %v6004_v3 = vadd.f32 %v5953_v49, %v5910_v40  ;;  %v6006_v24 = vadd.f32 %v5996_v12, %v5912_v23  ;;  %v10603_v39 = vld [vmem:[#allocation9 + $0x88] ss:$16 sps:$4 sm:$0xff]   ;;  %v10606_v40 = vld [vmem:[#allocation9 + $0x64] ss:$16 sps:$4 sm:$0xff]   ;;  %v10612_v23 = vld [vmem:[#allocation9 + $0x60] ss:$16 sps:$4 sm:$0xff]  }
 0xbde   :  { %v10615_v49 = vld [vmem:[#allocation9 + $0x68] ss:$16 sps:$4 sm:$0xff]   ;;  %v10618_v12 = vld [vmem:[#allocation9 + $0x44] ss:$16 sps:$4 sm:$0xff]  }
 0xbdf   :  { %8599 = vtanh.f32 %v6004_v3  ;;  %v10621_v3 = vld [vmem:[#allocation9 + $0x4c] ss:$16 sps:$4 sm:$0xff]  }
 0xbe0   :  { %8601 = vtanh.f32 %v6006_v24  ;;  %v10624_v24 = vld [vmem:[#allocation9 + $0x40] ss:$16 sps:$4 sm:$0xff]  }
 0xbe1   :  { %8603 = vtanh.f32 %v6001_v26  ;;  %v10642_v26 = vld [vmem:[#allocation9 + $0x4] ss:$16 sps:$4 sm:$0xff]  }
 0xbe2   :  { %8605 = vtanh.f32 %v6005_v31  ;;  %v11131_v31 = vld [vmem:[#allocation26_spill] sm:$0xff] }
 0xbe6   :  { %v8592_v33 = vpop.eup %8591 }
 0xbe7   :  { %v6015_v14 = vmul.f32 0.5, %v8592_v33  ;;  %v10627_v33 = vld [vmem:[#allocation9 + $0x48] ss:$16 sps:$4 sm:$0xff]  }
 0xbe8   :  { %v8594_v45 = vpop.eup %8593 }
 0xbe9   :  { %v8596_v4 = vpop.eup %8595  ;;  %v6021_v43 = vadd.f32 0.5, %v6015_v14  ;;  %v6016_v25 = vmul.f32 0.5, %v8594_v45  ;;  %v10633_v14 = vld [vmem:[#allocation9 + $0x2c] ss:$16 sps:$4 sm:$0xff]   ;;  %v10639_v45 = vld [vmem:[#allocation9 + $0x28] ss:$16 sps:$4 sm:$0xff]  }
 0xbea   :  { %v8598_v18 = vpop.eup %8597 }
 0xbeb   :  { %v6022_v55 = vadd.f32 0.5, %v6016_v25  ;;  %v6029_v16 = vmul.f32 %v8596_v4, %v6021_v43  ;;  %v6018_v28 = vmul.f32 0.5, %v8598_v18  ;;  %v10645_v4 = vld [vmem:[#allocation9 + $0xc] ss:$16 sps:$4 sm:$0xff]   ;;  %v10648_v43 = vld [vmem:[#allocation9] ss:$16 sps:$4 sm:$0xff]   ;;  %v6051_v18 = vunpack.c.l.bf16 %v11131_v31 }
 0xbec   :  { %v8600_v0 = vpop.eup %8599  ;;  %v10651_v25 = vld [vmem:[#allocation9 + $0x8] ss:$16 sps:$4 sm:$0xff]  }
 0xbed   :  { %v6027_v10 = vmul.f32 %v6022_v55, %v10501_v13  ;;  %v6024_v27 = vadd.f32 0.5, %v6018_v28  ;;  %v6019_v17 = vmul.f32 0.5, %v8600_v0  ;;  %v8602_v48 = vpop.eup %8601  ;;  %v6052_v0 = vunpack.c.h.bf16 %v11131_v31 }
 0xbee   :  { %v8604_v30 = vpop.eup %8603 }
 0xbef   :  { %v10573_v47 = vadd.f32 %v6029_v16, %v6027_v10  ;;  %v6025_v37 = vadd.f32 0.5, %v6019_v17  ;;  %v6030_v6 = vmul.f32 %v8602_v48, %v6024_v27  ;;  %v8606_v7 = vpop.eup %8605  ;;  %v6017_v56 = vmul.f32 0.5, %v8604_v30  ;;  %v11132_v10 = vld [vmem:[#allocation27_spill] sm:$0xff] }
 0xbf0   :  { %v6020_v13 = vmul.f32 0.5, %v8606_v7  ;;  %v6054_v27 = vunpack.c.h.bf16 %v11132_v10 }
 0xbf1   :  { %v6028_v21 = vmul.f32 %v6025_v37, %v10505_v61  ;;  %8607 = vtanh.f32 %v10573_v47  ;;  %v6023_v11 = vadd.f32 0.5, %v6017_v56  ;;  %v10591_v61 = vld [vmem:[#allocation9 + $0xa8] ss:$16 sps:$4 sm:$0xff]  }
 0xbf2   :  { %v6026_v19 = vadd.f32 0.5, %v6020_v13 }
 0xbf3   :  { %v10577_v22 = vadd.f32 %v6030_v6, %v6028_v21  ;;  %v11133_v21 = vld [vmem:[#allocation28_spill] sm:$0xff] }
 0xbf4   :  { %v6055_v30 = vunpack.c.l.bf16 %v11133_v21 }
 0xbf5   :  { %8609 = vtanh.f32 %v10577_v22 }
 0xbfe   :  { %v8608_v20 = vpop.eup %8607 }
 0xbff   :  { %v6035_v9 = vmul.f32 %v8608_v20, %v6023_v11  ;;  %v6056_v20 = vunpack.c.h.bf16 %v11133_v21  ;;  %v11134_v11 = vld [vmem:[#allocation29_spill] sm:$0xff] }
 0xc02   :  { %v8610_v29 = vpop.eup %8609 }
 0xc03   :  { %v6036_v2 = vmul.f32 %v8610_v29, %v6026_v19  ;;  %v6058_v19 = vunpack.c.h.bf16 %v11134_v11 }
 0xc05   :  { %v6037_v32 = vpack.c.bf16 %v6036_v2, %v6035_v9 }
 0xc07   :  { %7881 = vst [vmem:[#allocation2 + $0x18] sm:$0xff] %v6037_v32   ;;  %6092 = vmatmul.mubr.bf16.vlgmr.msra.gmra.mxu0 %v6037_v32  ;;  %6135 = vmatmul.mubr.bf16.vlgmr.msra.gmra.mxu1 %v6037_v32 }
 0xc08   :  { %6206 = vmatpush1.bf16.msra.mxu0 %v10508_v57  ;;  %6249 = vmatpush1.bf16.msra.mxu1 %v10511_v5 }
 0xc09   :  { %6207 = vmatprep.subr.bf16.mxu0 %v10514_v51  ;;  %6250 = vmatprep.subr.bf16.mxu1 %v10517_v15 }
 0xc0a   :  { %6237 = vmatprep.mubr.bf16.mxu0 %v11071_v8  ;;  %6280 = vmatprep.mubr.bf16.mxu1 %v11071_v8 }
 0xc0c   :  { %6208 = vmatpush1.bf16.msra.mxu0 %v10522_v60  ;;  %6251 = vmatpush1.bf16.msra.mxu1 %v10525_v41 }
 0xc0d   :  { %6209 = vmatprep.subr.bf16.mxu0 %v10528_v44  ;;  %6252 = vmatprep.subr.bf16.mxu1 %v10531_v54 }
 0xc10   :  { %6210 = vmatpush1.bf16.msra.mxu0 %v10534_v58  ;;  %6253 = vmatpush1.bf16.msra.mxu1 %v10591_v61 }
 0xc11   :  { %6211 = vmatprep.subr.bf16.mxu0 %v10594_v35  ;;  %6254 = vmatprep.subr.bf16.mxu1 %v10597_v36 }
 0xc14   :  { %6212 = vmatpush1.bf16.msra.mxu0 %v10600_v38  ;;  %6255 = vmatpush1.bf16.msra.mxu1 %v10603_v39 }
 0xc15   :  { %6213 = vmatprep.subr.bf16.mxu0 %v10606_v40  ;;  %6256 = vmatprep.subr.bf16.mxu1 %v10609_v42 }
 0xc18   :  { %6214 = vmatpush1.bf16.msra.mxu0 %v10612_v23  ;;  %6257 = vmatpush1.bf16.msra.mxu1 %v10615_v49 }
 0xc19   :  { %6215 = vmatprep.subr.bf16.mxu0 %v10618_v12  ;;  %6258 = vmatprep.subr.bf16.mxu1 %v10621_v3 }
 0xc1c   :  { %6216 = vmatpush1.bf16.msra.mxu0 %v10624_v24  ;;  %6259 = vmatpush1.bf16.msra.mxu1 %v10627_v33 }
 0xc1d   :  { %6217 = vmatprep.subr.bf16.mxu0 %v10630_v34  ;;  %6260 = vmatprep.subr.bf16.mxu1 %v10633_v14 }
 0xc20   :  { %6218 = vmatpush1.bf16.msra.mxu0 %v10636_v59  ;;  %6261 = vmatpush1.bf16.msra.mxu1 %v10639_v45 }
 0xc21   :  { %6219 = vmatprep.subr.bf16.mxu0 %v10642_v26  ;;  %6262 = vmatprep.subr.bf16.mxu1 %v10645_v4 }
 0xc24   :  { %6220 = vmatpush1.bf16.msra.mxu0 %v10648_v43  ;;  %6263 = vmatpush1.bf16.msra.mxu1 %v10651_v25 }
 0xc25   :  { %6351 = vmatprep.subr.bf16.mxu0 %v10558_v52  ;;  %6394 = vmatprep.subr.bf16.mxu1 %v10561_v53 }
 0xcc7   :  { %v6093_v55 = vpop.f32.mrf.mxu0  ;;  %v6136_v16 = vpop.f32.mrf.mxu1 }
 0xcc8   :  { %v6145_v28 = vadd.f32 %v6093_v55, %v6051_v18  ;;  %v6053_v18 = vunpack.c.l.bf16 %v11132_v10 }
 0xcc9   :  { %v6095_v17 = vpop.f32.mrf.mxu0  ;;  %v6138_v48 = vpop.f32.mrf.mxu1 }
 0xcca   :  { %8611 = vtanh.f32 %v6145_v28  ;;  %v6146_v37 = vadd.f32 %v6095_v17, %v6052_v0  ;;  %v6148_v6 = vadd.f32 %v6138_v48, %v6054_v27  ;;  %v6057_v28 = vunpack.c.l.bf16 %v11134_v11 }
 0xccb   :  { %v6097_v7 = vpop.f32.mrf.mxu0  ;;  %v6140_v56 = vpop.f32.mrf.mxu1  ;;  %v6147_v27 = vadd.f32 %v6136_v16, %v6053_v18 }
 0xccc   :  { %8613 = vtanh.f32 %v6146_v37  ;;  %v6149_v13 = vadd.f32 %v6097_v7, %v6055_v30  ;;  %v6151_v21 = vadd.f32 %v6140_v56, %v6057_v28 }
 0xccd   :  { %8615 = vtanh.f32 %v6148_v6  ;;  %v6099_v29 = vpop.f32.mrf.mxu0  ;;  %v6142_v9 = vpop.f32.mrf.mxu1 }
 0xcce   :  { %8617 = vtanh.f32 %v6149_v13  ;;  %v6150_v2 = vadd.f32 %v6099_v29, %v6056_v20  ;;  %v6152_v32 = vadd.f32 %v6142_v9, %v6058_v19 }
 0xcd0   :  { %8619 = vtanh.f32 %v6150_v2 }
 0xcd1   :  { %8621 = vtanh.f32 %v6152_v32 }
 0xcd2   :  { %8623 = vtanh.f32 %v6147_v27 }
 0xcd3   :  { %8625 = vtanh.f32 %v6151_v21 }
 0xcd7   :  { %v8612_v31 = vpop.eup %8611 }
 0xcd8   :  { %v6161_v55 = vmul.f32 0.5, %v8612_v31 }
 0xcd9   :  { %v8614_v0 = vpop.eup %8613 }
 0xcda   :  { %v8616_v17 = vpop.eup %8615  ;;  %v6167_v48 = vadd.f32 0.5, %v6161_v55  ;;  %v6162_v37 = vmul.f32 0.5, %v8614_v0 }
 0xcdb   :  { %v8618_v6 = vpop.eup %8617 }
 0xcdc   :  { %v6168_v30 = vadd.f32 0.5, %v6162_v37  ;;  %v6175_v7 = vmul.f32 %v8616_v17, %v6167_v48  ;;  %v6164_v13 = vmul.f32 0.5, %v8618_v6 }
 0xcdd   :  { %v8620_v20 = vpop.eup %8619 }
 0xcde   :  { %v6173_v19 = vmul.f32 %v6168_v30, %v10573_v47  ;;  %v6170_v29 = vadd.f32 0.5, %v6164_v13  ;;  %v6165_v10 = vmul.f32 0.5, %v8620_v20  ;;  %v8622_v9 = vpop.eup %8621 }
 0xcdf   :  { %v8624_v31 = vpop.eup %8623 }
 0xce0   :  { %v10665_v2 = vadd.f32 %v6175_v7, %v6173_v19  ;;  %v6171_v11 = vadd.f32 0.5, %v6165_v10  ;;  %v6176_v16 = vmul.f32 %v8622_v9, %v6170_v29  ;;  %v8626_v18 = vpop.eup %8625  ;;  %v6163_v55 = vmul.f32 0.5, %v8624_v31  ;;  %v11136_v19 = vld [vmem:[#allocation31_spill] sm:$0xff] }
 0xce1   :  { %v6166_v47 = vmul.f32 0.5, %v8626_v18  ;;  %v6200_v29 = vunpack.c.h.bf16 %v11136_v19 }
 0xce2   :  { %v6174_v32 = vmul.f32 %v6171_v11, %v10577_v22  ;;  %8627 = vtanh.f32 %v10665_v2  ;;  %v6169_v0 = vadd.f32 0.5, %v6163_v55  ;;  %v11135_v22 = vld [vmem:[#allocation30_spill] sm:$0xff] }
 0xce3   :  { %v6172_v27 = vadd.f32 0.5, %v6166_v47  ;;  %v6197_v6 = vunpack.c.l.bf16 %v11135_v22  ;;  %v6198_v20 = vunpack.c.h.bf16 %v11135_v22  ;;  %v11138_v47 = vld [vmem:[#allocation33_spill] sm:$0xff] }
 0xce4   :  { %v10669_v56 = vadd.f32 %v6176_v16, %v6174_v32  ;;  %v11137_v32 = vld [vmem:[#allocation32_spill] sm:$0xff] }
 0xce5   :  { %v6201_v31 = vunpack.c.l.bf16 %v11137_v32  ;;  %v6202_v55 = vunpack.c.h.bf16 %v11137_v32 }
 0xce6   :  { %8629 = vtanh.f32 %v10669_v56 }
 0xcef   :  { %v8628_v28 = vpop.eup %8627 }
 0xcf0   :  { %v6181_v48 = vmul.f32 %v8628_v28, %v6169_v0  ;;  %v6204_v28 = vunpack.c.h.bf16 %v11138_v47 }
 0xcf3   :  { %v8630_v17 = vpop.eup %8629 }
 0xcf4   :  { %v6182_v37 = vmul.f32 %v8630_v17, %v6172_v27 }
 0xcf6   :  { %v6183_v21 = vpack.c.bf16 %v6182_v37, %v6181_v48 }
 0xcf8   :  { %7886 = vst [vmem:[#allocation2 + $0x20] sm:$0xff] %v6183_v21   ;;  %6238 = vmatmul.mubr.bf16.vlgmr.msra.gmra.mxu0 %v6183_v21  ;;  %6281 = vmatmul.mubr.bf16.vlgmr.msra.gmra.mxu1 %v6183_v21  ;;  %v6199_v21 = vunpack.c.l.bf16 %v11136_v19 }
 0xcf9   :  { %6352 = vmatpush1.bf16.msra.mxu0 %v10508_v57  ;;  %6395 = vmatpush1.bf16.msra.mxu1 %v10511_v5 }
 0xcfa   :  { %6353 = vmatprep.subr.bf16.mxu0 %v10514_v51  ;;  %6396 = vmatprep.subr.bf16.mxu1 %v10517_v15 }
 0xcfb   :  { %6383 = vmatprep.mubr.bf16.mxu0 %v11071_v8  ;;  %6426 = vmatprep.mubr.bf16.mxu1 %v11071_v8 }
 0xcfd   :  { %6354 = vmatpush1.bf16.msra.mxu0 %v10522_v60  ;;  %6397 = vmatpush1.bf16.msra.mxu1 %v10525_v41 }
 0xcfe   :  { %6355 = vmatprep.subr.bf16.mxu0 %v10528_v44  ;;  %6398 = vmatprep.subr.bf16.mxu1 %v10531_v54 }
 0xd01   :  { %6356 = vmatpush1.bf16.msra.mxu0 %v10534_v58  ;;  %6399 = vmatpush1.bf16.msra.mxu1 %v10591_v61 }
 0xd02   :  { %6357 = vmatprep.subr.bf16.mxu0 %v10594_v35  ;;  %6400 = vmatprep.subr.bf16.mxu1 %v10597_v36 }
 0xd05   :  { %6358 = vmatpush1.bf16.msra.mxu0 %v10600_v38  ;;  %6401 = vmatpush1.bf16.msra.mxu1 %v10603_v39 }
 0xd06   :  { %6359 = vmatprep.subr.bf16.mxu0 %v10606_v40  ;;  %6402 = vmatprep.subr.bf16.mxu1 %v10609_v42 }
 0xd09   :  { %6360 = vmatpush1.bf16.msra.mxu0 %v10612_v23  ;;  %6403 = vmatpush1.bf16.msra.mxu1 %v10615_v49 }
 0xd0a   :  { %6361 = vmatprep.subr.bf16.mxu0 %v10618_v12  ;;  %6404 = vmatprep.subr.bf16.mxu1 %v10621_v3 }
 0xd0d   :  { %6362 = vmatpush1.bf16.msra.mxu0 %v10624_v24  ;;  %6405 = vmatpush1.bf16.msra.mxu1 %v10627_v33 }
 0xd0e   :  { %6363 = vmatprep.subr.bf16.mxu0 %v10630_v34  ;;  %6406 = vmatprep.subr.bf16.mxu1 %v10633_v14 }
 0xd11   :  { %6364 = vmatpush1.bf16.msra.mxu0 %v10636_v59  ;;  %6407 = vmatpush1.bf16.msra.mxu1 %v10639_v45 }
 0xd12   :  { %6365 = vmatprep.subr.bf16.mxu0 %v10642_v26  ;;  %6408 = vmatprep.subr.bf16.mxu1 %v10645_v4 }
 0xd15   :  { %6366 = vmatpush1.bf16.msra.mxu0 %v10648_v43  ;;  %6409 = vmatpush1.bf16.msra.mxu1 %v10651_v25 }
 0xd16   :  { %6497 = vmatprep.subr.bf16.mxu0 %v10558_v52  ;;  %6540 = vmatprep.subr.bf16.mxu1 %v10561_v53 }
 0xdb8   :  { %v6239_v30 = vpop.f32.mrf.mxu0  ;;  %v6282_v7 = vpop.f32.mrf.mxu1 }
 0xdb9   :  { %v6291_v13 = vadd.f32 %v6239_v30, %v6197_v6  ;;  %v6203_v6 = vunpack.c.l.bf16 %v11138_v47 }
 0xdba   :  { %v6241_v10 = vpop.f32.mrf.mxu0  ;;  %v6284_v9 = vpop.f32.mrf.mxu1 }
 0xdbb   :  { %8631 = vtanh.f32 %v6291_v13  ;;  %v6292_v11 = vadd.f32 %v6241_v10, %v6198_v20  ;;  %v6294_v16 = vadd.f32 %v6284_v9, %v6200_v29  ;;  %v6293_v13 = vadd.f32 %v6282_v7, %v6199_v21 }
 0xdbc   :  { %v6243_v18 = vpop.f32.mrf.mxu0  ;;  %v6286_v52 = vpop.f32.mrf.mxu1 }
 0xdbd   :  { %8633 = vtanh.f32 %v6292_v11  ;;  %v6295_v53 = vadd.f32 %v6243_v18, %v6201_v31  ;;  %v6297_v9 = vadd.f32 %v6286_v52, %v6203_v6 }
 0xdbe   :  { %8635 = vtanh.f32 %v6294_v16  ;;  %v6245_v0 = vpop.f32.mrf.mxu0  ;;  %v6288_v27 = vpop.f32.mrf.mxu1 }
 0xdbf   :  { %8637 = vtanh.f32 %v6295_v53  ;;  %v6296_v17 = vadd.f32 %v6245_v0, %v6202_v55  ;;  %v6298_v48 = vadd.f32 %v6288_v27, %v6204_v28 }
 0xdc1   :  { %8639 = vtanh.f32 %v6296_v17 }
 0xdc2   :  { %8641 = vtanh.f32 %v6298_v48 }
 0xdc3   :  { %8643 = vtanh.f32 %v6293_v13 }
 0xdc4   :  { %8645 = vtanh.f32 %v6297_v9 }
 0xdc8   :  { %v8632_v37 = vpop.eup %8631 }
 0xdc9   :  { %v6307_v22 = vmul.f32 0.5, %v8632_v37 }
 0xdca   :  { %v8634_v30 = vpop.eup %8633 }
 0xdcb   :  { %v8636_v20 = vpop.eup %8635  ;;  %v6313_v29 = vadd.f32 0.5, %v6307_v22  ;;  %v6308_v10 = vmul.f32 0.5, %v8634_v30 }
 0xdcc   :  { %v8638_v11 = vpop.eup %8637 }
 0xdcd   :  { %v6314_v16 = vadd.f32 0.5, %v6308_v10  ;;  %v6321_v32 = vmul.f32 %v8636_v20, %v6313_v29  ;;  %v6310_v31 = vmul.f32 0.5, %v8638_v11 }
 0xdce   :  { %v8640_v18 = vpop.eup %8639 }
 0xdcf   :  { %v6319_v53 = vmul.f32 %v6314_v16, %v10665_v2  ;;  %v6316_v55 = vadd.f32 0.5, %v6310_v31  ;;  %v6311_v19 = vmul.f32 0.5, %v8640_v18  ;;  %v8642_v28 = vpop.eup %8641 }
 0xdd0   :  { %v8644_v17 = vpop.eup %8643 }
 0xdd1   :  { %v10715_v0 = vadd.f32 %v6321_v32, %v6319_v53  ;;  %v6317_v47 = vadd.f32 0.5, %v6311_v19  ;;  %v6322_v7 = vmul.f32 %v8642_v28, %v6316_v55  ;;  %v8646_v48 = vpop.eup %8645  ;;  %v6309_v37 = vmul.f32 0.5, %v8644_v17 }
 0xdd2   :  { %v6312_v2 = vmul.f32 0.5, %v8646_v48 }
 0xdd3   :  { %v6320_v27 = vmul.f32 %v6317_v47, %v10669_v56  ;;  %8647 = vtanh.f32 %v10715_v0  ;;  %v6315_v22 = vadd.f32 0.5, %v6309_v37 }
 0xdd4   :  { %v6318_v6 = vadd.f32 0.5, %v6312_v2 }
 0xdd5   :  { %v10719_v52 = vadd.f32 %v6322_v7, %v6320_v27 }
 0xdd7   :  { %8649 = vtanh.f32 %v10719_v52 }
 0xde0   :  { %v8648_v21 = vpop.eup %8647 }
 0xde1   :  { %v6327_v13 = vmul.f32 %v8648_v21, %v6315_v22 }
 0xde4   :  { %v8650_v30 = vpop.eup %8649 }
 0xde5   :  { %v6328_v20 = vmul.f32 %v8650_v30, %v6318_v6 }
 0xde7   :  { %v6329_v29 = vpack.c.bf16 %v6328_v20, %v6327_v13 }
 0xde9   :  { %7891 = vst [vmem:[#allocation2 + $0x28] sm:$0xff] %v6329_v29   ;;  %6384 = vmatmul.mubr.bf16.vlgmr.msra.gmra.mxu0 %v6329_v29  ;;  %6427 = vmatmul.mubr.bf16.vlgmr.msra.gmra.mxu1 %v6329_v29 }
 0xdea   :  { %6498 = vmatpush1.bf16.msra.mxu0 %v10508_v57  ;;  %6541 = vmatpush1.bf16.msra.mxu1 %v10511_v5  ;;  %v6343_v57 = vunpack.c.l.bf16 %v10358_v1 }
 0xdeb   :  { %6499 = vmatprep.subr.bf16.mxu0 %v10514_v51  ;;  %6542 = vmatprep.subr.bf16.mxu1 %v10517_v15 }
 0xdec   :  { %6529 = vmatprep.mubr.bf16.mxu0 %v11071_v8  ;;  %6572 = vmatprep.mubr.bf16.mxu1 %v11071_v8  ;;  %v8848_v8 = vmov 0.0  }
 0xdee   :  { %6500 = vmatpush1.bf16.msra.mxu0 %v10522_v60  ;;  %6543 = vmatpush1.bf16.msra.mxu1 %v10525_v41  ;;  %v6344_v60 = vunpack.c.h.bf16 %v10358_v1  ;;  %v11139_v41 = vld [vmem:[#allocation34_spill] sm:$0xff] }
 0xdef   :  { %6501 = vmatprep.subr.bf16.mxu0 %v10528_v44  ;;  %6544 = vmatprep.subr.bf16.mxu1 %v10531_v54  ;;  %v6346_v44 = vunpack.c.h.bf16 %v11139_v41 }
 0xdf2   :  { %6502 = vmatpush1.bf16.msra.mxu0 %v10534_v58  ;;  %6545 = vmatpush1.bf16.msra.mxu1 %v10591_v61 }
 0xdf3   :  { %6503 = vmatprep.subr.bf16.mxu0 %v10594_v35  ;;  %6546 = vmatprep.subr.bf16.mxu1 %v10597_v36  ;;  %v11140_v36 = vld [vmem:[#allocation35_spill] sm:$0xff] }
 0xdf6   :  { %6504 = vmatpush1.bf16.msra.mxu0 %v10600_v38  ;;  %6547 = vmatpush1.bf16.msra.mxu1 %v10603_v39  ;;  %v6347_v38 = vunpack.c.l.bf16 %v11140_v36 }
 0xdf7   :  { %6505 = vmatprep.subr.bf16.mxu0 %v10606_v40  ;;  %6548 = vmatprep.subr.bf16.mxu1 %v10609_v42 }
 0xdfa   :  { %6506 = vmatpush1.bf16.msra.mxu0 %v10612_v23  ;;  %6549 = vmatpush1.bf16.msra.mxu1 %v10615_v49  ;;  %v6348_v23 = vunpack.c.h.bf16 %v11140_v36  ;;  %v11141_v49 = vld [vmem:[#allocation14_spill] sm:$0xff] }
 0xdfb   :  { %6507 = vmatprep.subr.bf16.mxu0 %v10618_v12  ;;  %6550 = vmatprep.subr.bf16.mxu1 %v10621_v3  ;;  %v6350_v12 = vunpack.c.h.bf16 %v11141_v49  ;;  %v8367_v36 = vld [vmem:[#allocation2 + $0x20] sm:$0xff]  }
 0xdfe   :  { %6508 = vmatpush1.bf16.msra.mxu0 %v10624_v24  ;;  %6551 = vmatpush1.bf16.msra.mxu1 %v10627_v33 }
 0xdff   :  { %6509 = vmatprep.subr.bf16.mxu0 %v10630_v34  ;;  %6552 = vmatprep.subr.bf16.mxu1 %v10633_v14  ;;  %v6345_v14 = vunpack.c.l.bf16 %v11139_v41  ;;  %v10831_v41 = vld [vmem:[%s10995_s7 + $0x8] sm:$0xff]  }
 0xe02   :  { %6510 = vmatpush1.bf16.msra.mxu0 %v10636_v59  ;;  %6553 = vmatpush1.bf16.msra.mxu1 %v10639_v45  ;;  %v6349_v45 = vunpack.c.l.bf16 %v11141_v49 }
 0xe03   :  { %6511 = vmatprep.subr.bf16.mxu0 %v10642_v26  ;;  %6554 = vmatprep.subr.bf16.mxu1 %v10645_v4 }
 0xe06   :  { %6512 = vmatpush1.bf16.msra.mxu0 %v10648_v43  ;;  %6555 = vmatpush1.bf16.msra.mxu1 %v10651_v25 }
 0xe07   :  { %7974 = vmatprep.subr.bf16.mxu0 %v8848_v8  ;;  %7994 = vmatprep.subr.bf16.mxu1 %v8848_v8 }
 0xea9   :  { %v6385_v5 = vpop.f32.mrf.mxu0  ;;  %v6428_v51 = vpop.f32.mrf.mxu1 }
 0xeaa   :  { %v6437_v15 = vadd.f32 %v6385_v5, %v6343_v57  ;;  %v6439_v4 = vadd.f32 %v6428_v51, %v6345_v14  ;;  %v10782_v57 = vld [vmem:[%s10995_s7 + $0x30] sm:$0xff]   ;;  %v10795_v5 = vld [vmem:[%s10995_s7 + $0x28] sm:$0xff]   ;;  %v10804_v51 = vld [vmem:[%s10995_s7 + $0x20] sm:$0xff]  }
 0xeab   :  { %v6387_v54 = vpop.f32.mrf.mxu0  ;;  %v6430_v58 = vpop.f32.mrf.mxu1 }
 0xeac   :  { %8651 = vtanh.f32 %v6437_v15  ;;  %v6438_v61 = vadd.f32 %v6387_v54, %v6344_v60  ;;  %v6440_v35 = vadd.f32 %v6430_v58, %v6346_v44  ;;  %v10813_v15 = vld [vmem:[%s10995_s7 + $0x18] sm:$0xff]   ;;  %v10822_v60 = vld [vmem:[%s10995_s7 + $0x10] sm:$0xff]   ;;  %v10840_v44 = vld [vmem:[%s10995_s7] sm:$0xff]  }
 0xead   :  { %v6389_v39 = vpop.f32.mrf.mxu0  ;;  %v6432_v40 = vpop.f32.mrf.mxu1  ;;  %v8363_v54 = vld [vmem:[#allocation2] sm:$0xff]   ;;  %v8364_v58 = vld [vmem:[#allocation2 + $0x8] sm:$0xff]  }
 0xeae   :  { %8653 = vtanh.f32 %v6438_v61  ;;  %v6441_v42 = vadd.f32 %v6389_v39, %v6347_v38  ;;  %v6443_v10 = vadd.f32 %v6432_v40, %v6349_v45  ;;  %v8365_v61 = vld [vmem:[#allocation2 + $0x10] sm:$0xff]   ;;  %v8368_v38 = vld [vmem:[#allocation2 + $0x28] sm:$0xff]   ;;  %v6489_v40 = vunpack.c.l.bf16 %v10374_v46 }
 0xeaf   :  { %8655 = vtanh.f32 %v6440_v35  ;;  %v6391_v3 = vpop.f32.mrf.mxu0  ;;  %v6434_v1 = vpop.f32.mrf.mxu1  ;;  %v8366_v35 = vld [vmem:[#allocation2 + $0x18] sm:$0xff]  }
 0xeb0   :  { %8657 = vtanh.f32 %v6441_v42  ;;  %v6442_v24 = vadd.f32 %v6391_v3, %v6348_v23  ;;  %v6444_v33 = vadd.f32 %v6434_v1, %v6350_v12  ;;  %v6490_v12 = vunpack.c.h.bf16 %v10374_v46 }
 0xeb1   :  { %v6492_v3 = vunpack.c.h.bf16 %v10376_v63 }
 0xeb2   :  { %8659 = vtanh.f32 %v6442_v24 }
 0xeb3   :  { %8661 = vtanh.f32 %v6444_v33 }
 0xeb4   :  { %8663 = vtanh.f32 %v6439_v4  ;;  %v6496_v4 = vunpack.c.h.bf16 %v10384_v50 }
 0xeb5   :  { %8665 = vtanh.f32 %v6443_v10  ;;  %v6491_v10 = vunpack.c.l.bf16 %v10376_v63 }
 0xeb9   :  { %v8652_v34 = vpop.eup %8651 }
 0xeba   :  { %v6453_v59 = vmul.f32 0.5, %v8652_v34  ;;  %v6493_v34 = vunpack.c.l.bf16 %v10382_v62 }
 0xebb   :  { %v8654_v26 = vpop.eup %8653 }
 0xebc   :  { %v8656_v43 = vpop.eup %8655  ;;  %v6459_v25 = vadd.f32 0.5, %v6453_v59  ;;  %v6454_v56 = vmul.f32 0.5, %v8654_v26  ;;  %v6494_v26 = vunpack.c.h.bf16 %v10382_v62 }
 0xebd   :  { %v8658_v9 = vpop.eup %8657 }
 0xebe   :  { %v6460_v11 = vadd.f32 0.5, %v6454_v56  ;;  %v6467_v16 = vmul.f32 %v8656_v43, %v6459_v25  ;;  %v6456_v32 = vmul.f32 0.5, %v8658_v9 }
 0xebf   :  { %v8660_v31 = vpop.eup %8659 }
 0xec0   :  { %v6465_v18 = vmul.f32 %v6460_v11, %v10715_v0  ;;  %v6462_v53 = vadd.f32 0.5, %v6456_v32  ;;  %v6457_v55 = vmul.f32 0.5, %v8660_v31  ;;  %v8662_v19 = vpop.eup %8661  ;;  %v6495_v32 = vunpack.c.l.bf16 %v10384_v50 }
 0xec1   :  { %v8664_v48 = vpop.eup %8663 }
 0xec2   :  { %v10765_v28 = vadd.f32 %v6467_v16, %v6465_v18  ;;  %v6463_v47 = vadd.f32 0.5, %v6457_v55  ;;  %v6468_v7 = vmul.f32 %v8662_v19, %v6462_v53  ;;  %v8666_v37 = vpop.eup %8665  ;;  %v6455_v2 = vmul.f32 0.5, %v8664_v48 }
 0xec3   :  { %v6458_v0 = vmul.f32 0.5, %v8666_v37 }
 0xec4   :  { %v6466_v27 = vmul.f32 %v6463_v47, %v10719_v52  ;;  %8667 = vtanh.f32 %v10765_v28  ;;  %v6461_v22 = vadd.f32 0.5, %v6455_v2  ;;  %v10775_v52 = vld [vmem:[%s10995_s7 + $0x38] sm:$0xff]  }
 0xec5   :  { %v6464_v6 = vadd.f32 0.5, %v6458_v0 }
 0xec6   :  { %v10769_v17 = vadd.f32 %v6468_v7, %v6466_v27 }
 0xec8   :  { %8669 = vtanh.f32 %v10769_v17 }
 0xed1   :  { %v8668_v21 = vpop.eup %8667 }
 0xed2   :  { %v6473_v13 = vmul.f32 %v8668_v21, %v6461_v22 }
 0xed5   :  { %v8670_v30 = vpop.eup %8669 }
 0xed6   :  { %v6474_v20 = vmul.f32 %v8670_v30, %v6464_v6 }
 0xed8   :  { %v6475_v29 = vpack.c.bf16 %v6474_v20, %v6473_v13  ;;  %v10967_v13 = vld [vmem:[%s10996_s8] ss:$0 sm:$0xff]  ;;  %s8850_s8 = smov [#allocation10]  }
 0xed9   :  { %s7179_s12 = sshll.u32 %s8850_s8, 4  ;;  %s7180_s12 = int_to_ptr.vmem [resolvable:$true] %s7179_s12 }
 0xeda   :  { %7896 = vst [vmem:[#allocation2 + $0x30] sm:$0xff] %v6475_v29   ;;  %6530 = vmatmul.mubr.bf16.vlgmr.msra.gmra.mxu0 %v6475_v29  ;;  %6573 = vmatmul.mubr.bf16.vlgmr.msra.gmra.mxu1 %v6475_v29  ;;  %s8815_s13 = scalar_lea.vmem %s7180_s12, 1024  ;;  %p8820_p2 = scmp.lt.s32.totalorder %s7180_s12, %s7180_s12 }
 0xedb   :  { %7975 = vmatpush3.bf16.msra.mxu0 %v10775_v52  ;;  %7995 = vmatpush3.bf16.msra.mxu1 %v10775_v52  ;;  %p8816_p1 = scmp.ne.s32.totalorder %s7180_s12, %s8815_s13  ;;  %p8821_p3 = scmp.lt.s32.totalorder %s8815_s13, %s8815_s13 }
 0xedc   :  { %7976 = vmatprep.subr.bf16.mxu0 %v8848_v8  ;;  %7996 = vmatprep.subr.bf16.mxu1 %v8848_v8 }
 0xedd   :  { %7990 = vmatprep.mubr.msk.bf16.mxu0 %vm8849_vm2, %v8848_v8  ;;  %8010 = vmatprep.mubr.msk.bf16.mxu1 %vm8849_vm2, %v8848_v8  ;;  %p8822_p4 = por %p8821_p3, %p8820_p2 }
 0xedf   :  { %7977 = vmatpush3.bf16.msra.mxu0 %v10782_v57  ;;  %7997 = vmatpush3.bf16.msra.mxu1 %v10782_v57  ;;  %p8823_p5 = pnand %p8822_p4, %p8816_p1 }
 0xee0   :  { %7978 = vmatprep.subr.bf16.mxu0 %v8848_v8  ;;  %7998 = vmatprep.subr.bf16.mxu1 %v8848_v8 }
 0xee1   :  { %v8369_v39 = vld [vmem:[#allocation2 + $0x30] sm:$0xff]  }
 0xee3   :  { %7979 = vmatpush3.bf16.msra.mxu0 %v10795_v5  ;;  %7999 = vmatpush3.bf16.msra.mxu1 %v10795_v5 }
 0xee4   :  { %7980 = vmatprep.subr.bf16.mxu0 %v8848_v8  ;;  %8000 = vmatprep.subr.bf16.mxu1 %v8848_v8 }
 0xee7   :  { %7981 = vmatpush3.bf16.msra.mxu0 %v10804_v51  ;;  %8001 = vmatpush3.bf16.msra.mxu1 %v10804_v51 }
 0xee8   :  { %7982 = vmatprep.subr.bf16.mxu0 %v8848_v8  ;;  %8002 = vmatprep.subr.bf16.mxu1 %v8848_v8 }
 0xeeb   :  { %7983 = vmatpush3.bf16.msra.mxu0 %v10813_v15  ;;  %8003 = vmatpush3.bf16.msra.mxu1 %v10813_v15 }
 0xeec   :  { %7984 = vmatprep.subr.bf16.mxu0 %v8848_v8  ;;  %8004 = vmatprep.subr.bf16.mxu1 %v8848_v8 }
 0xeef   :  { %7985 = vmatpush3.bf16.msra.mxu0 %v10822_v60  ;;  %8005 = vmatpush3.bf16.msra.mxu1 %v10822_v60 }
 0xef0   :  { %7986 = vmatprep.subr.bf16.mxu0 %v8848_v8  ;;  %8006 = vmatprep.subr.bf16.mxu1 %v8848_v8 }
 0xef3   :  { %7987 = vmatpush3.bf16.msra.mxu0 %v10831_v41  ;;  %8007 = vmatpush3.bf16.msra.mxu1 %v10831_v41 }
 0xef4   :  { %7988 = vmatprep.subr.bf16.mxu0 %v8848_v8  ;;  %8008 = vmatprep.subr.bf16.mxu1 %v8848_v8 }
 0xef7   :  { %7989 = vmatpush3.bf16.msra.mxu0 %v10840_v44  ;;  %8009 = vmatpush3.bf16.msra.mxu1 %v10840_v44 }
 0xef8   :  { %8014 = vmatprep.subr.bf16.mxu0 %v8848_v8  ;;  %8034 = vmatprep.subr.bf16.mxu1 %v8848_v8 }
 0xefa   :  { %7991 = vmatmul.mubr.bf16.vlgmr.msra.gmra.mxu0 %v8363_v54  ;;  %8011 = vmatmul.mubr.bf16.vlgmr.msra.gmra.mxu1 %v8364_v58 }
 0xefb   :  { %8015 = vmatpush3.bf16.msra.mxu0 %v10775_v52  ;;  %8035 = vmatpush3.bf16.msra.mxu1 %v10775_v52 }
 0xefc   :  { %8016 = vmatprep.subr.bf16.mxu0 %v8848_v8  ;;  %8036 = vmatprep.subr.bf16.mxu1 %v8848_v8 }
 0xefd   :  { %8030 = vmatprep.mubr.msk.bf16.mxu0 %vm8849_vm2, %v8848_v8  ;;  %8050 = vmatprep.mubr.msk.bf16.mxu1 %vm8849_vm2, %v8848_v8 }
 0xeff   :  { %8017 = vmatpush3.bf16.msra.mxu0 %v10782_v57  ;;  %8037 = vmatpush3.bf16.msra.mxu1 %v10782_v57 }
 0xf00   :  { %8018 = vmatprep.subr.bf16.mxu0 %v8848_v8  ;;  %8038 = vmatprep.subr.bf16.mxu1 %v8848_v8 }
 0xf03   :  { %8019 = vmatpush3.bf16.msra.mxu0 %v10795_v5  ;;  %8039 = vmatpush3.bf16.msra.mxu1 %v10795_v5 }
 0xf04   :  { %8020 = vmatprep.subr.bf16.mxu0 %v8848_v8  ;;  %8040 = vmatprep.subr.bf16.mxu1 %v8848_v8 }
 0xf07   :  { %8021 = vmatpush3.bf16.msra.mxu0 %v10804_v51  ;;  %8041 = vmatpush3.bf16.msra.mxu1 %v10804_v51 }
 0xf08   :  { %8022 = vmatprep.subr.bf16.mxu0 %v8848_v8  ;;  %8042 = vmatprep.subr.bf16.mxu1 %v8848_v8 }
 0xf0b   :  { %8023 = vmatpush3.bf16.msra.mxu0 %v10813_v15  ;;  %8043 = vmatpush3.bf16.msra.mxu1 %v10813_v15 }
 0xf0c   :  { %8024 = vmatprep.subr.bf16.mxu0 %v8848_v8  ;;  %8044 = vmatprep.subr.bf16.mxu1 %v8848_v8 }
 0xf0f   :  { %8025 = vmatpush3.bf16.msra.mxu0 %v10822_v60  ;;  %8045 = vmatpush3.bf16.msra.mxu1 %v10822_v60 }
 0xf10   :  { %8026 = vmatprep.subr.bf16.mxu0 %v8848_v8  ;;  %8046 = vmatprep.subr.bf16.mxu1 %v8848_v8 }
 0xf13   :  { %8027 = vmatpush3.bf16.msra.mxu0 %v10831_v41  ;;  %8047 = vmatpush3.bf16.msra.mxu1 %v10831_v41 }
 0xf14   :  { %8028 = vmatprep.subr.bf16.mxu0 %v8848_v8  ;;  %8048 = vmatprep.subr.bf16.mxu1 %v8848_v8 }
 0xf17   :  { %8029 = vmatpush3.bf16.msra.mxu0 %v10840_v44  ;;  %8049 = vmatpush3.bf16.msra.mxu1 %v10840_v44 }
 0xf18   :  { %8054 = vmatprep.subr.bf16.mxu0 %v8848_v8  ;;  %8074 = vmatprep.subr.bf16.mxu1 %v8848_v8 }
 0xf1a   :  { %8031 = vmatmul.mubr.bf16.vlgmr.msra.gmra.mxu0 %v8365_v61  ;;  %8051 = vmatmul.mubr.bf16.vlgmr.msra.gmra.mxu1 %v8366_v35 }
 0xf1b   :  { %8055 = vmatpush3.bf16.msra.mxu0 %v10775_v52  ;;  %8075 = vmatpush3.bf16.msra.mxu1 %v10775_v52 }
 0xf1c   :  { %8056 = vmatprep.subr.bf16.mxu0 %v8848_v8  ;;  %8076 = vmatprep.subr.bf16.mxu1 %v8848_v8 }
 0xf1d   :  { %8070 = vmatprep.mubr.msk.bf16.mxu0 %vm8849_vm2, %v8848_v8  ;;  %8090 = vmatprep.mubr.msk.bf16.mxu1 %vm8849_vm2, %v8848_v8 }
 0xf1f   :  { %8057 = vmatpush3.bf16.msra.mxu0 %v10782_v57  ;;  %8077 = vmatpush3.bf16.msra.mxu1 %v10782_v57 }
 0xf20   :  { %8058 = vmatprep.subr.bf16.mxu0 %v8848_v8  ;;  %8078 = vmatprep.subr.bf16.mxu1 %v8848_v8 }
 0xf23   :  { %8059 = vmatpush3.bf16.msra.mxu0 %v10795_v5  ;;  %8079 = vmatpush3.bf16.msra.mxu1 %v10795_v5 }
 0xf24   :  { %8060 = vmatprep.subr.bf16.mxu0 %v8848_v8  ;;  %8080 = vmatprep.subr.bf16.mxu1 %v8848_v8 }
 0xf27   :  { %8061 = vmatpush3.bf16.msra.mxu0 %v10804_v51  ;;  %8081 = vmatpush3.bf16.msra.mxu1 %v10804_v51 }
 0xf28   :  { %8062 = vmatprep.subr.bf16.mxu0 %v8848_v8  ;;  %8082 = vmatprep.subr.bf16.mxu1 %v8848_v8 }
 0xf2b   :  { %8063 = vmatpush3.bf16.msra.mxu0 %v10813_v15  ;;  %8083 = vmatpush3.bf16.msra.mxu1 %v10813_v15 }
 0xf2c   :  { %8064 = vmatprep.subr.bf16.mxu0 %v8848_v8  ;;  %8084 = vmatprep.subr.bf16.mxu1 %v8848_v8 }
 0xf2f   :  { %8065 = vmatpush3.bf16.msra.mxu0 %v10822_v60  ;;  %8085 = vmatpush3.bf16.msra.mxu1 %v10822_v60 }
 0xf30   :  { %8066 = vmatprep.subr.bf16.mxu0 %v8848_v8  ;;  %8086 = vmatprep.subr.bf16.mxu1 %v8848_v8 }
 0xf33   :  { %8067 = vmatpush3.bf16.msra.mxu0 %v10831_v41  ;;  %8087 = vmatpush3.bf16.msra.mxu1 %v10831_v41 }
 0xf34   :  { %8068 = vmatprep.subr.bf16.mxu0 %v8848_v8  ;;  %8088 = vmatprep.subr.bf16.mxu1 %v8848_v8 }
 0xf37   :  { %8069 = vmatpush3.bf16.msra.mxu0 %v10840_v44  ;;  %8089 = vmatpush3.bf16.msra.mxu1 %v10840_v44 }
 0xf38   :  { %8094 = vmatprep.subr.bf16.mxu0 %v8848_v8  ;;  %8114 = vmatprep.subr.bf16.mxu1 %v8848_v8 }
 0xf3a   :  { %8071 = vmatmul.mubr.bf16.vlgmr.msra.gmra.mxu0 %v8367_v36  ;;  %8091 = vmatmul.mubr.bf16.vlgmr.msra.gmra.mxu1 %v8368_v38 }
 0xf3b   :  { %8095 = vmatpush3.bf16.msra.mxu0 %v10775_v52  ;;  %8110 = vmatprep.mubr.msk.bf16.mxu0 %vm8849_vm2, %v8848_v8 }
 0xf3c   :  { %8096 = vmatprep.subr.bf16.mxu0 %v8848_v8  ;;  %8115 = vmatpush3.bf16.msra.mxu1 %v10775_v52 }
 0xf3d   :  { %8116 = vmatprep.subr.bf16.mxu1 %v8848_v8  ;;  %8130 = vmatprep.mubr.msk.bf16.mxu1 %vm8849_vm2, %v8848_v8 }
 0xf3f   :  { %8097 = vmatpush3.bf16.msra.mxu0 %v10782_v57 }
 0xf40   :  { %8098 = vmatprep.subr.bf16.mxu0 %v8848_v8  ;;  %8117 = vmatpush3.bf16.msra.mxu1 %v10782_v57 }
 0xf41   :  { %8118 = vmatprep.subr.bf16.mxu1 %v8848_v8 }
 0xf43   :  { %8099 = vmatpush3.bf16.msra.mxu0 %v10795_v5 }
 0xf44   :  { %8100 = vmatprep.subr.bf16.mxu0 %v8848_v8  ;;  %8119 = vmatpush3.bf16.msra.mxu1 %v10795_v5 }
 0xf45   :  { %8120 = vmatprep.subr.bf16.mxu1 %v8848_v8 }
 0xf47   :  { %8101 = vmatpush3.bf16.msra.mxu0 %v10804_v51 }
 0xf48   :  { %8102 = vmatprep.subr.bf16.mxu0 %v8848_v8  ;;  %8121 = vmatpush3.bf16.msra.mxu1 %v10804_v51 }
 0xf49   :  { %8122 = vmatprep.subr.bf16.mxu1 %v8848_v8 }
 0xf4b   :  { %8103 = vmatpush3.bf16.msra.mxu0 %v10813_v15 }
 0xf4c   :  { %8104 = vmatprep.subr.bf16.mxu0 %v8848_v8  ;;  %8123 = vmatpush3.bf16.msra.mxu1 %v10813_v15 }
 0xf4d   :  { %8124 = vmatprep.subr.bf16.mxu1 %v8848_v8 }
 0xf4f   :  { %8105 = vmatpush3.bf16.msra.mxu0 %v10822_v60 }
 0xf50   :  { %8106 = vmatprep.subr.bf16.mxu0 %v8848_v8  ;;  %8125 = vmatpush3.bf16.msra.mxu1 %v10822_v60 }
 0xf51   :  { %8126 = vmatprep.subr.bf16.mxu1 %v8848_v8 }
 0xf53   :  { %8107 = vmatpush3.bf16.msra.mxu0 %v10831_v41 }
 0xf54   :  { %8108 = vmatprep.subr.bf16.mxu0 %v8848_v8  ;;  %8127 = vmatpush3.bf16.msra.mxu1 %v10831_v41 }
 0xf55   :  { %8128 = vmatprep.subr.bf16.mxu1 %v8848_v8 }
 0xf57   :  { %8109 = vmatpush3.bf16.msra.mxu0 %v10840_v44 }
 0xf58   :  { %8129 = vmatpush3.bf16.msra.mxu1 %v10840_v44 }
 0xf5a   :  { %8111 = vmatmul.mubr.bf16.vlgmr.msra.gmra.mxu0 %v8369_v39 }
 0xf9a   :  { %v6531_v42 = vpop.f32.mrf.mxu0  ;;  %v6574_v23 = vpop.f32.mrf.mxu1 }
 0xf9b   :  { %v6583_v49 = vadd.f32 %v6531_v42, %v6489_v40  ;;  %v6585_v9 = vadd.f32 %v6574_v23, %v6491_v10 }
 0xf9c   :  { %v6533_v1 = vpop.f32.mrf.mxu0  ;;  %v6576_v24 = vpop.f32.mrf.mxu1 }
 0xf9d   :  { %8671 = vtanh.f32 %v6583_v49  ;;  %v6584_v33 = vadd.f32 %v6533_v1, %v6490_v12  ;;  %v6586_v8 = vadd.f32 %v6576_v24, %v6492_v3 }
 0xf9e   :  { %v6535_v14 = vpop.f32.mrf.mxu0  ;;  %v6578_v59 = vpop.f32.mrf.mxu1 }
 0xf9f   :  { %8673 = vtanh.f32 %v6584_v33  ;;  %v6587_v45 = vadd.f32 %v6535_v14, %v6493_v34  ;;  %v6589_v55 = vadd.f32 %v6578_v59, %v6495_v32 }
 0xfa0   :  { %8675 = vtanh.f32 %v6586_v8  ;;  %v6537_v43 = vpop.f32.mrf.mxu0  ;;  %v6580_v46 = vpop.f32.mrf.mxu1 }
 0xfa1   :  { %8677 = vtanh.f32 %v6587_v45  ;;  %v6588_v25 = vadd.f32 %v6537_v43, %v6494_v26  ;;  %v6590_v56 = vadd.f32 %v6580_v46, %v6496_v4 }
 0xfa3   :  { %8679 = vtanh.f32 %v6588_v25 }
 0xfa4   :  { %8681 = vtanh.f32 %v6590_v56 }
 0xfa5   :  { %8683 = vtanh.f32 %v6585_v9 }
 0xfa6   :  { %8685 = vtanh.f32 %v6589_v55 }
 0xfaa   :  { %v8672_v11 = vpop.eup %8671 }
 0xfab   :  { %v6599_v16 = vmul.f32 0.5, %v8672_v11 }
 0xfac   :  { %v8674_v31 = vpop.eup %8673 }
 0xfad   :  { %v8676_v18 = vpop.eup %8675  ;;  %v6605_v62 = vadd.f32 0.5, %v6599_v16  ;;  %v6600_v53 = vmul.f32 0.5, %v8674_v31 }
 0xfae   :  { %v8678_v19 = vpop.eup %8677 }
 0xfaf   :  { %v6606_v47 = vadd.f32 0.5, %v6600_v53  ;;  %v6613_v7 = vmul.f32 %v8676_v18, %v6605_v62  ;;  %v6602_v27 = vmul.f32 0.5, %v8678_v19 }
 0xfb0   :  { %v8680_v48 = vpop.eup %8679 }
 0xfb1   :  { %v6611_v37 = vmul.f32 %v6606_v47, %v10765_v28  ;;  %v6608_v2 = vadd.f32 0.5, %v6602_v27  ;;  %v6603_v63 = vmul.f32 0.5, %v8680_v48  ;;  %v8682_v0 = vpop.eup %8681 }
 0xfb2   :  { %v8684_v20 = vpop.eup %8683 }
 0xfb3   :  { %v6615_v21 = vadd.f32 %v6613_v7, %v6611_v37  ;;  %v6609_v22 = vadd.f32 0.5, %v6603_v63  ;;  %v6614_v50 = vmul.f32 %v8682_v0, %v6608_v2  ;;  %v6601_v15 = vmul.f32 0.5, %v8684_v20 }
 0xfb5   :  { %8687 = vtanh.f32 %v6615_v21  ;;  %v6612_v6 = vmul.f32 %v6609_v22, %v10769_v17  ;;  %v8686_v17 = vpop.eup %8685  ;;  %v6607_v38 = vadd.f32 0.5, %v6601_v15 }
 0xfb6   :  { %v6604_v39 = vmul.f32 0.5, %v8686_v17 }
 0xfb7   :  { %v6616_v30 = vadd.f32 %v6614_v50, %v6612_v6 }
 0xfb8   :  { %v6610_v12 = vadd.f32 0.5, %v6604_v39 }
 0xfb9   :  { %8689 = vtanh.f32 %v6616_v30 }
 0xfba   :  { %v6744_v52 = vpop.f32.mrf.mxu0  ;;  %v6803_v28 = vpop.f32.mrf.mxu1 }
 0xfbb   :  { %v6745_v29 = vadd.f32 %v10967_v13, %v6744_v52  ;;  %v6804_v57 = vadd.f32 %v10967_v13, %v6803_v28 }
 0xfbc   :  { %v7992_v5 = vpop.f32.mrf.mxu0  ;;  %v8012_v51 = vpop.f32.mrf.mxu1 }
 0xfbd   :  { %v7806_v60 = vpack.c.bf16 %v6745_v29, %v6745_v29  ;;  %v7808_v41 = vpack.c.bf16 %v6804_v57, %v6804_v57 }
 0xfbe   :  { %v6747_v44 = vpop.f32.mrf.mxu0  ;;  %v6806_v54 = vpop.f32.mrf.mxu1 }
 0xfbf   :  { %6759 = vst [vmem:[#allocation10] sm:$0xf] %v7806_v60  ;;  %6818 = vst [vmem:[#allocation10 + $0x4] sm:$0xf] %v7808_v41  ;;  %v6748_v58 = vadd.f32 %v10967_v13, %v6747_v44  ;;  %v6807_v61 = vadd.f32 %v10967_v13, %v6806_v54 }
 0xfc0   :  { %v7993_v35 = vpop.f32.mrf.mxu0  ;;  %v8013_v36 = vpop.f32.mrf.mxu1 }
 0xfc1   :  { %v7807_v40 = vpack.c.bf16 %v6748_v58, %v6748_v58  ;;  %v7809_v42 = vpack.c.bf16 %v6807_v61, %v6807_v61 }
 0xfc2   :  { %v8688_v23 = vpop.eup %8687 }
 0xfc3   :  { %v6619_v49 = vmul.f32 %v8688_v23, %v6607_v38  ;;  %6760 = vst [vmem:[#allocation10 + $0x20] sm:$0xf] %v7807_v40  ;;  %6819 = vst [vmem:[#allocation10 + $0x24] sm:$0xf] %v7809_v42 }
 0xfc6   :  { %v8690_v3 = vpop.eup %8689 }
 0xfc7   :  { %v6620_v1 = vmul.f32 %v8690_v3, %v6610_v12 }
 0xfc9   :  { %v7900_v24 = vpack.c.bf16 %v6620_v1, %v6619_v49 }
 0xfcb   :  { %7901 = vst [vmem:[#allocation2 + $0x38] sm:$0xff] %v7900_v24  }
 0xfd2   :  { %v8370_v33 = vld [vmem:[#allocation2 + $0x38] sm:$0xff]  }
 0xfd3   :  { %8131 = vmatmul.mubr.bf16.vlgmr.msra.gmra.mxu1 %v8370_v33 }
 0xfda   :  { %v6862_v8 = vpop.f32.mrf.mxu0  ;;  %v6921_v34 = vpop.f32.mrf.mxu1 }
 0xfdb   :  { %v6863_v14 = vadd.f32 %v10967_v13, %v6862_v8  ;;  %v6922_v59 = vadd.f32 %v10967_v13, %v6921_v34 }
 0xfdc   :  { %v8032_v45 = vpop.f32.mrf.mxu0  ;;  %v8052_v26 = vpop.f32.mrf.mxu1 }
 0xfdd   :  { %v7810_v4 = vpack.c.bf16 %v6863_v14, %v6863_v14  ;;  %v7812_v43 = vpack.c.bf16 %v6922_v59, %v6922_v59 }
 0xfde   :  { %v6865_v46 = vpop.f32.mrf.mxu0  ;;  %v6924_v25 = vpop.f32.mrf.mxu1 }
 0xfdf   :  { %6877 = vst [vmem:[#allocation10 + $0x8] sm:$0xf] %v7810_v4  ;;  %6936 = vst [vmem:[#allocation10 + $0xc] sm:$0xf] %v7812_v43  ;;  %v6866_v56 = vadd.f32 %v10967_v13, %v6865_v46  ;;  %v6925_v10 = vadd.f32 %v10967_v13, %v6924_v25 }
 0xfe0   :  { %v8033_v9 = vpop.f32.mrf.mxu0  ;;  %v8053_v11 = vpop.f32.mrf.mxu1 }
 0xfe1   :  { %v7811_v16 = vpack.c.bf16 %v6866_v56, %v6866_v56  ;;  %v7813_v32 = vpack.c.bf16 %v6925_v10, %v6925_v10 }
 0xfe3   :  { %6878 = vst [vmem:[#allocation10 + $0x28] sm:$0xf] %v7811_v16  ;;  %6937 = vst [vmem:[#allocation10 + $0x2c] sm:$0xf] %v7813_v32 }
 0xffa   :  { %v6980_v31 = vpop.f32.mrf.mxu0  ;;  %v7039_v18 = vpop.f32.mrf.mxu1 }
 0xffb   :  { %v6981_v62 = vadd.f32 %v10967_v13, %v6980_v31  ;;  %v7040_v53 = vadd.f32 %v10967_v13, %v7039_v18 }
 0xffc   :  { %v8072_v55 = vpop.f32.mrf.mxu0  ;;  %v8092_v19 = vpop.f32.mrf.mxu1 }
 0xffd   :  { %v7814_v47 = vpack.c.bf16 %v6981_v62, %v6981_v62  ;;  %v7816_v7 = vpack.c.bf16 %v7040_v53, %v7040_v53 }
 0xffe   :  { %v6983_v27 = vpop.f32.mrf.mxu0  ;;  %v7042_v48 = vpop.f32.mrf.mxu1 }
 0xfff   :  { %6995 = vst [vmem:[#allocation10 + $0x10] sm:$0xf] %v7814_v47  ;;  %7054 = vst [vmem:[#allocation10 + $0x14] sm:$0xf] %v7816_v7  ;;  %v6984_v37 = vadd.f32 %v10967_v13, %v6983_v27  ;;  %v7043_v2 = vadd.f32 %v10967_v13, %v7042_v48 }
0x1000   :  { %v8073_v63 = vpop.f32.mrf.mxu0  ;;  %v8093_v0 = vpop.f32.mrf.mxu1 }
0x1001   :  { %v7815_v21 = vpack.c.bf16 %v6984_v37, %v6984_v37  ;;  %v7817_v22 = vpack.c.bf16 %v7043_v2, %v7043_v2 }
0x1003   :  { %6996 = vst [vmem:[#allocation10 + $0x30] sm:$0xf] %v7815_v21  ;;  %7055 = vst [vmem:[#allocation10 + $0x34] sm:$0xf] %v7817_v22 }
0x101a   :  { %v7098_v50 = vpop.f32.mrf.mxu0 }
0x101b   :  { %v7099_v6 = vadd.f32 %v10967_v13, %v7098_v50 }
0x101c   :  { %v8112_v30 = vpop.f32.mrf.mxu0 }
0x101d   :  { %v7818_v20 = vpack.c.bf16 %v7099_v6, %v7099_v6 }
0x101e   :  { %v7101_v52 = vpop.f32.mrf.mxu0 }
0x101f   :  { %7113 = vst [vmem:[#allocation10 + $0x18] sm:$0xf] %v7818_v20  ;;  %v7102_v28 = vadd.f32 %v10967_v13, %v7101_v52 }
0x1020   :  { %v8113_v29 = vpop.f32.mrf.mxu0 }
0x1021   :  { %v7819_v57 = vpack.c.bf16 %v7102_v28, %v7102_v28 }
0x1023   :  { %7114 = vst [vmem:[#allocation10 + $0x38] sm:$0xf] %v7819_v57 }
0x1093   :  { %v7157_v5 = vpop.f32.mrf.mxu1 }
0x1094   :  { %v7158_v51 = vadd.f32 %v10967_v13, %v7157_v5 }
0x1095   :  { %v8132_v15 = vpop.f32.mrf.mxu1 }
0x1096   :  { %v7820_v60 = vpack.c.bf16 %v7158_v51, %v7158_v51 }
0x1097   :  { %v7160_v41 = vpop.f32.mrf.mxu1 }
0x1098   :  { %7172 = vst [vmem:[#allocation10 + $0x1c] sm:$0xf] %v7820_v60  ;;  %v7161_v17 = vadd.f32 %v10967_v13, %v7160_v41 }
0x1099   :  { %v8133_v44 = vpop.f32.mrf.mxu1 }
0x109a   :  { %v7821_v54 = vpack.c.bf16 %v7161_v17, %v7161_v17 }
0x109c   :  { %7173 = vst [vmem:[#allocation10 + $0x3c] sm:$0xf] %v7821_v54 }
0x109d   :  { %8826 = shalt.err (!%p8823_p5)
}
0x109e   :  { %s8851_s14 = smov 512   ;;  %s8852_s15 = smov 32  }
0x109f   :  { %7185 = dma.vmem_to_hbm [thread:$0]  %s7180_s12, 1024, %s10997_s9, [#allocation6], %s8851_s14, %s8851_s14, %s8852_s15  }
0x10a0   :  { %8839 = dma.done.wait [#allocation6], 1024  }
0x10a1   :  { %8840 = vsyncadd [#allocation6], 4294966272 }
0x10a2   :  { %7189 = vsyncpa [#allocation5], 1 }
0x10a3   :  { %7190 = vsyncpa [#allocation8], 1 }
0x10a4   :  { %7191 = vsyncpa [#allocation6], 1 }

</bundles_post_ra>
